<compile_context>
chip_gen: v7x
topology: tpu7x:2x2x1
jax: 0.10.0
libtpu: 0.0.40
codegen_flags: <defaults>
</compile_context>

<pallas_src>
import jax
import jax.numpy as jnp
import numpy as np
from jax import lax
from jax.experimental import pallas as pl
from jax.experimental.pallas import tpu as pltpu

LRELU_SLOPE = 0.1
KERNEL_SIZE = 3
DILATIONS = (1, 3, 5)
# Receptive-field radius of the whole block = sum of the six conv paddings:
# convs1 pads (1, 3, 5) + convs2 pads (1, 1, 1) = 12.
HALO = sum(d * (KERNEL_SIZE - 1) // 2 + (KERNEL_SIZE - 1) // 2 for d in DILATIONS)
MAX_PAD = max(DILATIONS) * (KERNEL_SIZE - 1) // 2  # 5
IM2COL_MIN_C = 256   # below this, per-tap matmuls beat the im2col materialization


def _round_up(x, m):
    return -(-x // m) * m


def _leaky_relu(x):
    return jnp.where(x > 0, x, LRELU_SLOPE * x)


def _make_kernel(C, K, T_true, t_tile, W, pad_alloc, n_t, use_im2col):
    """Builds the kernel closure over the static shape parameters."""
    last_valid = T_true - (n_t - 1) * t_tile
    # Only tiles whose stored columns' receptive field (radius HALO) can touch
    # a sequence end need the per-layer zero-padding mask.
    mask_from = (n_t - 1) if last_valid >= HALO else (n_t - 2)
    always_boundary = (n_t <= 1) or (mask_from <= 1)

    def kernel(x_hbm, w1_ref, b1_ref, w2_ref, b2_ref, o_ref, *scratch):
        if use_im2col:
            xwin_sc, pad_sc, taps_sc, dma_sem = scratch
        else:
            xwin_sc, pad_sc, dma_sem = scratch
            taps_sc = None

        b = pl.program_id(0)
        t = pl.program_id(1)
        start = pl.multiple_of(t * t_tile, t_tile)
        slot = t % 2

        def fetch(tile_idx, slot_idx):
            src = pl.multiple_of(tile_idx * t_tile, t_tile)
            pltpu.make_async_copy(
                x_hbm.at[b, :, pl.ds(src, W)],
                xwin_sc.at[slot_idx],
                dma_sem.at[slot_idx],
            ).start()

        # First time tile of this batch row: nobody prefetched it for us.
        @pl.when(t == 0)
        def _():
            fetch(0, 0)

        # Zero only the MAX_PAD borders of the conv-halo scratch (the centre
        # is fully overwritten before every use).
        pad_sc[:, :MAX_PAD] = jnp.zeros((C, MAX_PAD), jnp.bfloat16)
        pad_sc[:, MAX_PAD + W:] = jnp.zeros((C, pad_alloc - MAX_PAD - W),
                                            jnp.bfloat16)

        # Window columns outside the true sequence [0, T) must behave like
        # nn.Conv1d's per-layer zero padding.
        needs_mask = jnp.logical_or(t == 0, t >= mask_from)
        col = lax.broadcasted_iota(jnp.int32, (1, W), 1) + (start - HALO)
        valid = jnp.logical_and(col >= 0, col < T_true).astype(jnp.float32)

        def store_conv_input(act):
            # One bf16 write per conv; interior tiles skip the mask multiply.
            if always_boundary:
                pad_sc[:, MAX_PAD:MAX_PAD + W] = (act * valid).astype(jnp.bfloat16)
            else:
                @pl.when(needs_mask)
                def _():
                    pad_sc[:, MAX_PAD:MAX_PAD + W] = (act * valid).astype(jnp.bfloat16)

                @pl.when(jnp.logical_not(needs_mask))
                def _():
                    pad_sc[:, MAX_PAD:MAX_PAD + W] = act.astype(jnp.bfloat16)

        def conv(act, w_ref, i, bias, dilation):
            """'same' dilated conv of act (C, W) f32 -> (C, W) f32."""
            pad = dilation * (K - 1) // 2
            store_conv_input(act)
            if use_im2col:
                # Fused (C, K*C) x (K*C, W) MXU matmul, f32 accumulation.
                for k in range(K):
                    off = MAX_PAD + k * dilation - pad            # static
                    taps_sc[k * C:(k + 1) * C, :] = pad_sc[:, off:off + W]
                y = jnp.dot(w_ref[i], taps_sc[...],
                            preferred_element_type=jnp.float32)
            else:
                # Small C: K per-tap (C,C)x(C,W) matmuls straight off the
                # shifted slices; skips the im2col stores that dominate here.
                y = jnp.zeros((C, W), jnp.float32)
                for k in range(K):
                    off = MAX_PAD + k * dilation - pad            # static
                    y = y + jnp.dot(w_ref[i, :, k * C:(k + 1) * C],
                                    pad_sc[:, off:off + W],
                                    preferred_element_type=jnp.float32)
            return y + bias

        # Wait for this tile's window, then immediately start prefetching the
        # next tile's window so its HBM fetch overlaps the 6 convs below.
        pltpu.make_async_copy(
            x_hbm.at[b, :, pl.ds(start, W)], xwin_sc.at[slot], dma_sem.at[slot]
        ).wait()

        @pl.when(t + 1 < pl.num_programs(1))
        def _():
            fetch(t + 1, 1 - slot)

        x = xwin_sc[slot]                        # (C, W) f32 residual stream
        for i, d in enumerate(DILATIONS):
            xt = conv(_leaky_relu(x), w1_ref, i, b1_ref[i], d)
            xt = conv(_leaky_relu(xt), w2_ref, i, b2_ref[i], 1)
            x = xt + x
        # Only the central t_tile columns are exact; lane-dense full store.
        o_ref[...] = x[:, HALO:HALO + t_tile].astype(o_ref.dtype)

    return kernel


def resblock1_pallas(x, w1, b1, w2, b2, *, t_tile=None, force_im2col=False):
    """x: (B, C, T) f32.
    w1/w2: (3, C_out, C_in, K) f32 (PyTorch nn.Conv1d weight layout).
    b1/b2: (3, C) f32."""
    B, C, T = x.shape
    n_layers, C_out, C_in, K = w1.shape
    assert n_layers == len(DILATIONS) and K == KERNEL_SIZE
    assert C_out == C and C_in == C

    # Per-generation VMEM capacity (per TensorCore): 128 MiB v5e/v6e, 64 MiB v7x.
    try:
        vmem_cap = pltpu.get_tpu_info().vmem_capacity_bytes
    except Exception:
        vmem_cap = 64 * 1024 * 1024

    if t_tile is None:
        cap = 1024 if vmem_cap >= (96 << 20) else 512
        t_tile = max(128, min(cap, _round_up(T, 128)))
    assert t_tile % 128 == 0, "keep output tiles lane-dense"

    n_t = -(-T // t_tile)
    t_out = n_t * t_tile
    W = _round_up(t_tile + 2 * HALO, 128)         # lane-aligned compute width
    pad_alloc = _round_up(W + 2 * MAX_PAD, 128)   # zero-haloed scratch width
    use_im2col = force_im2col or (C >= IM2COL_MIN_C)

    # Fuse the K taps into the contraction dim, bf16 for the MXU:
    # (3, Co, Ci, K) -> (3, Co, K*Ci).
    w1f = jnp.transpose(w1, (0, 1, 3, 2)).reshape(n_layers, C, K * C).astype(jnp.bfloat16)
    w2f = jnp.transpose(w2, (0, 1, 3, 2)).reshape(n_layers, C, K * C).astype(jnp.bfloat16)
    b1f = b1.reshape(n_layers, C, 1).astype(jnp.float32)
    b2f = b2.reshape(n_layers, C, 1).astype(jnp.float32)

    # Pre-pad time so every (C, W) window DMA is in-bounds with a static shape.
    # TODO(synk): drop this host-side pad by clamping boundary-tile DMAs
    # in-kernel; the validity mask already supplies the logical zeros.
    T_padded = (n_t - 1) * t_tile + W
    x_pad = jnp.zeros((B, C, T_padded), jnp.float32)
    x_pad = x_pad.at[:, :, HALO:HALO + T].set(x.astype(jnp.float32))

    kernel = _make_kernel(C, K, T, t_tile, W, pad_alloc, n_t, use_im2col)

    scratch = [
        pltpu.VMEM((2, C, W), jnp.float32),          # double-buffered x window
        pltpu.VMEM((C, pad_alloc), jnp.bfloat16),    # zero-haloed conv input
    ]
    if use_im2col:
        scratch.append(pltpu.VMEM((K * C, W), jnp.bfloat16))   # im2col taps
    scratch.append(pltpu.SemaphoreType.DMA((2,)))

    # VMEM budget: single-buffered weights/biases, double-buffered output tile
    # and x window, scratches, plus headroom for f32 temporaries.
    est = (2 * (n_layers * C * K * C * 2 + n_layers * C * 4)   # w (bf16) + b
           + 2 * C * t_tile * 4                                # output tile
           + 2 * C * W * 4                                     # x window
           + C * pad_alloc * 2                                 # bf16 haloed input
           + (K * C * W * 2 if use_im2col else 0)              # bf16 im2col taps
           + 6 * C * W * 4)                                    # live f32 temps
    vmem_hi = max(vmem_cap - (16 << 20), 32 << 20)
    vmem_limit = int(min(max(2 * est, 32 << 20), vmem_hi))

    vmem_space = pltpu.MemorySpace.VMEM
    out = pl.pallas_call(
        kernel,
        out_shape=jax.ShapeDtypeStruct((B, C, t_out), jnp.float32),
        grid_spec=pltpu.PrefetchScalarGridSpec(
            num_scalar_prefetch=0,
            grid=(B, n_t),
            in_specs=[
                pl.BlockSpec(memory_space=pl.ANY),       # x stays in HBM
                pl.BlockSpec(memory_space=vmem_space),   # fused convs1 w (1 buffer)
                pl.BlockSpec(memory_space=vmem_space),   # convs1 bias
                pl.BlockSpec(memory_space=vmem_space),   # fused convs2 w (1 buffer)
                pl.BlockSpec(memory_space=vmem_space),   # convs2 bias
            ],
            out_specs=pl.BlockSpec((pl.Squeezed(), C, t_tile),
                                   lambda b, t: (b, 0, t)),
            scratch_shapes=scratch,
        ),
        compiler_params=pltpu.CompilerParams(
            # "arbitrary" on the time axis is required for the cross-step
            # window prefetch; batch stays "parallel" for megacore.
            dimension_semantics=("parallel", "arbitrary"),
            vmem_limit_bytes=vmem_limit,
        ),
    )(x_pad, w1f, b1f, w2f, b2f)
    return out[:, :, :T]


def resblock1_reference(x, w1, b1, w2, b2):
    """Pure-JAX reference matching PyTorch ResBlock1.forward, with the same
    bf16-operand / f32-accumulation numerics as the kernel's MXU path."""
    K = w1.shape[-1]

    def conv(h, w_oik, b_c, d):
        pad = d * (K - 1) // 2
        y = lax.conv_general_dilated(
            h.astype(jnp.bfloat16), w_oik.astype(jnp.bfloat16),
            window_strides=(1,), padding=[(pad, pad)], rhs_dilation=(d,),
            dimension_numbers=("NCH", "OIH", "NCH"),
            preferred_element_type=jnp.float32)
        return y + b_c[None, :, None]

    out = x.astype(jnp.float32)
    for i, d in enumerate(DILATIONS):
        xt = jnp.where(out > 0, out, LRELU_SLOPE * out)
        xt = conv(xt, w1[i], b1[i], d)
        xt = jnp.where(xt > 0, xt, LRELU_SLOPE * xt)
        xt = conv(xt, w2[i], b2[i], 1)
        out = xt + out
    return out


if __name__ == "__main__":
    B, C, K = 2, 32, KERNEL_SIZE

    key = jax.random.PRNGKey(0)
    k_w1, k_b1, k_w2, k_b2, k_x1, k_x2 = jax.random.split(key, 6)

    # Synthetic parameters in nn.Conv1d layout: weight (C_out, C_in, K), bias (C,).
    w1 = 0.1 * jax.random.normal(k_w1, (3, C, C, K), jnp.float32)
    b1 = 0.1 * jax.random.normal(k_b1, (3, C), jnp.float32)
    w2 = 0.1 * jax.random.normal(k_w2, (3, C, C, K), jnp.float32)
    b2 = 0.1 * jax.random.normal(k_b2, (3, C), jnp.float32)

    # Case 1: multi-tile sequence (T not a tile multiple) exercises boundary
    # masking, the interior no-mask fast path, and the window prefetch.
    x1 = jax.random.normal(k_x1, (B, C, 300), jnp.float32)
    out1 = jax.block_until_ready(resblock1_pallas(x1, w1, b1, w2, b2, t_tile=128))
    ref1 = jax.block_until_ready(resblock1_reference(x1, w1, b1, w2, b2))
    np.testing.assert_allclose(np.asarray(out1), np.asarray(ref1),
                               rtol=2e-3, atol=2e-3)

    # Case 2: auto tile size + the fused im2col path (the C >= 256 codepath).
    x2 = jax.random.normal(k_x2, (B, C, 256), jnp.float32)
    out2 = jax.block_until_ready(
        resblock1_pallas(x2, w1, b1, w2, b2, force_im2col=True))
    ref2 = jax.block_until_ready(resblock1_reference(x2, w1, b1, w2, b2))
    np.testing.assert_allclose(np.asarray(out2), np.asarray(ref2),
                               rtol=2e-3, atol=2e-3)

    print("KERNEL_OK")
</pallas_src>

<mosaic_0001>
module attributes {stable_mosaic.version = 11 : i64} {
  func.func @kernel(%arg0: i32, %arg1: i32, %arg2: memref<2x32x512xf32, #tpu.memory_space<any>>, %arg3: memref<3x32x96xbf16, #tpu.memory_space<vmem>>, %arg4: memref<3x32x1xf32, #tpu.memory_space<vmem>>, %arg5: memref<3x32x96xbf16, #tpu.memory_space<vmem>>, %arg6: memref<3x32x1xf32, #tpu.memory_space<vmem>>, %arg7: memref<1x32x128xf32, #tpu.memory_space<vmem>>, %arg8: memref<2x32x256xf32, #tpu.memory_space<vmem>>, %arg9: memref<32x384xbf16, #tpu.memory_space<vmem>>, %arg10: memref<2x!tpu.dma_semaphore, #tpu.memory_space<semaphore_mem>>) attributes {dimension_semantics = [#tpu.dimension_semantics<parallel>, #tpu.dimension_semantics<arbitrary>], iteration_bounds = array<i64: 2, 3>, scalar_prefetch = 0 : i64, scratch_operands = 3 : i64, tpu.core_type = #tpu.core_type<tc>, window_params = [{}, {pipeline_mode = #tpu.pipeline_mode<synchronous>, transform_indices = @transform_1, window_bounds = array<i64: 3, 32, 96>}, {pipeline_mode = #tpu.pipeline_mode<synchronous>, transform_indices = @transform_2, window_bounds = array<i64: 3, 32, 1>}, {pipeline_mode = #tpu.pipeline_mode<synchronous>, transform_indices = @transform_3, window_bounds = array<i64: 3, 32, 96>}, {pipeline_mode = #tpu.pipeline_mode<synchronous>, transform_indices = @transform_4, window_bounds = array<i64: 3, 32, 1>}, {transform_indices = @transform_5, window_bounds = array<i64: 1, 32, 128>}]} {
    %c128_i32 = arith.constant 128 : i32
    %0 = arith.muli %arg1, %c128_i32 : i32
    %1 = tpu.assume_multiple %0, 128 : i32
    %c2_i32 = arith.constant 2 : i32
    %c0_i32 = arith.constant 0 : i32
    %2 = arith.cmpi eq, %c2_i32, %c0_i32 : i32
    %c1_i32 = arith.constant 1 : i32
    %3 = arith.select %2, %c1_i32, %c2_i32 : i32
    %4 = arith.remsi %arg1, %3 : i32
    %c0_i32_0 = arith.constant 0 : i32
    %5 = arith.cmpi ne, %4, %c0_i32_0 : i32
    %c0_i32_1 = arith.constant 0 : i32
    %6 = arith.cmpi slt, %4, %c0_i32_1 : i32
    %c0_i32_2 = arith.constant 0 : i32
    %7 = arith.cmpi slt, %3, %c0_i32_2 : i32
    %8 = arith.xori %6, %7 : i1
    %9 = arith.andi %8, %5 : i1
    %10 = arith.addi %4, %3 : i32
    %11 = arith.select %9, %10, %4 : i32
    %c0_i32_3 = arith.constant 0 : i32
    %12 = arith.cmpi eq, %arg1, %c0_i32_3 : i32
    %13 = arith.extui %12 : i1 to i32
    %c0_i32_4 = arith.constant 0 : i32
    %14 = arith.cmpi ne, %13, %c0_i32_4 : i32
    scf.if %14 {
      %c0_i32_173 = arith.constant 0 : i32
      %233 = tpu.assume_multiple %c0_i32_173, 128 : i32
      %c0_i32_174 = arith.constant 0 : i32
      %c0_i32_175 = arith.constant 0 : i32
      %c0_i32_176 = arith.constant 0 : i32
      %234 = tpu.memref_slice %arg2[%arg0, %c0_i32_176, %233] : memref<2x32x512xf32, #tpu.memory_space<any>> -> memref<1x32x256xf32, #tpu.memory_space<any>>
      %235 = tpu.memref_squeeze %234 : memref<1x32x256xf32, #tpu.memory_space<any>> -> memref<32x256xf32, #tpu.memory_space<any>>
      %c0_i32_177 = arith.constant 0 : i32
      %c0_i32_178 = arith.constant 0 : i32
      %236 = tpu.memref_slice %arg8[%c0_i32_174, %c0_i32_177, %c0_i32_178] : memref<2x32x256xf32, #tpu.memory_space<vmem>> -> memref<1x32x256xf32, #tpu.memory_space<vmem>>
      %237 = tpu.memref_squeeze %236 : memref<1x32x256xf32, #tpu.memory_space<vmem>> -> memref<32x256xf32, #tpu.memory_space<vmem>>
      %238 = tpu.memref_slice %arg10[%c0_i32_175] : memref<2x!tpu.dma_semaphore, #tpu.memory_space<semaphore_mem>> -> memref<1x!tpu.dma_semaphore, #tpu.memory_space<semaphore_mem>>
      %239 = tpu.memref_squeeze %238 : memref<1x!tpu.dma_semaphore, #tpu.memory_space<semaphore_mem>> -> memref<!tpu.dma_semaphore, #tpu.memory_space<semaphore_mem>>
      tpu.enqueue_dma source(%235 : memref<32x256xf32, #tpu.memory_space<any>>) target(%237 : memref<32x256xf32, #tpu.memory_space<vmem>>) target_semaphore(%239 : memref<!tpu.dma_semaphore, #tpu.memory_space<semaphore_mem>>)
    } else {
    }
    %cst = arith.constant 0.000000e+00 : bf16
    %15 = vector.broadcast %cst : bf16 to vector<32x5xbf16>
    %c0 = arith.constant 0 : index
    %c0_5 = arith.constant 0 : index
    %16 = vector.load %arg9[%c0, %c0_5] : memref<32x384xbf16, #tpu.memory_space<vmem>>, vector<32x5xbf16>
    tpu.vector_store %arg9[%c0, %c0_5], %15 {strides = array<i32>} : memref<32x384xbf16, #tpu.memory_space<vmem>>, vector<32x5xbf16>,
    %cst_6 = arith.constant 0.000000e+00 : bf16
    %17 = vector.broadcast %cst_6 : bf16 to vector<32x123xbf16>
    %c0_7 = arith.constant 0 : index
    %c261 = arith.constant 261 : index
    %18 = vector.load %arg9[%c0_7, %c261] : memref<32x384xbf16, #tpu.memory_space<vmem>>, vector<32x123xbf16>
    tpu.vector_store %arg9[%c0_7, %c261], %17 {strides = array<i32>} : memref<32x384xbf16, #tpu.memory_space<vmem>>, vector<32x123xbf16>,
    %c0_i32_8 = arith.constant 0 : i32
    %19 = arith.cmpi eq, %arg1, %c0_i32_8 : i32
    %c2_i32_9 = arith.constant 2 : i32
    %20 = arith.cmpi sge, %arg1, %c2_i32_9 : i32
    %21 = arith.ori %19, %20 : i1
    %22 = tpu.iota {dimensions = array<i32: 1>} : vector<1x256xi32>
    %c12_i32 = arith.constant 12 : i32
    %23 = arith.subi %1, %c12_i32 : i32
    %24 = vector.broadcast %23 : i32 to vector<1x256xi32>
    %25 = arith.addi %22, %24 : vector<1x256xi32>
    %c0_i32_10 = arith.constant 0 : i32
    %26 = vector.broadcast %c0_i32_10 : i32 to vector<1x256xi32>
    %27 = arith.cmpi sge, %25, %26 : vector<1x256xi32>
    %c300_i32 = arith.constant 300 : i32
    %28 = vector.broadcast %c300_i32 : i32 to vector<1x256xi32>
    %29 = arith.cmpi slt, %25, %28 : vector<1x256xi32>
    %30 = arith.andi %27, %29 : vector<1x256xi1>
    %31 = arith.extui %30 : vector<1x256xi1> to vector<1x256xi32>
    %32 = arith.sitofp %31 : vector<1x256xi32> to vector<1x256xf32>
    %c0_i32_11 = arith.constant 0 : i32
    %33 = tpu.memref_slice %arg2[%arg0, %c0_i32_11, %1] : memref<2x32x512xf32, #tpu.memory_space<any>> -> memref<1x32x256xf32, #tpu.memory_space<any>>
    %34 = tpu.memref_squeeze %33 : memref<1x32x256xf32, #tpu.memory_space<any>> -> memref<32x256xf32, #tpu.memory_space<any>>
    %c0_i32_12 = arith.constant 0 : i32
    %c0_i32_13 = arith.constant 0 : i32
    %35 = tpu.memref_slice %arg8[%11, %c0_i32_12, %c0_i32_13] : memref<2x32x256xf32, #tpu.memory_space<vmem>> -> memref<1x32x256xf32, #tpu.memory_space<vmem>>
    %36 = tpu.memref_squeeze %35 : memref<1x32x256xf32, #tpu.memory_space<vmem>> -> memref<32x256xf32, #tpu.memory_space<vmem>>
    %37 = tpu.memref_slice %arg10[%11] : memref<2x!tpu.dma_semaphore, #tpu.memory_space<semaphore_mem>> -> memref<1x!tpu.dma_semaphore, #tpu.memory_space<semaphore_mem>>
    %38 = tpu.memref_squeeze %37 : memref<1x!tpu.dma_semaphore, #tpu.memory_space<semaphore_mem>> -> memref<!tpu.dma_semaphore, #tpu.memory_space<semaphore_mem>>
    tpu.wait_dma2 semaphore(%38 : memref<!tpu.dma_semaphore, #tpu.memory_space<semaphore_mem>>) src(%34 : memref<32x256xf32, #tpu.memory_space<any>>) dst(%36 : memref<32x256xf32, #tpu.memory_space<vmem>>)
    %c1_i32_14 = arith.constant 1 : i32
    %39 = arith.addi %arg1, %c1_i32_14 : i32
    %c3_i32 = arith.constant 3 : i32
    %40 = arith.cmpi slt, %39, %c3_i32 : i32
    %41 = arith.extui %40 : i1 to i32
    %c0_i32_15 = arith.constant 0 : i32
    %42 = arith.cmpi ne, %41, %c0_i32_15 : i32
    scf.if %42 {
      %c1_i32_173 = arith.constant 1 : i32
      %233 = arith.addi %arg1, %c1_i32_173 : i32
      %c1_i32_174 = arith.constant 1 : i32
      %234 = arith.subi %c1_i32_174, %11 : i32
      %c128_i32_175 = arith.constant 128 : i32
      %235 = arith.muli %233, %c128_i32_175 : i32
      %236 = tpu.assume_multiple %235, 128 : i32
      %c0_i32_176 = arith.constant 0 : i32
      %237 = tpu.memref_slice %arg2[%arg0, %c0_i32_176, %236] : memref<2x32x512xf32, #tpu.memory_space<any>> -> memref<1x32x256xf32, #tpu.memory_space<any>>
      %238 = tpu.memref_squeeze %237 : memref<1x32x256xf32, #tpu.memory_space<any>> -> memref<32x256xf32, #tpu.memory_space<any>>
      %c0_i32_177 = arith.constant 0 : i32
      %c0_i32_178 = arith.constant 0 : i32
      %239 = tpu.memref_slice %arg8[%234, %c0_i32_177, %c0_i32_178] : memref<2x32x256xf32, #tpu.memory_space<vmem>> -> memref<1x32x256xf32, #tpu.memory_space<vmem>>
      %240 = tpu.memref_squeeze %239 : memref<1x32x256xf32, #tpu.memory_space<vmem>> -> memref<32x256xf32, #tpu.memory_space<vmem>>
      %241 = tpu.memref_slice %arg10[%234] : memref<2x!tpu.dma_semaphore, #tpu.memory_space<semaphore_mem>> -> memref<1x!tpu.dma_semaphore, #tpu.memory_space<semaphore_mem>>
      %242 = tpu.memref_squeeze %241 : memref<1x!tpu.dma_semaphore, #tpu.memory_space<semaphore_mem>> -> memref<!tpu.dma_semaphore, #tpu.memory_space<semaphore_mem>>
      tpu.enqueue_dma source(%238 : memref<32x256xf32, #tpu.memory_space<any>>) target(%240 : memref<32x256xf32, #tpu.memory_space<vmem>>) target_semaphore(%242 : memref<!tpu.dma_semaphore, #tpu.memory_space<semaphore_mem>>)
    } else {
    }
    %43 = arith.index_cast %11 : i32 to index
    %c0_16 = arith.constant 0 : index
    %c0_17 = arith.constant 0 : index
    %44 = vector.load %arg8[%43, %c0_16, %c0_17] : memref<2x32x256xf32, #tpu.memory_space<vmem>>, vector<1x32x256xf32>
    %45 = vector.shape_cast %44 : vector<1x32x256xf32> to vector<32x256xf32>
    %cst_18 = arith.constant 0.000000e+00 : f32
    %46 = vector.broadcast %cst_18 : f32 to vector<32x256xf32>
    %47 = arith.cmpf ogt, %45, %46 : vector<32x256xf32>
    %cst_19 = arith.constant 1.000000e-01 : f32
    %48 = vector.broadcast %cst_19 : f32 to vector<32x256xf32>
    %49 = arith.mulf %48, %45 : vector<32x256xf32>
    %50 = arith.select %47, %45, %49 : vector<32x256xi1>, vector<32x256xf32>
    %c0_20 = arith.constant 0 : index
    %c0_21 = arith.constant 0 : index
    %c0_22 = arith.constant 0 : index
    %51 = vector.load %arg4[%c0_20, %c0_21, %c0_22] : memref<3x32x1xf32, #tpu.memory_space<vmem>>, vector<1x32x1xf32>
    %52 = vector.shape_cast %51 : vector<1x32x1xf32> to vector<32x1xf32>
    %53 = arith.extui %21 : i1 to i32
    %c0_i32_23 = arith.constant 0 : i32
    %54 = arith.cmpi ne, %53, %c0_i32_23 : i32
    scf.if %54 {
      %233 = vector.broadcast %32 : vector<1x256xf32> to vector<32x256xf32>
      %234 = arith.mulf %50, %233 : vector<32x256xf32>
      %235 = arith.truncf %234 : vector<32x256xf32> to vector<32x256xbf16>
      %c0_173 = arith.constant 0 : index
      %c5_174 = arith.constant 5 : index
      %236 = vector.load %arg9[%c0_173, %c5_174] : memref<32x384xbf16, #tpu.memory_space<vmem>>, vector<32x256xbf16>
      tpu.vector_store %arg9[%c0_173, %c5_174], %235 {strides = array<i32>} : memref<32x384xbf16, #tpu.memory_space<vmem>>, vector<32x256xbf16>,
    } else {
    }
    %true = arith.constant true
    %55 = arith.xori %21, %true : i1
    %56 = arith.extui %55 : i1 to i32
    %c0_i32_24 = arith.constant 0 : i32
    %57 = arith.cmpi ne, %56, %c0_i32_24 : i32
    scf.if %57 {
      %233 = arith.truncf %50 : vector<32x256xf32> to vector<32x256xbf16>
      %c0_173 = arith.constant 0 : index
      %c5_174 = arith.constant 5 : index
      %234 = vector.load %arg9[%c0_173, %c5_174] : memref<32x384xbf16, #tpu.memory_space<vmem>>, vector<32x256xbf16>
      tpu.vector_store %arg9[%c0_173, %c5_174], %233 {strides = array<i32>} : memref<32x384xbf16, #tpu.memory_space<vmem>>, vector<32x256xbf16>,
    } else {
    }
    %cst_25 = arith.constant 0.000000e+00 : f32
    %58 = vector.broadcast %cst_25 : f32 to vector<32x256xf32>
    %c0_26 = arith.constant 0 : index
    %c0_27 = arith.constant 0 : index
    %c0_28 = arith.constant 0 : index
    %59 = vector.load %arg3[%c0_26, %c0_27, %c0_28] : memref<3x32x96xbf16, #tpu.memory_space<vmem>>, vector<1x32x32xbf16>
    %60 = vector.shape_cast %59 : vector<1x32x32xbf16> to vector<32x32xbf16>
    %c0_29 = arith.constant 0 : index
    %c4 = arith.constant 4 : index
    %61 = vector.load %arg9[%c0_29, %c4] : memref<32x384xbf16, #tpu.memory_space<vmem>>, vector<32x256xbf16>
    %cst_30 = arith.constant dense<0.000000e+00> : vector<32x256xf32>
    %62 = tpu.matmul %60, %61, %cst_30 {dimension_numbers = #tpu.dot_dimension_numbers<[1], [0], [0], [1], [0, 0, 1, 1], [], []>} : vector<32x32xbf16>, vector<32x256xbf16>, vector<32x256xf32> -> vector<32x256xf32>
    %63 = arith.addf %58, %62 : vector<32x256xf32>
    %c0_31 = arith.constant 0 : index
    %c0_32 = arith.constant 0 : index
    %c32 = arith.constant 32 : index
    %64 = vector.load %arg3[%c0_31, %c0_32, %c32] : memref<3x32x96xbf16, #tpu.memory_space<vmem>>, vector<1x32x32xbf16>
    %65 = vector.shape_cast %64 : vector<1x32x32xbf16> to vector<32x32xbf16>
    %c0_33 = arith.constant 0 : index
    %c5 = arith.constant 5 : index
    %66 = vector.load %arg9[%c0_33, %c5] : memref<32x384xbf16, #tpu.memory_space<vmem>>, vector<32x256xbf16>
    %cst_34 = arith.constant dense<0.000000e+00> : vector<32x256xf32>
    %67 = tpu.matmul %65, %66, %cst_34 {dimension_numbers = #tpu.dot_dimension_numbers<[1], [0], [0], [1], [0, 0, 1, 1], [], []>} : vector<32x32xbf16>, vector<32x256xbf16>, vector<32x256xf32> -> vector<32x256xf32>
    %68 = arith.addf %63, %67 : vector<32x256xf32>
    %c0_35 = arith.constant 0 : index
    %c0_36 = arith.constant 0 : index
    %c64 = arith.constant 64 : index
    %69 = vector.load %arg3[%c0_35, %c0_36, %c64] : memref<3x32x96xbf16, #tpu.memory_space<vmem>>, vector<1x32x32xbf16>
    %70 = vector.shape_cast %69 : vector<1x32x32xbf16> to vector<32x32xbf16>
    %c0_37 = arith.constant 0 : index
    %c6 = arith.constant 6 : index
    %71 = vector.load %arg9[%c0_37, %c6] : memref<32x384xbf16, #tpu.memory_space<vmem>>, vector<32x256xbf16>
    %cst_38 = arith.constant dense<0.000000e+00> : vector<32x256xf32>
    %72 = tpu.matmul %70, %71, %cst_38 {dimension_numbers = #tpu.dot_dimension_numbers<[1], [0], [0], [1], [0, 0, 1, 1], [], []>} : vector<32x32xbf16>, vector<32x256xbf16>, vector<32x256xf32> -> vector<32x256xf32>
    %73 = arith.addf %68, %72 : vector<32x256xf32>
    %74 = vector.broadcast %52 : vector<32x1xf32> to vector<32x256xf32>
    %75 = arith.addf %73, %74 : vector<32x256xf32>
    %cst_39 = arith.constant 0.000000e+00 : f32
    %76 = vector.broadcast %cst_39 : f32 to vector<32x256xf32>
    %77 = arith.cmpf ogt, %75, %76 : vector<32x256xf32>
    %cst_40 = arith.constant 1.000000e-01 : f32
    %78 = vector.broadcast %cst_40 : f32 to vector<32x256xf32>
    %79 = arith.mulf %78, %75 : vector<32x256xf32>
    %80 = arith.select %77, %75, %79 : vector<32x256xi1>, vector<32x256xf32>
    %c0_41 = arith.constant 0 : index
    %c0_42 = arith.constant 0 : index
    %c0_43 = arith.constant 0 : index
    %81 = vector.load %arg6[%c0_41, %c0_42, %c0_43] : memref<3x32x1xf32, #tpu.memory_space<vmem>>, vector<1x32x1xf32>
    %82 = vector.shape_cast %81 : vector<1x32x1xf32> to vector<32x1xf32>
    %83 = arith.extui %21 : i1 to i32
    %c0_i32_44 = arith.constant 0 : i32
    %84 = arith.cmpi ne, %83, %c0_i32_44 : i32
    scf.if %84 {
      %233 = vector.broadcast %32 : vector<1x256xf32> to vector<32x256xf32>
      %234 = arith.mulf %80, %233 : vector<32x256xf32>
      %235 = arith.truncf %234 : vector<32x256xf32> to vector<32x256xbf16>
      %c0_173 = arith.constant 0 : index
      %c5_174 = arith.constant 5 : index
      %236 = vector.load %arg9[%c0_173, %c5_174] : memref<32x384xbf16, #tpu.memory_space<vmem>>, vector<32x256xbf16>
      tpu.vector_store %arg9[%c0_173, %c5_174], %235 {strides = array<i32>} : memref<32x384xbf16, #tpu.memory_space<vmem>>, vector<32x256xbf16>,
    } else {
    }
    %true_45 = arith.constant true
    %85 = arith.xori %21, %true_45 : i1
    %86 = arith.extui %85 : i1 to i32
    %c0_i32_46 = arith.constant 0 : i32
    %87 = arith.cmpi ne, %86, %c0_i32_46 : i32
    scf.if %87 {
      %233 = arith.truncf %80 : vector<32x256xf32> to vector<32x256xbf16>
      %c0_173 = arith.constant 0 : index
      %c5_174 = arith.constant 5 : index
      %234 = vector.load %arg9[%c0_173, %c5_174] : memref<32x384xbf16, #tpu.memory_space<vmem>>, vector<32x256xbf16>
      tpu.vector_store %arg9[%c0_173, %c5_174], %233 {strides = array<i32>} : memref<32x384xbf16, #tpu.memory_space<vmem>>, vector<32x256xbf16>,
    } else {
    }
    %cst_47 = arith.constant 0.000000e+00 : f32
    %88 = vector.broadcast %cst_47 : f32 to vector<32x256xf32>
    %c0_48 = arith.constant 0 : index
    %c0_49 = arith.constant 0 : index
    %c0_50 = arith.constant 0 : index
    %89 = vector.load %arg5[%c0_48, %c0_49, %c0_50] : memref<3x32x96xbf16, #tpu.memory_space<vmem>>, vector<1x32x32xbf16>
    %90 = vector.shape_cast %89 : vector<1x32x32xbf16> to vector<32x32xbf16>
    %c0_51 = arith.constant 0 : index
    %c4_52 = arith.constant 4 : index
    %91 = vector.load %arg9[%c0_51, %c4_52] : memref<32x384xbf16, #tpu.memory_space<vmem>>, vector<32x256xbf16>
    %cst_53 = arith.constant dense<0.000000e+00> : vector<32x256xf32>
    %92 = tpu.matmul %90, %91, %cst_53 {dimension_numbers = #tpu.dot_dimension_numbers<[1], [0], [0], [1], [0, 0, 1, 1], [], []>} : vector<32x32xbf16>, vector<32x256xbf16>, vector<32x256xf32> -> vector<32x256xf32>
    %93 = arith.addf %88, %92 : vector<32x256xf32>
    %c0_54 = arith.constant 0 : index
    %c0_55 = arith.constant 0 : index
    %c32_56 = arith.constant 32 : index
    %94 = vector.load %arg5[%c0_54, %c0_55, %c32_56] : memref<3x32x96xbf16, #tpu.memory_space<vmem>>, vector<1x32x32xbf16>
    %95 = vector.shape_cast %94 : vector<1x32x32xbf16> to vector<32x32xbf16>
    %c0_57 = arith.constant 0 : index
    %c5_58 = arith.constant 5 : index
    %96 = vector.load %arg9[%c0_57, %c5_58] : memref<32x384xbf16, #tpu.memory_space<vmem>>, vector<32x256xbf16>
    %cst_59 = arith.constant dense<0.000000e+00> : vector<32x256xf32>
    %97 = tpu.matmul %95, %96, %cst_59 {dimension_numbers = #tpu.dot_dimension_numbers<[1], [0], [0], [1], [0, 0, 1, 1], [], []>} : vector<32x32xbf16>, vector<32x256xbf16>, vector<32x256xf32> -> vector<32x256xf32>
    %98 = arith.addf %93, %97 : vector<32x256xf32>
    %c0_60 = arith.constant 0 : index
    %c0_61 = arith.constant 0 : index
    %c64_62 = arith.constant 64 : index
    %99 = vector.load %arg5[%c0_60, %c0_61, %c64_62] : memref<3x32x96xbf16, #tpu.memory_space<vmem>>, vector<1x32x32xbf16>
    %100 = vector.shape_cast %99 : vector<1x32x32xbf16> to vector<32x32xbf16>
    %c0_63 = arith.constant 0 : index
    %c6_64 = arith.constant 6 : index
    %101 = vector.load %arg9[%c0_63, %c6_64] : memref<32x384xbf16, #tpu.memory_space<vmem>>, vector<32x256xbf16>
    %cst_65 = arith.constant dense<0.000000e+00> : vector<32x256xf32>
    %102 = tpu.matmul %100, %101, %cst_65 {dimension_numbers = #tpu.dot_dimension_numbers<[1], [0], [0], [1], [0, 0, 1, 1], [], []>} : vector<32x32xbf16>, vector<32x256xbf16>, vector<32x256xf32> -> vector<32x256xf32>
    %103 = arith.addf %98, %102 : vector<32x256xf32>
    %104 = vector.broadcast %82 : vector<32x1xf32> to vector<32x256xf32>
    %105 = arith.addf %103, %104 : vector<32x256xf32>
    %106 = arith.addf %105, %45 : vector<32x256xf32>
    %cst_66 = arith.constant 0.000000e+00 : f32
    %107 = vector.broadcast %cst_66 : f32 to vector<32x256xf32>
    %108 = arith.cmpf ogt, %106, %107 : vector<32x256xf32>
    %cst_67 = arith.constant 1.000000e-01 : f32
    %109 = vector.broadcast %cst_67 : f32 to vector<32x256xf32>
    %110 = arith.mulf %109, %106 : vector<32x256xf32>
    %111 = arith.select %108, %106, %110 : vector<32x256xi1>, vector<32x256xf32>
    %c1 = arith.constant 1 : index
    %c0_68 = arith.constant 0 : index
    %c0_69 = arith.constant 0 : index
    %112 = vector.load %arg4[%c1, %c0_68, %c0_69] : memref<3x32x1xf32, #tpu.memory_space<vmem>>, vector<1x32x1xf32>
    %113 = vector.shape_cast %112 : vector<1x32x1xf32> to vector<32x1xf32>
    %114 = arith.extui %21 : i1 to i32
    %c0_i32_70 = arith.constant 0 : i32
    %115 = arith.cmpi ne, %114, %c0_i32_70 : i32
    scf.if %115 {
      %233 = vector.broadcast %32 : vector<1x256xf32> to vector<32x256xf32>
      %234 = arith.mulf %111, %233 : vector<32x256xf32>
      %235 = arith.truncf %234 : vector<32x256xf32> to vector<32x256xbf16>
      %c0_173 = arith.constant 0 : index
      %c5_174 = arith.constant 5 : index
      %236 = vector.load %arg9[%c0_173, %c5_174] : memref<32x384xbf16, #tpu.memory_space<vmem>>, vector<32x256xbf16>
      tpu.vector_store %arg9[%c0_173, %c5_174], %235 {strides = array<i32>} : memref<32x384xbf16, #tpu.memory_space<vmem>>, vector<32x256xbf16>,
    } else {
    }
    %true_71 = arith.constant true
    %116 = arith.xori %21, %true_71 : i1
    %117 = arith.extui %116 : i1 to i32
    %c0_i32_72 = arith.constant 0 : i32
    %118 = arith.cmpi ne, %117, %c0_i32_72 : i32
    scf.if %118 {
      %233 = arith.truncf %111 : vector<32x256xf32> to vector<32x256xbf16>
      %c0_173 = arith.constant 0 : index
      %c5_174 = arith.constant 5 : index
      %234 = vector.load %arg9[%c0_173, %c5_174] : memref<32x384xbf16, #tpu.memory_space<vmem>>, vector<32x256xbf16>
      tpu.vector_store %arg9[%c0_173, %c5_174], %233 {strides = array<i32>} : memref<32x384xbf16, #tpu.memory_space<vmem>>, vector<32x256xbf16>,
    } else {
    }
    %cst_73 = arith.constant 0.000000e+00 : f32
    %119 = vector.broadcast %cst_73 : f32 to vector<32x256xf32>
    %c1_74 = arith.constant 1 : index
    %c0_75 = arith.constant 0 : index
    %c0_76 = arith.constant 0 : index
    %120 = vector.load %arg3[%c1_74, %c0_75, %c0_76] : memref<3x32x96xbf16, #tpu.memory_space<vmem>>, vector<1x32x32xbf16>
    %121 = vector.shape_cast %120 : vector<1x32x32xbf16> to vector<32x32xbf16>
    %c0_77 = arith.constant 0 : index
    %c2 = arith.constant 2 : index
    %122 = vector.load %arg9[%c0_77, %c2] : memref<32x384xbf16, #tpu.memory_space<vmem>>, vector<32x256xbf16>
    %cst_78 = arith.constant dense<0.000000e+00> : vector<32x256xf32>
    %123 = tpu.matmul %121, %122, %cst_78 {dimension_numbers = #tpu.dot_dimension_numbers<[1], [0], [0], [1], [0, 0, 1, 1], [], []>} : vector<32x32xbf16>, vector<32x256xbf16>, vector<32x256xf32> -> vector<32x256xf32>
    %124 = arith.addf %119, %123 : vector<32x256xf32>
    %c1_79 = arith.constant 1 : index
    %c0_80 = arith.constant 0 : index
    %c32_81 = arith.constant 32 : index
    %125 = vector.load %arg3[%c1_79, %c0_80, %c32_81] : memref<3x32x96xbf16, #tpu.memory_space<vmem>>, vector<1x32x32xbf16>
    %126 = vector.shape_cast %125 : vector<1x32x32xbf16> to vector<32x32xbf16>
    %c0_82 = arith.constant 0 : index
    %c5_83 = arith.constant 5 : index
    %127 = vector.load %arg9[%c0_82, %c5_83] : memref<32x384xbf16, #tpu.memory_space<vmem>>, vector<32x256xbf16>
    %cst_84 = arith.constant dense<0.000000e+00> : vector<32x256xf32>
    %128 = tpu.matmul %126, %127, %cst_84 {dimension_numbers = #tpu.dot_dimension_numbers<[1], [0], [0], [1], [0, 0, 1, 1], [], []>} : vector<32x32xbf16>, vector<32x256xbf16>, vector<32x256xf32> -> vector<32x256xf32>
    %129 = arith.addf %124, %128 : vector<32x256xf32>
    %c1_85 = arith.constant 1 : index
    %c0_86 = arith.constant 0 : index
    %c64_87 = arith.constant 64 : index
    %130 = vector.load %arg3[%c1_85, %c0_86, %c64_87] : memref<3x32x96xbf16, #tpu.memory_space<vmem>>, vector<1x32x32xbf16>
    %131 = vector.shape_cast %130 : vector<1x32x32xbf16> to vector<32x32xbf16>
    %c0_88 = arith.constant 0 : index
    %c8 = arith.constant 8 : index
    %132 = vector.load %arg9[%c0_88, %c8] : memref<32x384xbf16, #tpu.memory_space<vmem>>, vector<32x256xbf16>
    %cst_89 = arith.constant dense<0.000000e+00> : vector<32x256xf32>
    %133 = tpu.matmul %131, %132, %cst_89 {dimension_numbers = #tpu.dot_dimension_numbers<[1], [0], [0], [1], [0, 0, 1, 1], [], []>} : vector<32x32xbf16>, vector<32x256xbf16>, vector<32x256xf32> -> vector<32x256xf32>
    %134 = arith.addf %129, %133 : vector<32x256xf32>
    %135 = vector.broadcast %113 : vector<32x1xf32> to vector<32x256xf32>
    %136 = arith.addf %134, %135 : vector<32x256xf32>
    %cst_90 = arith.constant 0.000000e+00 : f32
    %137 = vector.broadcast %cst_90 : f32 to vector<32x256xf32>
    %138 = arith.cmpf ogt, %136, %137 : vector<32x256xf32>
    %cst_91 = arith.constant 1.000000e-01 : f32
    %139 = vector.broadcast %cst_91 : f32 to vector<32x256xf32>
    %140 = arith.mulf %139, %136 : vector<32x256xf32>
    %141 = arith.select %138, %136, %140 : vector<32x256xi1>, vector<32x256xf32>
    %c1_92 = arith.constant 1 : index
    %c0_93 = arith.constant 0 : index
    %c0_94 = arith.constant 0 : index
    %142 = vector.load %arg6[%c1_92, %c0_93, %c0_94] : memref<3x32x1xf32, #tpu.memory_space<vmem>>, vector<1x32x1xf32>
    %143 = vector.shape_cast %142 : vector<1x32x1xf32> to vector<32x1xf32>
    %144 = arith.extui %21 : i1 to i32
    %c0_i32_95 = arith.constant 0 : i32
    %145 = arith.cmpi ne, %144, %c0_i32_95 : i32
    scf.if %145 {
      %233 = vector.broadcast %32 : vector<1x256xf32> to vector<32x256xf32>
      %234 = arith.mulf %141, %233 : vector<32x256xf32>
      %235 = arith.truncf %234 : vector<32x256xf32> to vector<32x256xbf16>
      %c0_173 = arith.constant 0 : index
      %c5_174 = arith.constant 5 : index
      %236 = vector.load %arg9[%c0_173, %c5_174] : memref<32x384xbf16, #tpu.memory_space<vmem>>, vector<32x256xbf16>
      tpu.vector_store %arg9[%c0_173, %c5_174], %235 {strides = array<i32>} : memref<32x384xbf16, #tpu.memory_space<vmem>>, vector<32x256xbf16>,
    } else {
    }
    %true_96 = arith.constant true
    %146 = arith.xori %21, %true_96 : i1
    %147 = arith.extui %146 : i1 to i32
    %c0_i32_97 = arith.constant 0 : i32
    %148 = arith.cmpi ne, %147, %c0_i32_97 : i32
    scf.if %148 {
      %233 = arith.truncf %141 : vector<32x256xf32> to vector<32x256xbf16>
      %c0_173 = arith.constant 0 : index
      %c5_174 = arith.constant 5 : index
      %234 = vector.load %arg9[%c0_173, %c5_174] : memref<32x384xbf16, #tpu.memory_space<vmem>>, vector<32x256xbf16>
      tpu.vector_store %arg9[%c0_173, %c5_174], %233 {strides = array<i32>} : memref<32x384xbf16, #tpu.memory_space<vmem>>, vector<32x256xbf16>,
    } else {
    }
    %cst_98 = arith.constant 0.000000e+00 : f32
    %149 = vector.broadcast %cst_98 : f32 to vector<32x256xf32>
    %c1_99 = arith.constant 1 : index
    %c0_100 = arith.constant 0 : index
    %c0_101 = arith.constant 0 : index
    %150 = vector.load %arg5[%c1_99, %c0_100, %c0_101] : memref<3x32x96xbf16, #tpu.memory_space<vmem>>, vector<1x32x32xbf16>
    %151 = vector.shape_cast %150 : vector<1x32x32xbf16> to vector<32x32xbf16>
    %c0_102 = arith.constant 0 : index
    %c4_103 = arith.constant 4 : index
    %152 = vector.load %arg9[%c0_102, %c4_103] : memref<32x384xbf16, #tpu.memory_space<vmem>>, vector<32x256xbf16>
    %cst_104 = arith.constant dense<0.000000e+00> : vector<32x256xf32>
    %153 = tpu.matmul %151, %152, %cst_104 {dimension_numbers = #tpu.dot_dimension_numbers<[1], [0], [0], [1], [0, 0, 1, 1], [], []>} : vector<32x32xbf16>, vector<32x256xbf16>, vector<32x256xf32> -> vector<32x256xf32>
    %154 = arith.addf %149, %153 : vector<32x256xf32>
    %c1_105 = arith.constant 1 : index
    %c0_106 = arith.constant 0 : index
    %c32_107 = arith.constant 32 : index
    %155 = vector.load %arg5[%c1_105, %c0_106, %c32_107] : memref<3x32x96xbf16, #tpu.memory_space<vmem>>, vector<1x32x32xbf16>
    %156 = vector.shape_cast %155 : vector<1x32x32xbf16> to vector<32x32xbf16>
    %c0_108 = arith.constant 0 : index
    %c5_109 = arith.constant 5 : index
    %157 = vector.load %arg9[%c0_108, %c5_109] : memref<32x384xbf16, #tpu.memory_space<vmem>>, vector<32x256xbf16>
    %cst_110 = arith.constant dense<0.000000e+00> : vector<32x256xf32>
    %158 = tpu.matmul %156, %157, %cst_110 {dimension_numbers = #tpu.dot_dimension_numbers<[1], [0], [0], [1], [0, 0, 1, 1], [], []>} : vector<32x32xbf16>, vector<32x256xbf16>, vector<32x256xf32> -> vector<32x256xf32>
    %159 = arith.addf %154, %158 : vector<32x256xf32>
    %c1_111 = arith.constant 1 : index
    %c0_112 = arith.constant 0 : index
    %c64_113 = arith.constant 64 : index
    %160 = vector.load %arg5[%c1_111, %c0_112, %c64_113] : memref<3x32x96xbf16, #tpu.memory_space<vmem>>, vector<1x32x32xbf16>
    %161 = vector.shape_cast %160 : vector<1x32x32xbf16> to vector<32x32xbf16>
    %c0_114 = arith.constant 0 : index
    %c6_115 = arith.constant 6 : index
    %162 = vector.load %arg9[%c0_114, %c6_115] : memref<32x384xbf16, #tpu.memory_space<vmem>>, vector<32x256xbf16>
    %cst_116 = arith.constant dense<0.000000e+00> : vector<32x256xf32>
    %163 = tpu.matmul %161, %162, %cst_116 {dimension_numbers = #tpu.dot_dimension_numbers<[1], [0], [0], [1], [0, 0, 1, 1], [], []>} : vector<32x32xbf16>, vector<32x256xbf16>, vector<32x256xf32> -> vector<32x256xf32>
    %164 = arith.addf %159, %163 : vector<32x256xf32>
    %165 = vector.broadcast %143 : vector<32x1xf32> to vector<32x256xf32>
    %166 = arith.addf %164, %165 : vector<32x256xf32>
    %167 = arith.addf %166, %106 : vector<32x256xf32>
    %cst_117 = arith.constant 0.000000e+00 : f32
    %168 = vector.broadcast %cst_117 : f32 to vector<32x256xf32>
    %169 = arith.cmpf ogt, %167, %168 : vector<32x256xf32>
    %cst_118 = arith.constant 1.000000e-01 : f32
    %170 = vector.broadcast %cst_118 : f32 to vector<32x256xf32>
    %171 = arith.mulf %170, %167 : vector<32x256xf32>
    %172 = arith.select %169, %167, %171 : vector<32x256xi1>, vector<32x256xf32>
    %c2_119 = arith.constant 2 : index
    %c0_120 = arith.constant 0 : index
    %c0_121 = arith.constant 0 : index
    %173 = vector.load %arg4[%c2_119, %c0_120, %c0_121] : memref<3x32x1xf32, #tpu.memory_space<vmem>>, vector<1x32x1xf32>
    %174 = vector.shape_cast %173 : vector<1x32x1xf32> to vector<32x1xf32>
    %175 = arith.extui %21 : i1 to i32
    %c0_i32_122 = arith.constant 0 : i32
    %176 = arith.cmpi ne, %175, %c0_i32_122 : i32
    scf.if %176 {
      %233 = vector.broadcast %32 : vector<1x256xf32> to vector<32x256xf32>
      %234 = arith.mulf %172, %233 : vector<32x256xf32>
      %235 = arith.truncf %234 : vector<32x256xf32> to vector<32x256xbf16>
      %c0_173 = arith.constant 0 : index
      %c5_174 = arith.constant 5 : index
      %236 = vector.load %arg9[%c0_173, %c5_174] : memref<32x384xbf16, #tpu.memory_space<vmem>>, vector<32x256xbf16>
      tpu.vector_store %arg9[%c0_173, %c5_174], %235 {strides = array<i32>} : memref<32x384xbf16, #tpu.memory_space<vmem>>, vector<32x256xbf16>,
    } else {
    }
    %true_123 = arith.constant true
    %177 = arith.xori %21, %true_123 : i1
    %178 = arith.extui %177 : i1 to i32
    %c0_i32_124 = arith.constant 0 : i32
    %179 = arith.cmpi ne, %178, %c0_i32_124 : i32
    scf.if %179 {
      %233 = arith.truncf %172 : vector<32x256xf32> to vector<32x256xbf16>
      %c0_173 = arith.constant 0 : index
      %c5_174 = arith.constant 5 : index
      %234 = vector.load %arg9[%c0_173, %c5_174] : memref<32x384xbf16, #tpu.memory_space<vmem>>, vector<32x256xbf16>
      tpu.vector_store %arg9[%c0_173, %c5_174], %233 {strides = array<i32>} : memref<32x384xbf16, #tpu.memory_space<vmem>>, vector<32x256xbf16>,
    } else {
    }
    %cst_125 = arith.constant 0.000000e+00 : f32
    %180 = vector.broadcast %cst_125 : f32 to vector<32x256xf32>
    %c2_126 = arith.constant 2 : index
    %c0_127 = arith.constant 0 : index
    %c0_128 = arith.constant 0 : index
    %181 = vector.load %arg3[%c2_126, %c0_127, %c0_128] : memref<3x32x96xbf16, #tpu.memory_space<vmem>>, vector<1x32x32xbf16>
    %182 = vector.shape_cast %181 : vector<1x32x32xbf16> to vector<32x32xbf16>
    %c0_129 = arith.constant 0 : index
    %c0_130 = arith.constant 0 : index
    %183 = vector.load %arg9[%c0_129, %c0_130] : memref<32x384xbf16, #tpu.memory_space<vmem>>, vector<32x256xbf16>
    %cst_131 = arith.constant dense<0.000000e+00> : vector<32x256xf32>
    %184 = tpu.matmul %182, %183, %cst_131 {dimension_numbers = #tpu.dot_dimension_numbers<[1], [0], [0], [1], [0, 0, 1, 1], [], []>} : vector<32x32xbf16>, vector<32x256xbf16>, vector<32x256xf32> -> vector<32x256xf32>
    %185 = arith.addf %180, %184 : vector<32x256xf32>
    %c2_132 = arith.constant 2 : index
    %c0_133 = arith.constant 0 : index
    %c32_134 = arith.constant 32 : index
    %186 = vector.load %arg3[%c2_132, %c0_133, %c32_134] : memref<3x32x96xbf16, #tpu.memory_space<vmem>>, vector<1x32x32xbf16>
    %187 = vector.shape_cast %186 : vector<1x32x32xbf16> to vector<32x32xbf16>
    %c0_135 = arith.constant 0 : index
    %c5_136 = arith.constant 5 : index
    %188 = vector.load %arg9[%c0_135, %c5_136] : memref<32x384xbf16, #tpu.memory_space<vmem>>, vector<32x256xbf16>
    %cst_137 = arith.constant dense<0.000000e+00> : vector<32x256xf32>
    %189 = tpu.matmul %187, %188, %cst_137 {dimension_numbers = #tpu.dot_dimension_numbers<[1], [0], [0], [1], [0, 0, 1, 1], [], []>} : vector<32x32xbf16>, vector<32x256xbf16>, vector<32x256xf32> -> vector<32x256xf32>
    %190 = arith.addf %185, %189 : vector<32x256xf32>
    %c2_138 = arith.constant 2 : index
    %c0_139 = arith.constant 0 : index
    %c64_140 = arith.constant 64 : index
    %191 = vector.load %arg3[%c2_138, %c0_139, %c64_140] : memref<3x32x96xbf16, #tpu.memory_space<vmem>>, vector<1x32x32xbf16>
    %192 = vector.shape_cast %191 : vector<1x32x32xbf16> to vector<32x32xbf16>
    %c0_141 = arith.constant 0 : index
    %c10 = arith.constant 10 : index
    %193 = vector.load %arg9[%c0_141, %c10] : memref<32x384xbf16, #tpu.memory_space<vmem>>, vector<32x256xbf16>
    %cst_142 = arith.constant dense<0.000000e+00> : vector<32x256xf32>
    %194 = tpu.matmul %192, %193, %cst_142 {dimension_numbers = #tpu.dot_dimension_numbers<[1], [0], [0], [1], [0, 0, 1, 1], [], []>} : vector<32x32xbf16>, vector<32x256xbf16>, vector<32x256xf32> -> vector<32x256xf32>
    %195 = arith.addf %190, %194 : vector<32x256xf32>
    %196 = vector.broadcast %174 : vector<32x1xf32> to vector<32x256xf32>
    %197 = arith.addf %195, %196 : vector<32x256xf32>
    %cst_143 = arith.constant 0.000000e+00 : f32
    %198 = vector.broadcast %cst_143 : f32 to vector<32x256xf32>
    %199 = arith.cmpf ogt, %197, %198 : vector<32x256xf32>
    %cst_144 = arith.constant 1.000000e-01 : f32
    %200 = vector.broadcast %cst_144 : f32 to vector<32x256xf32>
    %201 = arith.mulf %200, %197 : vector<32x256xf32>
    %202 = arith.select %199, %197, %201 : vector<32x256xi1>, vector<32x256xf32>
    %c2_145 = arith.constant 2 : index
    %c0_146 = arith.constant 0 : index
    %c0_147 = arith.constant 0 : index
    %203 = vector.load %arg6[%c2_145, %c0_146, %c0_147] : memref<3x32x1xf32, #tpu.memory_space<vmem>>, vector<1x32x1xf32>
    %204 = vector.shape_cast %203 : vector<1x32x1xf32> to vector<32x1xf32>
    %205 = arith.extui %21 : i1 to i32
    %c0_i32_148 = arith.constant 0 : i32
    %206 = arith.cmpi ne, %205, %c0_i32_148 : i32
    scf.if %206 {
      %233 = vector.broadcast %32 : vector<1x256xf32> to vector<32x256xf32>
      %234 = arith.mulf %202, %233 : vector<32x256xf32>
      %235 = arith.truncf %234 : vector<32x256xf32> to vector<32x256xbf16>
      %c0_173 = arith.constant 0 : index
      %c5_174 = arith.constant 5 : index
      %236 = vector.load %arg9[%c0_173, %c5_174] : memref<32x384xbf16, #tpu.memory_space<vmem>>, vector<32x256xbf16>
      tpu.vector_store %arg9[%c0_173, %c5_174], %235 {strides = array<i32>} : memref<32x384xbf16, #tpu.memory_space<vmem>>, vector<32x256xbf16>,
    } else {
    }
    %true_149 = arith.constant true
    %207 = arith.xori %21, %true_149 : i1
    %208 = arith.extui %207 : i1 to i32
    %c0_i32_150 = arith.constant 0 : i32
    %209 = arith.cmpi ne, %208, %c0_i32_150 : i32
    scf.if %209 {
      %233 = arith.truncf %202 : vector<32x256xf32> to vector<32x256xbf16>
      %c0_173 = arith.constant 0 : index
      %c5_174 = arith.constant 5 : index
      %234 = vector.load %arg9[%c0_173, %c5_174] : memref<32x384xbf16, #tpu.memory_space<vmem>>, vector<32x256xbf16>
      tpu.vector_store %arg9[%c0_173, %c5_174], %233 {strides = array<i32>} : memref<32x384xbf16, #tpu.memory_space<vmem>>, vector<32x256xbf16>,
    } else {
    }
    %cst_151 = arith.constant 0.000000e+00 : f32
    %210 = vector.broadcast %cst_151 : f32 to vector<32x256xf32>
    %c2_152 = arith.constant 2 : index
    %c0_153 = arith.constant 0 : index
    %c0_154 = arith.constant 0 : index
    %211 = vector.load %arg5[%c2_152, %c0_153, %c0_154] : memref<3x32x96xbf16, #tpu.memory_space<vmem>>, vector<1x32x32xbf16>
    %212 = vector.shape_cast %211 : vector<1x32x32xbf16> to vector<32x32xbf16>
    %c0_155 = arith.constant 0 : index
    %c4_156 = arith.constant 4 : index
    %213 = vector.load %arg9[%c0_155, %c4_156] : memref<32x384xbf16, #tpu.memory_space<vmem>>, vector<32x256xbf16>
    %cst_157 = arith.constant dense<0.000000e+00> : vector<32x256xf32>
    %214 = tpu.matmul %212, %213, %cst_157 {dimension_numbers = #tpu.dot_dimension_numbers<[1], [0], [0], [1], [0, 0, 1, 1], [], []>} : vector<32x32xbf16>, vector<32x256xbf16>, vector<32x256xf32> -> vector<32x256xf32>
    %215 = arith.addf %210, %214 : vector<32x256xf32>
    %c2_158 = arith.constant 2 : index
    %c0_159 = arith.constant 0 : index
    %c32_160 = arith.constant 32 : index
    %216 = vector.load %arg5[%c2_158, %c0_159, %c32_160] : memref<3x32x96xbf16, #tpu.memory_space<vmem>>, vector<1x32x32xbf16>
    %217 = vector.shape_cast %216 : vector<1x32x32xbf16> to vector<32x32xbf16>
    %c0_161 = arith.constant 0 : index
    %c5_162 = arith.constant 5 : index
    %218 = vector.load %arg9[%c0_161, %c5_162] : memref<32x384xbf16, #tpu.memory_space<vmem>>, vector<32x256xbf16>
    %cst_163 = arith.constant dense<0.000000e+00> : vector<32x256xf32>
    %219 = tpu.matmul %217, %218, %cst_163 {dimension_numbers = #tpu.dot_dimension_numbers<[1], [0], [0], [1], [0, 0, 1, 1], [], []>} : vector<32x32xbf16>, vector<32x256xbf16>, vector<32x256xf32> -> vector<32x256xf32>
    %220 = arith.addf %215, %219 : vector<32x256xf32>
    %c2_164 = arith.constant 2 : index
    %c0_165 = arith.constant 0 : index
    %c64_166 = arith.constant 64 : index
    %221 = vector.load %arg5[%c2_164, %c0_165, %c64_166] : memref<3x32x96xbf16, #tpu.memory_space<vmem>>, vector<1x32x32xbf16>
    %222 = vector.shape_cast %221 : vector<1x32x32xbf16> to vector<32x32xbf16>
    %c0_167 = arith.constant 0 : index
    %c6_168 = arith.constant 6 : index
    %223 = vector.load %arg9[%c0_167, %c6_168] : memref<32x384xbf16, #tpu.memory_space<vmem>>, vector<32x256xbf16>
    %cst_169 = arith.constant dense<0.000000e+00> : vector<32x256xf32>
    %224 = tpu.matmul %222, %223, %cst_169 {dimension_numbers = #tpu.dot_dimension_numbers<[1], [0], [0], [1], [0, 0, 1, 1], [], []>} : vector<32x32xbf16>, vector<32x256xbf16>, vector<32x256xf32> -> vector<32x256xf32>
    %225 = arith.addf %220, %224 : vector<32x256xf32>
    %226 = vector.broadcast %204 : vector<32x1xf32> to vector<32x256xf32>
    %227 = arith.addf %225, %226 : vector<32x256xf32>
    %228 = arith.addf %227, %167 : vector<32x256xf32>
    %229 = vector.extract_strided_slice %228 {offsets = [0, 12], sizes = [32, 128], strides = [1, 1]} : vector<32x256xf32> to vector<32x128xf32>
    %c0_170 = arith.constant 0 : index
    %c0_171 = arith.constant 0 : index
    %c0_172 = arith.constant 0 : index
    %230 = vector.load %arg7[%c0_170, %c0_171, %c0_172] : memref<1x32x128xf32, #tpu.memory_space<vmem>>, vector<1x32x128xf32>
    %231 = vector.shape_cast %230 : vector<1x32x128xf32> to vector<32x128xf32>
    %232 = vector.shape_cast %229 : vector<32x128xf32> to vector<1x32x128xf32>
    tpu.vector_store %arg7[%c0_170, %c0_171, %c0_172], %232 {strides = array<i32>} : memref<1x32x128xf32, #tpu.memory_space<vmem>>, vector<1x32x128xf32>,
    return
  }
  func.func @transform_1(%arg0: i32, %arg1: i32) -> (i32, i32, i32) {
    %c0_i32 = arith.constant 0 : i32
    %c0_i32_0 = arith.constant 0 : i32
    %c0_i32_1 = arith.constant 0 : i32
    %c0_i32_2 = arith.constant 0 : i32
    return %c0_i32, %c0_i32_0, %c0_i32_1 : i32, i32, i32
  }
  func.func @transform_2(%arg0: i32, %arg1: i32) -> (i32, i32, i32) {
    %c0_i32 = arith.constant 0 : i32
    %c0_i32_0 = arith.constant 0 : i32
    %c0_i32_1 = arith.constant 0 : i32
    %c0_i32_2 = arith.constant 0 : i32
    return %c0_i32, %c0_i32_0, %c0_i32_1 : i32, i32, i32
  }
  func.func @transform_3(%arg0: i32, %arg1: i32) -> (i32, i32, i32) {
    %c0_i32 = arith.constant 0 : i32
    %c0_i32_0 = arith.constant 0 : i32
    %c0_i32_1 = arith.constant 0 : i32
    %c0_i32_2 = arith.constant 0 : i32
    return %c0_i32, %c0_i32_0, %c0_i32_1 : i32, i32, i32
  }
  func.func @transform_4(%arg0: i32, %arg1: i32) -> (i32, i32, i32) {
    %c0_i32 = arith.constant 0 : i32
    %c0_i32_0 = arith.constant 0 : i32
    %c0_i32_1 = arith.constant 0 : i32
    %c0_i32_2 = arith.constant 0 : i32
    return %c0_i32, %c0_i32_0, %c0_i32_1 : i32, i32, i32
  }
  func.func @transform_5(%arg0: i32, %arg1: i32) -> (i32, i32, i32) {
    %c0_i32 = arith.constant 0 : i32
    %c0_i32_0 = arith.constant 0 : i32
    return %arg0, %c0_i32, %arg1 : i32, i32, i32
  }
}

</mosaic_0001>

<bundles_post_ra>
// kernel: tpu_custom_call.1
= control target key start
LH: loop header
LB: loop body
LE: loop exit
PB: predicated region body
PF: predicated region fallthrough
CT: control target
= control target key end

     0   :  { %10 = vsyncpa [#allocation6], 0  ;;  %s4560_s0 = inlined_call_operand.hbm [shape: f32[2,32,512], index: 0, kind: input, shape index: {}]   ;;  %s4561_s1 = inlined_call_operand.vmem [shape: bf16[3,32,96], index: 1, kind: input, shape index: {}]   ;;  %s4562_s2 = inlined_call_operand.vmem [shape: f32[3,32,1], index: 2, kind: input, shape index: {}]   ;;  %s4563_s3 = inlined_call_operand.vmem [shape: bf16[3,32,96], index: 3, kind: input, shape index: {}]   ;;  %s4564_s4 = inlined_call_operand.vmem [shape: f32[3,32,1], index: 4, kind: input, shape index: {}]   ;;  %s4565_s5 = inlined_call_operand.hbm [shape: f32[2,32,384], index: 5, kind: output, shape index: {}]  }
   0x1   :  { %12 = vsyncpa [#allocation6 + $0x1], 0  ;;  %s3468_s18 = smov 0   ;;  %s3470_s19 = smov 0  }
   0x2   :  { %s3472_s20 = smov 0   ;;  %s3474_s21 = smov 0  }
   0x3   :  { %s3476_s22 = smov 0   ;;  %s3478_s23 = smov 0  }
   0x4   :  { %s3480_s24 = smov 0   ;;  %s3482_s25 = smov 0  }
   0x5 LB: > { %4580 = sst [smem:[#allocation11_spill]] %s3377_s18  ;;  %s2911_s26 = sadd.s32 4294967295, %s3405_s25   ;;  %s3405_s25 = sphi %s3482_s25, %s18_s25   ;;  %s3401_s24 = sphi %s3480_s24, %s4622_s24   ;;  %s3397_s23 = sphi %s3478_s23, %s4621_s23   ;;  %s3393_s22 = sphi %s3476_s22, %s4620_s22   ;;  %s3389_s21 = sphi %s3474_s21, %s4626_s21   ;;  %s3385_s20 = sphi %s3472_s20, %s4625_s20   ;;  %s3381_s19 = sphi %s3470_s19, %s4624_s19   ;;  %s3377_s18 = sphi %s3468_s18, %s4623_s18  }
   0x6   : > { %4581 = sst [smem:[#allocation12_spill]] %s3385_s20  ;;  %s2912_s27 = sadd.s32 4294967294, %s3405_s25  }
   0x7   : > { %4582 = sst [smem:[#allocation13_spill]] %s3397_s23  ;;  %s27_s28 = sadd.s32 1, %s3397_s23 }
   0x8   : > { %4583 = sst [smem:[#allocation14_spill]] %s3401_s24  ;;  %p28_p0 = scmp.ge.s32.totalorder %s27_s28, 3 }
   0x9   : > { %s30_s29 = sadd.s32 1, %s3401_s24  ;;  %p133_p1 = scmp.ne.s32.totalorder %s3385_s20, %s3381_s19 }
   0xa   : > { %p134_p2 = scmp.eq.s32.totalorder %s2911_s26, 5  ;;  %s4628_s28 = smov (%p28_p0, %s27_s28), 0 }
   0xb   : > { %4584 = sst [smem:[#allocation15_spill]] %s4628_s28  ;;  %s4630_s29 = smov (!%p28_p0, %s30_s29), %s3401_s24 }
   0xc   : > { %s119_s30 = ssub.s32 %s3397_s23, %s4628_s28  ;;  %p3519_p3 = por %p134_p2, %p133_p1 }
   0xd   : > { %p32_p4 = scmp.ge.s32.totalorder %s4630_s29, 2  ;;  %p139_p5 = scmp.ne.s32.totalorder %s3381_s19, %s3377_s18 }
   0xe   : > { %s4585_s6 = scalar_select %p3519_p3, 1, 0 }
   0xf   : > { %p140_p6 = scmp.eq.s32.totalorder %s2912_s27, 5  ;;  %p2914_p7 = scmp.ge.s32.totalorder %s3405_s25, 1 }
  0x10   : > { %s4632_s29 = smov (%p32_p4, %s4630_s29), 0  ;;  %p170_p9 = scmp.lt.s32.totalorder %s3405_s25, 7 }
  0x11   : > { %4586 = sst [smem:[#allocation16_spill]] %s4632_s29  ;;  %p3528_p8 = por %p140_p6, %p139_p5 }
  0x12   : > { %s118_s8 = ssub.s32 %s3401_s24, %s4632_s29  ;;  %s123_s9 = sadd.s32 1, %s3385_s20 }
  0x13   : > { %s4587_s7 = scalar_select %p3528_p8, 1, 0 }
  0x14   : > { %s120_s10 = sor.u32 %s119_s30, %s118_s8  ;;  %p171_p10 = pnand %p2914_p7, %p170_p9 }
  0x15   : > { %4588 = sst [smem:[#allocation17_spill]] %s4587_s7  ;;  %p121_p11 = scmp.eq.s32.totalorder %s120_s10, 0  ;;  %vm218_vm0 = vcmask (!%p171_p10), 39936   ;;  %v3407_v0 = vmov (!%p171_p10), 0   ;;  %vm221_vm1 = vcmask (!%p171_p10), 1047592   ;;  %v226_v1 = vlaneseq (!%p171_p10) }
  0x16   : > { %174 = sbr.rel (%p171_p10) target bundleno = 4101 (0x1005), region = 36  ;;  %s4566_s12 = sand.u32 (!%p171_p10), 1, %s3381_s19   ;;  %219 = vst.msk [vmem:[#allocation3] sm:$0xff] (!%p171_p10), %vm218_vm0, %v3407_v0  ;;  %220 = vst.msk [vmem:[#allocation3 + $0x18] sm:$0xff] (!%p171_p10), %vm218_vm0, %v3407_v0 }
  0x17   : > { %s3537_s11 = scalar_select %p121_p11, %s3385_s20, %s123_s9  }
  0x18   : > { %s3543_s14 = sshll.u32 (!%p171_p10), %s4566_s12, 5  ;;  %p193_p12 = scmp.lt.s32.totalorder (!%p171_p10), %s3389_s21, 0  ;;  %222 = vst.msk [vmem:[#allocation3 + $0x10] sm:$0xff] (!%p171_p10), %vm221_vm1, %v3407_v0  ;;  %223 = vst.msk [vmem:[#allocation3 + $0x28] sm:$0xff] (!%p171_p10), %vm221_vm1, %v3407_v0  ;;  %v227_v2 = vand.u32 (!%p171_p10), 127, %v226_v1 }
  0x19   : > { %4589 = sst [smem:[#allocation18_spill]] %s3537_s11  ;;  %s194_s15 = ssub.s32 (!%p171_p10), 0, %s3389_s21 }
  0x1a   : > { %s2917_s16 = smin.u32 (!%p171_p10), %s3389_s21, %s194_s15  ;;  %p205_p13 = scmp.eq.s32.totalorder (!%p171_p10), %s3389_s21, 0  ;;  %v228_v3 = vadd.s32 (!%p171_p10), 128, %v227_v2 }
  0x1b   : > { %s196_s17 = sand.u32 (!%p171_p10), 1, %s2917_s16   ;;  %s3020_s27 = sshll.u32 (!%p171_p10), %s3393_s22, 11 }
  0x1c   : > { %s197_s26 = ssub.s32 (!%p171_p10), 0, %s196_s17  ;;  %s3563_s9 = scalar_lea.hbm (!%p171_p10), %s4560_s0, %s3020_s27 }
  0x1d   : > { %s4634_s26 = smov (!%p193_p12, %s197_s26), %s196_s17  ;;  %s3408_s15 = smov [#allocation2]  }
  0x1e   : > { %p2919_p0 = scmp.lt.s32.totalorder %s4634_s26, 0  ;;  %s203_s10 = sadd.s32 2, %s4634_s26 }
  0x1f   : > { %s214_s16 = sshll.u32 %s3408_s15, 4  ;;  %s3253_s17 = scalar_lea.hbm %s3563_s9, 1024  ;;  %s3567_s16 = int_to_ptr.vmem [resolvable:$true] %s214_s16 }
  0x20   : > { %s4636_s10 = smov (!%p2919_p0, %s203_s10), %s4634_s26  ;;  %p3254_p2 = scmp.ne.s32.totalorder %s3563_s9, %s3253_s17 }
  0x21   : > { %s4571_s8 = scalar_lea.hbm %s4560_s0, 4096  ;;  %p3258_p6 = scmp.lt.u32.totalorder %s3563_s9, %s4560_s0 }
  0x22   : > { %p3255_p4 = pnand %p3254_p2, %p205_p13  ;;  %p3259_p7 = scmp.lt.u32.totalorder %s4571_s8, %s3253_s17 }
  0x23   : > { %p3261_p10 = scmp.lt.u32.totalorder %s3253_s17, %s3563_s9 }
  0x24   : > { %p3256_p5 = pneg %p3255_p4  ;;  %p3260_p9 = por %p3259_p7, %p3258_p6 }
  0x26   : > { %p3262_p11 = por %p3261_p10, %p3260_p9 }
  0x28   : > { %p3263_p12 = pnand %p3262_p11, %p3256_p5 }
  0x2a   : > { %3266 = shalt.err (!%p3263_p12)  }
  0x2b   : > { %s3267_s27 = scalar_lea.vmem %s3567_s16, 1024  ;;  %s4567_s12 = scalar_lea.vmem %s3567_s16, 2048 }
  0x2c   : > { %p3268_p0 = scmp.ne.s32.totalorder %s3567_s16, %s3267_s27  ;;  %p3274_p1 = scmp.lt.s32.totalorder %s3567_s16, %s3567_s16 }
  0x2d   : > { %p3275_p6 = scmp.lt.s32.totalorder %s4567_s12, %s3267_s27 }
  0x2e   : > { %p3269_p2 = pnand %p3268_p0, %p205_p13 }
  0x2f   : > { %p3276_p7 = por %p3275_p6, %p3274_p1 }
  0x30   : > { %p3270_p4 = pneg %p3269_p2 }
  0x32   : > { %p3277_p9 = pnand %p3276_p7, %p3270_p4 }
  0x34   : > { %3280 = shalt.err (!%p3277_p9)  }
  0x35   : > { %s4568_s13 = smov 512   ;;  %s4569_s17 = smov 256   ;;  %v3412_v7 = vmov 0.0  }
  0x36   : > { %s4570_s30 = smov 16   ;;  %p4590_p5 = scmp.ge.s32.totalorder %s3389_s21, 2 }
  0x37   : > { %3123 = dma.hbm_to_vmem [thread:$0]  (%p205_p13), %s3563_s9, 1024, %s3567_s16, [#allocation4], %s4568_s13, %s4569_s17, %s4570_s30 }
  0x38   : > { %p3606_p1 = por %p4590_p5, %p205_p13  ;;  %s4592_s26 = sshll.u32 %s3389_s21, 7 }
  0x39   : > { %s2923_s27 = sadd.s32 4294967284, %s4592_s26  ;;  %s3021_s12 = sshll.u32 %s4636_s10, 6 }
  0x3a   : > { %s4591_s15 = scalar_select %p3606_p1, 1, 0  ;;  %v230_v4 = vstv %s2923_s27 }
  0x3b   : > { %v231_v5 = vadd.s32 %v230_v4, %v227_v2  ;;  %v232_v6 = vadd.s32 %v230_v4, %v228_v3  ;;  %s3618_s9 = scalar_lea.vmem [#allocation5], %s3543_s14  ;;  %s3620_s13 = scalar_lea.vmem [#allocation2], %s3021_s12 }
  0x3c   : > { %s246_s26 = scalar_lea.sflag [#allocation4], %s4636_s10 }
  0x3d   : > { %vm233_vm2 = vcmp.ge.s32.totalorder %v231_v5, 0  ;;  %vm234_vm3 = vcmp.ge.s32.totalorder %v232_v6, 0  ;;  %vm235_vm4 = vcmp.lt.s32.totalorder %v231_v5, 300  ;;  %vm236_vm5 = vcmp.lt.s32.totalorder %v232_v6, 300 }
  0x3e   : > { %vm237_vm6 = vmand %vm233_vm2, %vm235_vm4 }
  0x3f   : > { %vm238_vm7 = vmand %vm234_vm3, %vm236_vm5  ;;  %v3613_v8 = vsel %vm237_vm6, 1.0, %v3412_v7 }
  0x40   : > { %v3615_v9 = vsel %vm238_vm7, 1.0, %v3412_v7 }
  0x41   : > { %3369 = dma.done.wait %s246_s26, 1024 }
  0x42   : > { %3370 = vsyncadd %s246_s26, 4294966272  ;;  %s251_s27 = sadd.s32 1, %s3389_s21  ;;  %s256_s17 = ssub.s32 1, %s4636_s10  ;;  %v3640_v10 = vld [vmem:[%s4562_s2] sm:$0xff]  ;;  %v3645_v11 = vld [vmem:[%s4562_s2 + $0x8] sm:$0xff] }
  0x43   : > { %p3625_p13 = scmp.lt.s32.totalorder %s251_s27, 3  ;;  %s4594_s8 = sshll.u32 %s3389_s21, 7  ;;  %v3650_v12 = vld [vmem:[%s4562_s2 + $0x10] sm:$0xff]  ;;  %v3655_v13 = vld [vmem:[%s4562_s2 + $0x18] sm:$0xff] }
  0x44   : > { %s3023_s29 = sadd.s32 128, %s4594_s8  ;;  %s2930_s28 = sshll.u32 %s3393_s22, 4 }
  0x45   : > { %s258_s14 = sshra.s32 %s3023_s29, 7  ;;  %s3024_s12 = sshll.u32 %s256_s17, 6 }
  0x46   : > { %s261_s24 = sadd.s32 %s2930_s28, %s258_s14  ;;  %s266_s10 = scalar_lea.vmem [#allocation2], %s3024_s12 }
  0x47   : > { %s2931_s23 = sshll.u32 %s261_s24, 7  ;;  %s269_s27 = sshll.u32 %s266_s10, 4  ;;  %s270_s27 = int_to_ptr.vmem [resolvable:$true] %s269_s27 }
  0x48   : > { %s3635_s20 = scalar_lea.hbm %s4560_s0, %s2931_s23  ;;  %s267_s14 = scalar_lea.sflag [#allocation4], %s256_s17 }
  0x49   : > { %s3281_s18 = scalar_lea.hbm %s3635_s20, 1024  ;;  %p3286_p0 = scmp.lt.u32.totalorder %s3635_s20, %s4560_s0 }
  0x4a   : > { %p3282_p10 = scmp.ne.s32.totalorder %s3635_s20, %s3281_s18  ;;  %s4595_s29 = scalar_lea.hbm %s4560_s0, 4096 }
  0x4b   : > { %p3287_p2 = scmp.lt.u32.totalorder %s4595_s29, %s3281_s18  ;;  %p3289_p6 = scmp.lt.u32.totalorder %s3281_s18, %s3635_s20 }
  0x4c   : > { %p3283_p11 = pnand %p3282_p10, %p3625_p13 }
  0x4d   : > { %p3288_p4 = por %p3287_p2, %p3286_p0 }
  0x4e   : > { %p3284_p12 = pneg %p3283_p11 }
  0x4f   : > { %p3290_p7 = por %p3289_p6, %p3288_p4 }
  0x51   : > { %p3291_p9 = pnand %p3290_p7, %p3284_p12 }
  0x53   : > { %3294 = shalt.err (!%p3291_p9)  }
  0x54   : > { %s3295_s17 = scalar_lea.vmem %s270_s27, 1024  ;;  %p3302_p8 = scmp.lt.s32.totalorder %s270_s27, %s3567_s16 }
  0x55   : > { %p3296_p5 = scmp.ne.s32.totalorder %s270_s27, %s3295_s17  ;;  %s4596_s8 = scalar_lea.vmem %s3567_s16, 2048 }
  0x56   : > { %p3303_p3 = scmp.lt.s32.totalorder %s4596_s8, %s3295_s17 }
  0x57   : > { %p3297_p10 = pnand %p3296_p5, %p3625_p13 }
  0x58   : > { %p3304_p1 = por %p3303_p3, %p3302_p8 }
  0x59   : > { %p3298_p11 = pneg %p3297_p10 }
  0x5b   : > { %p3305_p0 = pnand %p3304_p1, %p3298_p11 }
  0x5d   : > { %3308 = shalt.err (!%p3305_p0)  }
  0x5e   : > { %s4597_s24 = smov 16   ;;  %s4598_s28 = smov 256  }
  0x5f   : > { %s4599_s23 = smov 512   ;;  %p4600_p3 = scmp.ne.s32.totalorder %s4591_s15, 0 }
  0x60   : > { %3125 = dma.hbm_to_vmem [thread:$0]  (%p3625_p13), %s3635_s20, 1024, %s270_s27, %s267_s14, %s4599_s23, %s4598_s28, %s4597_s24 }
  0x61   : > { %v3682_v14 = vld [vmem:[%s3620_s13] sm:$0xff]  ;;  %v3685_v15 = vld [vmem:[%s3620_s13 + $0x8] sm:$0xff]  ;;  %v3688_v16 = vld [vmem:[%s3620_s13 + $0x10] sm:$0xff]  ;;  %s3413_s20 = smov (%p4600_p3), 5  }
  0x62   : > { %v3691_v17 = vld [vmem:[%s3620_s13 + $0x18] sm:$0xff]  ;;  %v3694_v18 = vld [vmem:[%s3620_s13 + $0x20] sm:$0xff]  ;;  %v3697_v19 = vld [vmem:[%s3620_s13 + $0x28] sm:$0xff]  ;;  %vm281_vm8 = vcmp.gt.f32.partialorder %v3682_v14, 0.0  ;;  %vm282_vm9 = vcmp.gt.f32.partialorder %v3685_v15, 0.0  ;;  %vm283_vm10 = vcmp.gt.f32.partialorder %v3688_v16, 0.0 }
  0x63   : > { %v3702_v20 = vld [vmem:[%s3620_s13 + $0x30] sm:$0xff]  ;;  %v3705_v21 = vld [vmem:[%s3620_s13 + $0x38] sm:$0xff]  ;;  %vm284_vm11 = vcmp.gt.f32.partialorder %v3691_v17, 0.0  ;;  %vm285_vm12 = vcmp.gt.f32.partialorder %v3694_v18, 0.0  ;;  %vm286_vm13 = vcmp.gt.f32.partialorder %v3697_v19, 0.0  ;;  %311 = sbr.rel (!%p4600_p3) target bundleno = 230 (0xe6), region = 48 }
  0x64   : > { %vm287_vm14 = vcmp.gt.f32.partialorder %v3702_v20, 0.0  ;;  %vm288_vm15 = vcmp.gt.f32.partialorder %v3705_v21, 0.0  ;;  %v289_v22 = vmul.f32 0.1, %v3682_v14  ;;  %v290_v23 = vmul.f32 0.1, %v3685_v15 }
  0x65   : > { %v291_v24 = vmul.f32 0.1, %v3688_v16  ;;  %v292_v25 = vmul.f32 0.1, %v3691_v17  ;;  %v293_v26 = vmul.f32 0.1, %v3694_v18 }
  0x66   : > { %v294_v27 = vmul.f32 0.1, %v3697_v19  ;;  %v295_v28 = vmul.f32 0.1, %v3702_v20  ;;  %v296_v29 = vmul.f32 0.1, %v3705_v21  ;;  %v297_v30 = vsel %vm281_vm8, %v3682_v14, %v289_v22 }
  0x67   : > { %v298_v31 = vsel %vm282_vm9, %v3685_v15, %v290_v23  ;;  %v299_v32 = vsel %vm283_vm10, %v3688_v16, %v291_v24  ;;  %v300_v33 = vsel %vm284_vm11, %v3691_v17, %v292_v25  ;;  %v301_v34 = vsel %vm285_vm12, %v3694_v18, %v293_v26 }
  0x68   : > { %v302_v35 = vsel %vm286_vm13, %v3697_v19, %v294_v27  ;;  %v303_v36 = vsel %vm287_vm14, %v3702_v20, %v295_v28  ;;  %v304_v37 = vsel %vm288_vm15, %v3705_v21, %v296_v29  ;;  %v316_v38 = vmul.f32 (%p4600_p3), %v3613_v8, %v301_v34 }
  0x69   : > { %v318_v39 = vmul.f32 (%p4600_p3), %v3613_v8, %v303_v36  ;;  %v312_v40 = vmul.f32 (%p4600_p3), %v3613_v8, %v297_v30  ;;  %v314_v41 = vmul.f32 (%p4600_p3), %v3613_v8, %v299_v32  ;;  %v317_v42 = vmul.f32 (%p4600_p3), %v3615_v9, %v302_v35 }
  0x6a   : > { %v319_v43 = vmul.f32 %v3615_v9, %v304_v37  ;;  %v313_v44 = vmul.f32 %v3615_v9, %v298_v31  ;;  %v315_v45 = vmul.f32 %v3615_v9, %v300_v33 }
  0x6b   : > { %v322_v46 = vpack.c.bf16 %v318_v39, %v316_v38  ;;  %v320_v47 = vpack.c.bf16 %v314_v41, %v312_v40 }
  0x6c   : > { %v323_v48 = vpack.c.bf16 %v319_v43, %v317_v42  ;;  %v321_v49 = vpack.c.bf16 %v315_v45, %v313_v44 }
  0x6d   : > { %332 = vrot.lane.b32.xlu1 %v322_v46, %s3413_s20  ;;  %328 = vrot.lane.b32.xlu0 %v320_v47, %s3413_s20 }
  0x71   : > { %334 = vrot.lane.b32.xlu1 %v323_v48, %s3413_s20  ;;  %330 = vrot.lane.b32.xlu0 %v321_v49, %s3413_s20 }
  0xdf   : > { %v333_v50 = vpop.permute.xlu1 %332  ;;  %v329_v51 = vpop.permute.xlu0 %328 }
  0xe0   : > { %348 = vst.msk [vmem:[#allocation3 + $0x18] sm:$0xff] %vm221_vm1, %v333_v50  ;;  %345 = vst.msk [vmem:[#allocation3] sm:$0xff] %vm221_vm1, %v329_v51 }
  0xe3   : > { %v335_v52 = vpop.permute.xlu1 %334  ;;  %v331_v53 = vpop.permute.xlu0 %330 }
  0xe4   : > { %v338_v54 = vsel %vm218_vm0, %v333_v50, %v335_v52  ;;  %350 = vst.msk [vmem:[#allocation3 + $0x28] sm:$0xff] %vm218_vm0, %v335_v52  ;;  %v337_v55 = vsel %vm218_vm0, %v329_v51, %v331_v53  ;;  %347 = vst.msk [vmem:[#allocation3 + $0x10] sm:$0xff] %vm218_vm0, %v331_v53 }
  0xe5   : > { %349 = vst [vmem:[#allocation3 + $0x20] sm:$0xff] %v338_v54  ;;  %346 = vst [vmem:[#allocation3 + $0x8] sm:$0xff] %v337_v55 }
  0xe6 PF: > { %p4601_p8 = scmp.ne.s32.totalorder %s4591_s15, 0 }
  0xe7   : > { %v356_v56 = vpack.c.bf16 (!%p4601_p8), %v303_v36, %v301_v34  ;;  %v354_v57 = vpack.c.bf16 (!%p4601_p8), %v299_v32, %v297_v30  ;;  %s3414_s16 = smov (!%p4601_p8), 5   ;;  %v357_v58 = vpack.c.bf16 (!%p4601_p8), %v304_v37, %v302_v35  ;;  %v355_v59 = vpack.c.bf16 (!%p4601_p8), %v300_v33, %v298_v31 }
  0xe8   : > { %353 = sbr.rel (%p4601_p8) target bundleno = 354 (0x162), region = 52 }
  0xe9   : > { %366 = vrot.lane.b32.xlu1 (!%p4601_p8), %v356_v56, %s3414_s16  ;;  %362 = vrot.lane.b32.xlu0 (!%p4601_p8), %v354_v57, %s3414_s16 }
  0xed   : > { %368 = vrot.lane.b32.xlu1 (!%p4601_p8), %v357_v58, %s3414_s16  ;;  %364 = vrot.lane.b32.xlu0 (!%p4601_p8), %v355_v59, %s3414_s16 }
 0x15b   : > { %v367_v60 = vpop.permute.xlu1 %366  ;;  %v363_v61 = vpop.permute.xlu0 %362 }
 0x15c   : > { %382 = vst.msk [vmem:[#allocation3 + $0x18] sm:$0xff] %vm221_vm1, %v367_v60  ;;  %379 = vst.msk [vmem:[#allocation3] sm:$0xff] %vm221_vm1, %v363_v61 }
 0x15f   : > { %v369_v62 = vpop.permute.xlu1 %368  ;;  %v365_v63 = vpop.permute.xlu0 %364 }
 0x160   : > { %v372_v1 = vsel %vm218_vm0, %v367_v60, %v369_v62  ;;  %384 = vst.msk [vmem:[#allocation3 + $0x28] sm:$0xff] %vm218_vm0, %v369_v62  ;;  %v371_v2 = vsel %vm218_vm0, %v363_v61, %v365_v63  ;;  %381 = vst.msk [vmem:[#allocation3 + $0x10] sm:$0xff] %vm218_vm0, %v365_v63 }
 0x161   : > { %383 = vst [vmem:[#allocation3 + $0x20] sm:$0xff] %v372_v1  ;;  %380 = vst [vmem:[#allocation3 + $0x8] sm:$0xff] %v371_v2 }
 0x162 PF: > { %475 = vmatprep.mubr.bf16.mxu0 %v3407_v0  ;;  %3229 = vset.pattern.permute.xlu0 %v3407_v0  ;;  %s3415_s13 = smov 123   ;;  %v3781_v23 = vld [vmem:[%s4561_s1] sm:$0xff]   ;;  %s3416_s11 = smov 124   ;;  %v3789_v24 = vld [vmem:[%s4561_s1 + $0x8] sm:$0xff]   ;;  %vm427_vm2 = vcmask 1006592   ;;  %vm436_vm3 = vcmask 261120  }
 0x163   : > { %v389_v4 = vld [vmem:[#allocation3] sm:$0xff]  ;;  %3230 = vset.pattern.permute.xlu1 %v3407_v0  ;;  %v392_v22 = vld [vmem:[#allocation3 + $0x18] sm:$0xff]  ;;  %s3417_s14 = smov 96   ;;  %s3418_s12 = smov 122   ;;  %vm508_vm4 = vcmask 1014784   ;;  %vm592_vm5 = vcmask 998400  }
 0x164   : > { %415 = vrot.lane.b32.xlu1 %v389_v4, %s3415_s13  ;;  %s3419_s26 = smov 64   ;;  %v3840_v55 = vld [vmem:[%s4564_s4] sm:$0xff]  ;;  %v3845_v56 = vld [vmem:[%s4564_s4 + $0x8] sm:$0xff]  ;;  %v3850_v57 = vld [vmem:[%s4564_s4 + $0x10] sm:$0xff]  ;;  %p4602_p1 = scmp.ne.s32.totalorder %s4591_s15, 0 }
 0x165   : > { %v3855_v58 = vld [vmem:[%s4564_s4 + $0x18] sm:$0xff]  ;;  %s3420_s16 = smov (%p4602_p1), 5  }
 0x167   : > { %v391_v5 = vld [vmem:[#allocation3 + $0x10] sm:$0xff]  ;;  %v394_v7 = vld [vmem:[#allocation3 + $0x28] sm:$0xff] }
 0x168   : > { %v390_v3 = vld [vmem:[#allocation3 + $0x8] sm:$0xff]  ;;  %v393_v6 = vld [vmem:[#allocation3 + $0x20] sm:$0xff] }
 0x169   : > { %417 = vrot.lane.b32.xlu0 %v390_v3, %s3415_s13  ;;  %423 = vrot.lane.b32.xlu1 %v393_v6, %s3415_s13 }
 0x16d   : > { %419 = vrot.lane.b32.xlu0 %v391_v5, %s3415_s13  ;;  %421 = vrot.lane.b32.xlu1 %v392_v22, %s3415_s13 }
 0x171   : > { %425 = vrot.lane.b32.xlu0 %v394_v7, %s3415_s13  ;;  %498 = vrot.lane.b32.xlu1 %v390_v3, %s3416_s11 }
 0x175   : > { %405 = vrot.lane.b32.xlu0 %v3781_v23, %s3417_s14  ;;  %407 = vrot.lane.b32.xlu1 %v3789_v24, %s3417_s14 }
 0x179   : > { %500 = vrot.lane.b32.xlu0 %v391_v5, %s3416_s11  ;;  %504 = vrot.lane.b32.xlu1 %v393_v6, %s3416_s11 }
 0x17d   : > { %496 = vrot.lane.b32.xlu0 %v389_v4, %s3416_s11  ;;  %502 = vrot.lane.b32.xlu1 %v392_v22, %s3416_s11 }
 0x181   : > { %506 = vrot.lane.b32.xlu0 %v394_v7, %s3416_s11  ;;  %584 = vrot.lane.b32.xlu1 %v391_v5, %s3418_s12 }
 0x185   : > { %582 = vrot.lane.b32.xlu0 %v390_v3, %s3418_s12  ;;  %588 = vrot.lane.b32.xlu1 %v393_v6, %s3418_s12 }
 0x189   : > { %580 = vrot.lane.b32.xlu0 %v389_v4, %s3418_s12  ;;  %586 = vrot.lane.b32.xlu1 %v392_v22, %s3418_s12 }
 0x18d   : > { %590 = vrot.lane.b32.xlu0 %v394_v7, %s3418_s12  ;;  %578 = vrot.lane.b32.xlu1 %v3789_v24, %s3419_s26 }
 0x191   : > { %576 = vrot.lane.b32.xlu0 %v3781_v23, %s3419_s26  ;;  %675 = vperm.xlu1 %3230, %v3645_v11  }
 0x195   : > { %670 = vperm.xlu0 %3229, %v3640_v10   ;;  %680 = vperm.xlu1 %3230, %v3650_v12  }
 0x199   : > { %685 = vperm.xlu0 %3229, %v3655_v13  }
 0x1d6   : > { %v416_v26 = vpop.permute.xlu1 %415 }
 0x1db   : > { %v418_v25 = vpop.permute.xlu0 %417  ;;  %v424_v28 = vpop.permute.xlu1 %423 }
 0x1dc   : > { %v428_v30 = vsel %vm427_vm2, %v416_v26, %v418_v25 }
 0x1df   : > { %v420_v27 = vpop.permute.xlu0 %419  ;;  %v422_v32 = vpop.permute.xlu1 %421 }
 0x1e0   : > { %v429_v29 = vsel %vm427_vm2, %v418_v25, %v420_v27  ;;  %v430_v11 = vsel %vm427_vm2, %v422_v32, %v424_v28 }
 0x1e1   : > { %443 = vmatprep.subr.bf16.mxu0 %v429_v29 }
 0x1e2   : > { %444 = vmatpush1.bf16.msra.mxu0 %v428_v30 }
 0x1e3   : > { %v426_v31 = vpop.permute.xlu0 %425  ;;  %v499_v12 = vpop.permute.xlu1 %498 }
 0x1e4   : > { %v431_v10 = vsel %vm427_vm2, %v424_v28, %v426_v31 }
 0x1e5   : > { %445 = vmatprep.subr.bf16.mxu0 %v431_v10 }
 0x1e6   : > { %446 = vmatpush1.bf16.msra.mxu0 %v430_v11 }
 0x1e7   : > { %v406_v13 = vpop.permute.xlu0 %405  ;;  %v408_v33 = vpop.permute.xlu1 %407 }
 0x1e9   : > { %2936 = vmatmul.mubr.msk.bf16.vlgmr.msra.gmra.mrb[0].mxu0 %vm436_vm3, %v406_v13 }
 0x1ea   : > { %485 = vmatprep.mubr.bf16.mxu0 %v3407_v0 }
 0x1eb   : > { %v501_v34 = vpop.permute.xlu0 %500  ;;  %v505_v36 = vpop.permute.xlu1 %504 }
 0x1ec   : > { %v510_v35 = vsel %vm508_vm4, %v499_v12, %v501_v34 }
 0x1ed   : > { %523 = vmatprep.subr.bf16.mxu0 %v510_v35 }
 0x1ef   : > { %v497_v37 = vpop.permute.xlu0 %496  ;;  %v503_v39 = vpop.permute.xlu1 %502 }
 0x1f0   : > { %v509_v38 = vsel %vm508_vm4, %v497_v37, %v499_v12  ;;  %v511_v41 = vsel %vm508_vm4, %v503_v39, %v505_v36 }
 0x1f1   : > { %2937 = vmatmul.mubr.msk.bf16.gmra.mrb[4].mxu0 %vm436_vm3, %v408_v33 }
 0x1f2   : > { %524 = vmatpush1.bf16.msra.mxu0 %v509_v38  ;;  %555 = vmatprep.mubr.bf16.mxu0 %v3407_v0 }
 0x1f3   : > { %v507_v40 = vpop.permute.xlu0 %506  ;;  %v585_v44 = vpop.permute.xlu1 %584 }
 0x1f4   : > { %v512_v42 = vsel %vm508_vm4, %v505_v36, %v507_v40 }
 0x1f5   : > { %525 = vmatprep.subr.bf16.mxu0 %v512_v42 }
 0x1f6   : > { %526 = vmatpush1.bf16.msra.mxu0 %v511_v41 }
 0x1f7   : > { %v583_v43 = vpop.permute.xlu0 %582  ;;  %v589_v47 = vpop.permute.xlu1 %588 }
 0x1f8   : > { %v594_v45 = vsel %vm592_vm5, %v583_v43, %v585_v44 }
 0x1f9   : > { %2938 = vmatmul.mubr.msk.bf16.vlgmr.msra.gmra.mrb[0].mxu0 %vm436_vm3, %v3781_v23  ;;  %607 = vmatprep.subr.bf16.mxu0 %v594_v45 }
 0x1fa   : > { %565 = vmatprep.mubr.bf16.mxu0 %v3407_v0 }
 0x1fb   : > { %v581_v46 = vpop.permute.xlu0 %580  ;;  %v587_v50 = vpop.permute.xlu1 %586 }
 0x1fc   : > { %v593_v48 = vsel %vm592_vm5, %v581_v46, %v583_v43  ;;  %v595_v51 = vsel %vm592_vm5, %v587_v50, %v589_v47 }
 0x1fd   : > { %608 = vmatpush1.bf16.msra.mxu0 %v593_v48 }
 0x1ff   : > { %v591_v49 = vpop.permute.xlu0 %590  ;;  %v579_v54 = vpop.permute.xlu1 %578 }
 0x200   : > { %v596_v52 = vsel %vm592_vm5, %v589_v47, %v591_v49 }
 0x201   : > { %2939 = vmatmul.mubr.msk.bf16.gmra.mrb[4].mxu0 %vm436_vm3, %v3789_v24  ;;  %609 = vmatprep.subr.bf16.mxu0 %v596_v52 }
 0x202   : > { %610 = vmatpush1.bf16.msra.mxu0 %v595_v51  ;;  %639 = vmatprep.mubr.bf16.mxu0 %v3407_v0 }
 0x203   : > { %v577_v53 = vpop.permute.xlu0 %576 }
 0x209   : > { %2940 = vmatmul.mubr.msk.bf16.vlgmr.msra.gmra.mrb[0].mxu0 %vm436_vm3, %v577_v53 }
 0x20a   : > { %649 = vmatprep.mubr.bf16.mxu0 %v3407_v0 }
 0x210   : > { %v676_v61 = vpop.permute.xlu1 %675 }
 0x211   : > { %2941 = vmatmul.mubr.msk.bf16.gmra.mrb[4].mxu0 %vm436_vm3, %v579_v54 }
 0x214   : > { %v671_v59 = vpop.permute.xlu0 %670  ;;  %v681_v26 = vpop.permute.xlu1 %680 }
 0x218   : > { %v686_v11 = vpop.permute.xlu0 %685 }
 0x2dc   : > { %v641_v60 = vpop.f32.mrb[0].mxu0 }
 0x2dd   : > { %v688_v62 = vadd.f32 %v671_v59, %v641_v60  ;;  %v643_v63 = vpop.f32.mrb[1].mxu0 }
 0x2de   : > { %v689_v1 = vadd.f32 %v671_v59, %v643_v63  ;;  %v645_v2 = vpop.f32.mrb[2].mxu0 }
 0x2df   : > { %vm696_vm6 = vcmp.gt.f32.partialorder %v688_v62, 0.0  ;;  %v704_v3 = vmul.f32 0.1, %v688_v62  ;;  %v690_v4 = vadd.f32 %v676_v61, %v645_v2  ;;  %v647_v5 = vpop.f32.mrb[3].mxu0 }
 0x2e0   : > { %vm697_vm7 = vcmp.gt.f32.partialorder %v689_v1, 0.0  ;;  %v705_v6 = vmul.f32 0.1, %v689_v1  ;;  %v691_v7 = vadd.f32 %v676_v61, %v647_v5 }
 0x2e1   : > { %v3857_v22 = vsel %vm696_vm6, %v688_v62, %v704_v3  ;;  %vm698_vm8 = vcmp.gt.f32.partialorder %v690_v4, 0.0  ;;  %v706_v23 = vmul.f32 0.1, %v690_v4 }
 0x2e2   : > { %v3859_v24 = vsel %vm697_vm7, %v689_v1, %v705_v6  ;;  %vm699_vm9 = vcmp.gt.f32.partialorder %v691_v7, 0.0  ;;  %v707_v25 = vmul.f32 0.1, %v691_v7  ;;  %v727_v44 = vmul.f32 (%p4602_p1), %v3613_v8, %v3857_v22 }
 0x2e3   : > { %v714_v27 = vsel %vm698_vm8, %v690_v4, %v706_v23  ;;  %v728_v48 = vmul.f32 (%p4602_p1), %v3615_v9, %v3859_v24 }
 0x2e4   : > { %v715_v28 = vsel %vm699_vm9, %v691_v7, %v707_v25  ;;  %v651_v29 = vpop.f32.mrb[4].mxu0  ;;  %v729_v45 = vmul.f32 (%p4602_p1), %v3613_v8, %v714_v27 }
 0x2e5   : > { %v692_v30 = vadd.f32 %v681_v26, %v651_v29  ;;  %v653_v31 = vpop.f32.mrb[5].mxu0  ;;  %v730_v49 = vmul.f32 (%p4602_p1), %v3615_v9, %v715_v28 }
 0x2e6   : > { %v693_v32 = vadd.f32 %v681_v26, %v653_v31  ;;  %v655_v10 = vpop.f32.mrb[6].mxu0  ;;  %726 = sbr.rel (!%p4602_p1) target bundleno = 873 (0x369), region = 56  ;;  %v735_v51 = vpack.c.bf16 (%p4602_p1), %v729_v45, %v727_v44 }
 0x2e7   : > { %vm700_vm10 = vcmp.gt.f32.partialorder %v692_v30, 0.0  ;;  %v708_v12 = vmul.f32 0.1, %v692_v30  ;;  %v694_v13 = vadd.f32 %v686_v11, %v655_v10  ;;  %v657_v33 = vpop.f32.mrb[7].mxu0  ;;  %v736_v53 = vpack.c.bf16 (%p4602_p1), %v730_v49, %v728_v48 }
 0x2e8   : > { %vm701_vm11 = vcmp.gt.f32.partialorder %v693_v32, 0.0  ;;  %v709_v34 = vmul.f32 0.1, %v693_v32  ;;  %v695_v35 = vadd.f32 %v686_v11, %v657_v33  ;;  %743 = vrot.lane.b32.xlu0 (%p4602_p1), %v735_v51, %s3420_s16 }
 0x2e9   : > { %v716_v36 = vsel %vm700_vm10, %v692_v30, %v708_v12  ;;  %vm702_vm12 = vcmp.gt.f32.partialorder %v694_v13, 0.0  ;;  %v710_v37 = vmul.f32 0.1, %v694_v13 }
 0x2ea   : > { %v717_v38 = vsel %vm701_vm11, %v693_v32, %v709_v34  ;;  %vm703_vm13 = vcmp.gt.f32.partialorder %v695_v35, 0.0  ;;  %v711_v39 = vmul.f32 0.1, %v695_v35  ;;  %v731_v42 = vmul.f32 (%p4602_p1), %v3613_v8, %v716_v36 }
 0x2eb   : > { %v718_v40 = vsel %vm702_vm12, %v694_v13, %v710_v37  ;;  %v732_v46 = vmul.f32 (%p4602_p1), %v3615_v9, %v717_v38 }
 0x2ec   : > { %v719_v41 = vsel %vm703_vm13, %v695_v35, %v711_v39  ;;  %v733_v43 = vmul.f32 (%p4602_p1), %v3613_v8, %v718_v40  ;;  %745 = vrot.lane.b32.xlu0 (%p4602_p1), %v736_v53, %s3420_s16 }
 0x2ed   : > { %v734_v47 = vmul.f32 %v3615_v9, %v719_v41 }
 0x2ee   : > { %v737_v50 = vpack.c.bf16 %v733_v43, %v731_v42 }
 0x2ef   : > { %v738_v52 = vpack.c.bf16 %v734_v47, %v732_v46 }
 0x2f0   : > { %747 = vrot.lane.b32.xlu1 %v737_v50, %s3420_s16 }
 0x2f4   : > { %749 = vrot.lane.b32.xlu1 %v738_v52, %s3420_s16 }
 0x35a   : > { %v744_v59 = vpop.permute.xlu0 %743 }
 0x35b   : > { %760 = vst.msk [vmem:[#allocation3] sm:$0xff] %vm221_vm1, %v744_v59 }
 0x35e   : > { %v746_v61 = vpop.permute.xlu0 %745 }
 0x35f   : > { %v752_v63 = vsel %vm218_vm0, %v744_v59, %v746_v61  ;;  %762 = vst.msk [vmem:[#allocation3 + $0x10] sm:$0xff] %vm218_vm0, %v746_v61 }
 0x360   : > { %761 = vst [vmem:[#allocation3 + $0x8] sm:$0xff] %v752_v63 }
 0x362   : > { %v748_v54 = vpop.permute.xlu1 %747 }
 0x363   : > { %763 = vst.msk [vmem:[#allocation3 + $0x18] sm:$0xff] %vm221_vm1, %v748_v54 }
 0x366   : > { %v750_v60 = vpop.permute.xlu1 %749 }
 0x367   : > { %v753_v62 = vsel %vm218_vm0, %v748_v54, %v750_v60  ;;  %765 = vst.msk [vmem:[#allocation3 + $0x28] sm:$0xff] %vm218_vm0, %v750_v60 }
 0x368   : > { %764 = vst [vmem:[#allocation3 + $0x20] sm:$0xff] %v753_v62 }
 0x369 PF: > { %p4603_p13 = scmp.ne.s32.totalorder %s4591_s15, 0 }
 0x36a   : > { %v771_v1 = vpack.c.bf16 (!%p4603_p13), %v718_v40, %v716_v36  ;;  %v769_v2 = vpack.c.bf16 (!%p4603_p13), %v714_v27, %v3857_v22  ;;  %s3421_s30 = smov (!%p4603_p13), 5   ;;  %v772_v3 = vpack.c.bf16 (!%p4603_p13), %v719_v41, %v717_v38  ;;  %v770_v4 = vpack.c.bf16 (!%p4603_p13), %v715_v28, %v3859_v24 }
 0x36b   : > { %768 = sbr.rel (%p4603_p13) target bundleno = 997 (0x3e5), region = 60 }
 0x36c   : > { %781 = vrot.lane.b32.xlu1 (!%p4603_p13), %v771_v1, %s3421_s30  ;;  %777 = vrot.lane.b32.xlu0 (!%p4603_p13), %v769_v2, %s3421_s30 }
 0x370   : > { %783 = vrot.lane.b32.xlu1 (!%p4603_p13), %v772_v3, %s3421_s30  ;;  %779 = vrot.lane.b32.xlu0 (!%p4603_p13), %v770_v4, %s3421_s30 }
 0x3de   : > { %v782_v5 = vpop.permute.xlu1 %781  ;;  %v778_v6 = vpop.permute.xlu0 %777 }
 0x3df   : > { %797 = vst.msk [vmem:[#allocation3 + $0x18] sm:$0xff] %vm221_vm1, %v782_v5  ;;  %794 = vst.msk [vmem:[#allocation3] sm:$0xff] %vm221_vm1, %v778_v6 }
 0x3e2   : > { %v784_v7 = vpop.permute.xlu1 %783  ;;  %v780_v23 = vpop.permute.xlu0 %779 }
 0x3e3   : > { %v787_v25 = vsel %vm218_vm0, %v782_v5, %v784_v7  ;;  %799 = vst.msk [vmem:[#allocation3 + $0x28] sm:$0xff] %vm218_vm0, %v784_v7  ;;  %v786_v22 = vsel %vm218_vm0, %v778_v6, %v780_v23  ;;  %796 = vst.msk [vmem:[#allocation3 + $0x10] sm:$0xff] %vm218_vm0, %v780_v23 }
 0x3e4   : > { %798 = vst [vmem:[#allocation3 + $0x20] sm:$0xff] %v787_v25  ;;  %795 = vst [vmem:[#allocation3 + $0x8] sm:$0xff] %v786_v22 }
 0x3e5 PF: > { %888 = vmatprep.mubr.bf16.mxu1 %v3407_v0  ;;  %3233 = vset.pattern.permute.xlu0 %v3407_v0  ;;  %v3235_v31 = vld [vmem:[%s4563_s3] sm:$0xff]   ;;  %v3906_v32 = vld [vmem:[%s4563_s3 + $0x8] sm:$0xff]   ;;  %v3965_v2 = vld [vmem:[%s4562_s2 + $0x30] sm:$0xff]  ;;  %p4604_p12 = scmp.ne.s32.totalorder %s4591_s15, 0 }
 0x3e6   : > { %v804_v26 = vld [vmem:[#allocation3] sm:$0xff]  ;;  %3234 = vset.pattern.permute.xlu1 %v3407_v0  ;;  %v807_v30 = vld [vmem:[#allocation3 + $0x18] sm:$0xff]  ;;  %v3960_v1 = vld [vmem:[%s4562_s2 + $0x28] sm:$0xff]  ;;  %s3422_s30 = smov (%p4604_p12), 5  }
 0x3e7   : > { %830 = vrot.lane.b32.xlu1 %v804_v26, %s3415_s13  ;;  %v3955_v63 = vld [vmem:[%s4562_s2 + $0x20] sm:$0xff]  ;;  %v3970_v3 = vld [vmem:[%s4562_s2 + $0x38] sm:$0xff] }
 0x3ea   : > { %v806_v27 = vld [vmem:[#allocation3 + $0x10] sm:$0xff]  ;;  %v809_v29 = vld [vmem:[#allocation3 + $0x28] sm:$0xff] }
 0x3eb   : > { %v805_v24 = vld [vmem:[#allocation3 + $0x8] sm:$0xff]  ;;  %v808_v28 = vld [vmem:[#allocation3 + $0x20] sm:$0xff] }
 0x3ec   : > { %832 = vrot.lane.b32.xlu0 %v805_v24, %s3415_s13  ;;  %838 = vrot.lane.b32.xlu1 %v808_v28, %s3415_s13 }
 0x3f0   : > { %834 = vrot.lane.b32.xlu0 %v806_v27, %s3415_s13  ;;  %836 = vrot.lane.b32.xlu1 %v807_v30, %s3415_s13 }
 0x3f4   : > { %840 = vrot.lane.b32.xlu0 %v809_v29, %s3415_s13  ;;  %911 = vrot.lane.b32.xlu1 %v805_v24, %s3416_s11 }
 0x3f8   : > { %820 = vrot.lane.b32.xlu0 %v3235_v31, %s3417_s14  ;;  %822 = vrot.lane.b32.xlu1 %v3906_v32, %s3417_s14 }
 0x3fc   : > { %913 = vrot.lane.b32.xlu0 %v806_v27, %s3416_s11  ;;  %917 = vrot.lane.b32.xlu1 %v808_v28, %s3416_s11 }
 0x400   : > { %909 = vrot.lane.b32.xlu0 %v804_v26, %s3416_s11  ;;  %915 = vrot.lane.b32.xlu1 %v807_v30, %s3416_s11 }
 0x404   : > { %919 = vrot.lane.b32.xlu0 %v809_v29, %s3416_s11  ;;  %996 = vrot.lane.b32.xlu1 %v806_v27, %s3418_s12 }
 0x408   : > { %994 = vrot.lane.b32.xlu0 %v805_v24, %s3418_s12  ;;  %1000 = vrot.lane.b32.xlu1 %v808_v28, %s3418_s12 }
 0x40c   : > { %992 = vrot.lane.b32.xlu0 %v804_v26, %s3418_s12  ;;  %998 = vrot.lane.b32.xlu1 %v807_v30, %s3418_s12 }
 0x410   : > { %1002 = vrot.lane.b32.xlu0 %v809_v29, %s3418_s12  ;;  %990 = vrot.lane.b32.xlu1 %v3906_v32, %s3419_s26 }
 0x414   : > { %988 = vrot.lane.b32.xlu0 %v3235_v31, %s3419_s26  ;;  %1086 = vperm.xlu1 %3234, %v3845_v56  }
 0x418   : > { %1081 = vperm.xlu0 %3233, %v3840_v55   ;;  %1091 = vperm.xlu1 %3234, %v3850_v57  }
 0x41c   : > { %1096 = vperm.xlu0 %3233, %v3855_v58  }
 0x459   : > { %v831_v11 = vpop.permute.xlu1 %830 }
 0x45e   : > { %v833_v10 = vpop.permute.xlu0 %832  ;;  %v839_v13 = vpop.permute.xlu1 %838 }
 0x45f   : > { %v842_v34 = vsel %vm427_vm2, %v831_v11, %v833_v10 }
 0x462   : > { %v835_v12 = vpop.permute.xlu0 %834  ;;  %v837_v36 = vpop.permute.xlu1 %836 }
 0x463   : > { %v843_v33 = vsel %vm427_vm2, %v833_v10, %v835_v12  ;;  %v844_v56 = vsel %vm427_vm2, %v837_v36, %v839_v13 }
 0x464   : > { %856 = vmatprep.subr.bf16.mxu1 %v843_v33 }
 0x465   : > { %857 = vmatpush1.bf16.msra.mxu1 %v842_v34 }
 0x466   : > { %v841_v35 = vpop.permute.xlu0 %840  ;;  %v912_v57 = vpop.permute.xlu1 %911 }
 0x467   : > { %v845_v55 = vsel %vm427_vm2, %v839_v13, %v841_v35 }
 0x468   : > { %858 = vmatprep.subr.bf16.mxu1 %v845_v55 }
 0x469   : > { %859 = vmatpush1.bf16.msra.mxu1 %v844_v56 }
 0x46a   : > { %v821_v58 = vpop.permute.xlu0 %820  ;;  %v823_v37 = vpop.permute.xlu1 %822 }
 0x46c   : > { %2944 = vmatmul.mubr.msk.bf16.vlgmr.msra.gmra.mrb[0].mxu1 %vm436_vm3, %v821_v58 }
 0x46d   : > { %898 = vmatprep.mubr.bf16.mxu1 %v3407_v0 }
 0x46e   : > { %v914_v38 = vpop.permute.xlu0 %913  ;;  %v918_v40 = vpop.permute.xlu1 %917 }
 0x46f   : > { %v922_v39 = vsel %vm508_vm4, %v912_v57, %v914_v38 }
 0x470   : > { %935 = vmatprep.subr.bf16.mxu1 %v922_v39 }
 0x472   : > { %v910_v41 = vpop.permute.xlu0 %909  ;;  %v916_v43 = vpop.permute.xlu1 %915 }
 0x473   : > { %v921_v42 = vsel %vm508_vm4, %v910_v41, %v912_v57  ;;  %v923_v45 = vsel %vm508_vm4, %v916_v43, %v918_v40 }
 0x474   : > { %2945 = vmatmul.mubr.msk.bf16.gmra.mrb[4].mxu1 %vm436_vm3, %v823_v37 }
 0x475   : > { %936 = vmatpush1.bf16.msra.mxu1 %v921_v42  ;;  %967 = vmatprep.mubr.bf16.mxu1 %v3407_v0 }
 0x476   : > { %v920_v44 = vpop.permute.xlu0 %919  ;;  %v997_v48 = vpop.permute.xlu1 %996 }
 0x477   : > { %v924_v46 = vsel %vm508_vm4, %v918_v40, %v920_v44 }
 0x478   : > { %937 = vmatprep.subr.bf16.mxu1 %v924_v46 }
 0x479   : > { %938 = vmatpush1.bf16.msra.mxu1 %v923_v45 }
 0x47a   : > { %v995_v47 = vpop.permute.xlu0 %994  ;;  %v1001_v51 = vpop.permute.xlu1 %1000 }
 0x47b   : > { %v1005_v49 = vsel %vm592_vm5, %v995_v47, %v997_v48 }
 0x47c   : > { %2946 = vmatmul.mubr.msk.bf16.vlgmr.msra.gmra.mrb[0].mxu1 %vm436_vm3, %v3235_v31  ;;  %1018 = vmatprep.subr.bf16.mxu1 %v1005_v49 }
 0x47d   : > { %977 = vmatprep.mubr.bf16.mxu1 %v3407_v0 }
 0x47e   : > { %v993_v50 = vpop.permute.xlu0 %992  ;;  %v999_v54 = vpop.permute.xlu1 %998 }
 0x47f   : > { %v1004_v52 = vsel %vm592_vm5, %v993_v50, %v995_v47  ;;  %v1006_v60 = vsel %vm592_vm5, %v999_v54, %v1001_v51 }
 0x480   : > { %1019 = vmatpush1.bf16.msra.mxu1 %v1004_v52 }
 0x482   : > { %v1003_v53 = vpop.permute.xlu0 %1002  ;;  %v991_v62 = vpop.permute.xlu1 %990 }
 0x483   : > { %v1007_v59 = vsel %vm592_vm5, %v1001_v51, %v1003_v53 }
 0x484   : > { %2947 = vmatmul.mubr.msk.bf16.gmra.mrb[4].mxu1 %vm436_vm3, %v3906_v32  ;;  %1020 = vmatprep.subr.bf16.mxu1 %v1007_v59 }
 0x485   : > { %1021 = vmatpush1.bf16.msra.mxu1 %v1006_v60  ;;  %1050 = vmatprep.mubr.bf16.mxu1 %v3407_v0 }
 0x486   : > { %v989_v61 = vpop.permute.xlu0 %988 }
 0x48c   : > { %2948 = vmatmul.mubr.msk.bf16.vlgmr.msra.gmra.mrb[0].mxu1 %vm436_vm3, %v989_v61 }
 0x48d   : > { %1060 = vmatprep.mubr.bf16.mxu1 %v3407_v0 }
 0x493   : > { %v1087_v6 = vpop.permute.xlu1 %1086 }
 0x494   : > { %2949 = vmatmul.mubr.msk.bf16.gmra.mrb[4].mxu1 %vm436_vm3, %v991_v62 }
 0x497   : > { %v1082_v4 = vpop.permute.xlu0 %1081  ;;  %v1092_v10 = vpop.permute.xlu1 %1091 }
 0x49b   : > { %v1097_v56 = vpop.permute.xlu0 %1096 }
 0x55f   : > { %v1052_v5 = vpop.f32.mrb[0].mxu1 }
 0x560   : > { %v1099_v7 = vadd.f32 %v1082_v4, %v1052_v5  ;;  %v1054_v23 = vpop.f32.mrb[1].mxu1 }
 0x561   : > { %v1100_v25 = vadd.f32 %v1082_v4, %v1054_v23  ;;  %v1056_v22 = vpop.f32.mrb[2].mxu1 }
 0x562   : > { %v3973_v24 = vadd.f32 %v1099_v7, %v3682_v14  ;;  %v1101_v26 = vadd.f32 %v1087_v6, %v1056_v22  ;;  %v1058_v27 = vpop.f32.mrb[3].mxu1 }
 0x563   : > { %v3976_v28 = vadd.f32 %v1100_v25, %v3685_v15  ;;  %v1102_v29 = vadd.f32 %v1087_v6, %v1058_v27 }
 0x564   : > { %vm1115_vm14 = vcmp.gt.f32.partialorder %v3973_v24, 0.0  ;;  %v1123_v30 = vmul.f32 0.1, %v3973_v24  ;;  %v3981_v31 = vadd.f32 %v1101_v26, %v3688_v16 }
 0x565   : > { %vm1116_vm15 = vcmp.gt.f32.partialorder %v3976_v28, 0.0  ;;  %v1124_v32 = vmul.f32 0.1, %v3976_v28  ;;  %v3986_v14 = vadd.f32 %v1102_v29, %v3691_v17 }
 0x566   : > { %v3989_v11 = vsel %vm1115_vm14, %v3973_v24, %v1123_v30  ;;  %vm1117_vm6 = vcmp.gt.f32.partialorder %v3981_v31, 0.0  ;;  %v1125_v15 = vmul.f32 0.1, %v3981_v31 }
 0x567   : > { %v3994_v12 = vsel %vm1116_vm15, %v3976_v28, %v1124_v32  ;;  %vm1118_vm7 = vcmp.gt.f32.partialorder %v3986_v14, 0.0  ;;  %v1126_v16 = vmul.f32 0.1, %v3986_v14  ;;  %v1062_v13 = vpop.f32.mrb[4].mxu1  ;;  %v1147_v48 = vmul.f32 (%p4604_p12), %v3613_v8, %v3989_v11 }
 0x568   : > { %v1133_v33 = vsel %vm1117_vm6, %v3981_v31, %v1125_v15  ;;  %v1103_v17 = vadd.f32 %v1092_v10, %v1062_v13  ;;  %v1064_v34 = vpop.f32.mrb[5].mxu1  ;;  %v1148_v52 = vmul.f32 (%p4604_p12), %v3615_v9, %v3994_v12 }
 0x569   : > { %v4000_v35 = vsel %vm1118_vm7, %v3986_v14, %v1126_v16  ;;  %v1104_v36 = vadd.f32 %v1092_v10, %v1064_v34  ;;  %v1066_v55 = vpop.f32.mrb[6].mxu1  ;;  %v1149_v49 = vmul.f32 (%p4604_p12), %v3613_v8, %v1133_v33 }
 0x56a   : > { %v4003_v57 = vadd.f32 %v1103_v17, %v3694_v18  ;;  %v1105_v58 = vadd.f32 %v1097_v56, %v1066_v55  ;;  %v1068_v37 = vpop.f32.mrb[7].mxu1  ;;  %v1150_v53 = vmul.f32 (%p4604_p12), %v3615_v9, %v4000_v35 }
 0x56b   : > { %v4006_v38 = vadd.f32 %v1104_v36, %v3697_v19  ;;  %v1106_v39 = vadd.f32 %v1097_v56, %v1068_v37  ;;  %1146 = sbr.rel (!%p4604_p12) target bundleno = 1518 (0x5ee), region = 64  ;;  %v1155_v59 = vpack.c.bf16 (%p4604_p12), %v1149_v49, %v1147_v48 }
 0x56c   : > { %vm1119_vm8 = vcmp.gt.f32.partialorder %v4003_v57, 0.0  ;;  %v1127_v40 = vmul.f32 0.1, %v4003_v57  ;;  %v4011_v41 = vadd.f32 %v1105_v58, %v3702_v20  ;;  %v1156_v61 = vpack.c.bf16 (%p4604_p12), %v1150_v53, %v1148_v52 }
 0x56d   : > { %vm1120_vm9 = vcmp.gt.f32.partialorder %v4006_v38, 0.0  ;;  %v1128_v42 = vmul.f32 0.1, %v4006_v38  ;;  %v4016_v18 = vadd.f32 %v1106_v39, %v3705_v21  ;;  %1163 = vrot.lane.b32.xlu0 (%p4604_p12), %v1155_v59, %s3422_s30 }
 0x56e   : > { %v1135_v43 = vsel %vm1119_vm8, %v4003_v57, %v1127_v40  ;;  %vm1121_vm10 = vcmp.gt.f32.partialorder %v4011_v41, 0.0  ;;  %v1129_v19 = vmul.f32 0.1, %v4011_v41 }
 0x56f   : > { %v1136_v44 = vsel %vm1120_vm9, %v4006_v38, %v1128_v42  ;;  %vm1122_vm11 = vcmp.gt.f32.partialorder %v4016_v18, 0.0  ;;  %v1130_v20 = vmul.f32 0.1, %v4016_v18  ;;  %v1151_v21 = vmul.f32 (%p4604_p12), %v3613_v8, %v1135_v43 }
 0x570   : > { %v1137_v45 = vsel %vm1121_vm10, %v4011_v41, %v1129_v19  ;;  %v1152_v50 = vmul.f32 (%p4604_p12), %v3615_v9, %v1136_v44 }
 0x571   : > { %v1138_v46 = vsel %vm1122_vm11, %v4016_v18, %v1130_v20  ;;  %v1153_v47 = vmul.f32 (%p4604_p12), %v3613_v8, %v1137_v45  ;;  %1165 = vrot.lane.b32.xlu0 (%p4604_p12), %v1156_v61, %s3422_s30 }
 0x572   : > { %v1154_v51 = vmul.f32 %v3615_v9, %v1138_v46 }
 0x573   : > { %v1157_v54 = vpack.c.bf16 %v1153_v47, %v1151_v21 }
 0x574   : > { %v1158_v60 = vpack.c.bf16 %v1154_v51, %v1152_v50 }
 0x575   : > { %1167 = vrot.lane.b32.xlu1 %v1157_v54, %s3422_s30 }
 0x579   : > { %1169 = vrot.lane.b32.xlu1 %v1158_v60, %s3422_s30 }
 0x5df   : > { %v1164_v4 = vpop.permute.xlu0 %1163 }
 0x5e0   : > { %1180 = vst.msk [vmem:[#allocation3] sm:$0xff] %vm221_vm1, %v1164_v4 }
 0x5e3   : > { %v1166_v6 = vpop.permute.xlu0 %1165 }
 0x5e4   : > { %v1172_v23 = vsel %vm218_vm0, %v1164_v4, %v1166_v6  ;;  %1182 = vst.msk [vmem:[#allocation3 + $0x10] sm:$0xff] %vm218_vm0, %v1166_v6 }
 0x5e5   : > { %1181 = vst [vmem:[#allocation3 + $0x8] sm:$0xff] %v1172_v23 }
 0x5e7   : > { %v1168_v62 = vpop.permute.xlu1 %1167 }
 0x5e8   : > { %1183 = vst.msk [vmem:[#allocation3 + $0x18] sm:$0xff] %vm221_vm1, %v1168_v62 }
 0x5eb   : > { %v1170_v5 = vpop.permute.xlu1 %1169 }
 0x5ec   : > { %v1173_v7 = vsel %vm218_vm0, %v1168_v62, %v1170_v5  ;;  %1185 = vst.msk [vmem:[#allocation3 + $0x28] sm:$0xff] %vm218_vm0, %v1170_v5 }
 0x5ed   : > { %1184 = vst [vmem:[#allocation3 + $0x20] sm:$0xff] %v1173_v7 }
 0x5ee PF: > { %p4605_p2 = scmp.ne.s32.totalorder %s4591_s15, 0 }
 0x5ef   : > { %v1191_v25 = vpack.c.bf16 (!%p4605_p2), %v1137_v45, %v1135_v43  ;;  %v1189_v22 = vpack.c.bf16 (!%p4605_p2), %v1133_v33, %v3989_v11  ;;  %s3423_s27 = smov (!%p4605_p2), 5   ;;  %v1192_v26 = vpack.c.bf16 (!%p4605_p2), %v1138_v46, %v1136_v44  ;;  %v1190_v27 = vpack.c.bf16 (!%p4605_p2), %v4000_v35, %v3994_v12 }
 0x5f0   : > { %1188 = sbr.rel (%p4605_p2) target bundleno = 1642 (0x66a), region = 68 }
 0x5f1   : > { %1201 = vrot.lane.b32.xlu1 (!%p4605_p2), %v1191_v25, %s3423_s27  ;;  %1197 = vrot.lane.b32.xlu0 (!%p4605_p2), %v1189_v22, %s3423_s27 }
 0x5f5   : > { %1203 = vrot.lane.b32.xlu1 (!%p4605_p2), %v1192_v26, %s3423_s27  ;;  %1199 = vrot.lane.b32.xlu0 (!%p4605_p2), %v1190_v27, %s3423_s27 }
 0x663   : > { %v1202_v29 = vpop.permute.xlu1 %1201  ;;  %v1198_v30 = vpop.permute.xlu0 %1197 }
 0x664   : > { %1217 = vst.msk [vmem:[#allocation3 + $0x18] sm:$0xff] %vm221_vm1, %v1202_v29  ;;  %1214 = vst.msk [vmem:[#allocation3] sm:$0xff] %vm221_vm1, %v1198_v30 }
 0x667   : > { %v1204_v32 = vpop.permute.xlu1 %1203  ;;  %v1200_v10 = vpop.permute.xlu0 %1199 }
 0x668   : > { %v1207_v15 = vsel %vm218_vm0, %v1202_v29, %v1204_v32  ;;  %1219 = vst.msk [vmem:[#allocation3 + $0x28] sm:$0xff] %vm218_vm0, %v1204_v32  ;;  %v1206_v11 = vsel %vm218_vm0, %v1198_v30, %v1200_v10  ;;  %1216 = vst.msk [vmem:[#allocation3 + $0x10] sm:$0xff] %vm218_vm0, %v1200_v10 }
 0x669   : > { %1218 = vst [vmem:[#allocation3 + $0x20] sm:$0xff] %v1207_v15  ;;  %1215 = vst [vmem:[#allocation3 + $0x8] sm:$0xff] %v1206_v11 }
 0x66a PF: > { %1309 = vmatprep.mubr.bf16.mxu0 %v3407_v0  ;;  %3237 = vset.pattern.permute.xlu0 %v3407_v0  ;;  %v4068_v35 = vld [vmem:[%s4561_s1 + $0x10] sm:$0xff]   ;;  %s3424_s10 = smov 126   ;;  %v4075_v36 = vld [vmem:[%s4561_s1 + $0x18] sm:$0xff]   ;;  %s3425_s8 = smov 120   ;;  %vm1342_vm12 = vcmask 1031168   ;;  %vm1426_vm13 = vcmask 982016  }
 0x66b   : > { %v1225_v16 = vld [vmem:[#allocation3] sm:$0xff]  ;;  %3238 = vset.pattern.permute.xlu1 %v3407_v0  ;;  %v1228_v34 = vld [vmem:[#allocation3 + $0x18] sm:$0xff]  ;;  %v4112_v25 = vld [vmem:[%s4564_s4 + $0x28] sm:$0xff]  ;;  %p4606_p4 = scmp.ne.s32.totalorder %s4591_s15, 0 }
 0x66c   : > { %1251 = vrot.lane.b32.xlu1 %v1225_v16, %s3415_s13  ;;  %v4107_v23 = vld [vmem:[%s4564_s4 + $0x20] sm:$0xff]  ;;  %v4117_v22 = vld [vmem:[%s4564_s4 + $0x30] sm:$0xff]  ;;  %v4122_v26 = vld [vmem:[%s4564_s4 + $0x38] sm:$0xff]  ;;  %s3426_s7 = smov (%p4606_p4), 5  }
 0x66f   : > { %v1227_v13 = vld [vmem:[#allocation3 + $0x10] sm:$0xff]  ;;  %v1230_v17 = vld [vmem:[#allocation3 + $0x28] sm:$0xff] }
 0x670   : > { %v1226_v12 = vld [vmem:[#allocation3 + $0x8] sm:$0xff]  ;;  %v1229_v33 = vld [vmem:[#allocation3 + $0x20] sm:$0xff] }
 0x671   : > { %1253 = vrot.lane.b32.xlu0 %v1226_v12, %s3415_s13  ;;  %1259 = vrot.lane.b32.xlu1 %v1229_v33, %s3415_s13 }
 0x675   : > { %1255 = vrot.lane.b32.xlu0 %v1227_v13, %s3415_s13  ;;  %1257 = vrot.lane.b32.xlu1 %v1228_v34, %s3415_s13 }
 0x679   : > { %1261 = vrot.lane.b32.xlu0 %v1230_v17, %s3415_s13  ;;  %1332 = vrot.lane.b32.xlu1 %v1226_v12, %s3424_s10 }
 0x67d   : > { %1241 = vrot.lane.b32.xlu0 %v4068_v35, %s3417_s14  ;;  %1243 = vrot.lane.b32.xlu1 %v4075_v36, %s3417_s14 }
 0x681   : > { %1334 = vrot.lane.b32.xlu0 %v1227_v13, %s3424_s10  ;;  %1338 = vrot.lane.b32.xlu1 %v1229_v33, %s3424_s10 }
 0x685   : > { %1330 = vrot.lane.b32.xlu0 %v1225_v16, %s3424_s10  ;;  %1336 = vrot.lane.b32.xlu1 %v1228_v34, %s3424_s10 }
 0x689   : > { %1340 = vrot.lane.b32.xlu0 %v1230_v17, %s3424_s10  ;;  %1418 = vrot.lane.b32.xlu1 %v1227_v13, %s3425_s8 }
 0x68d   : > { %1416 = vrot.lane.b32.xlu0 %v1226_v12, %s3425_s8  ;;  %1422 = vrot.lane.b32.xlu1 %v1229_v33, %s3425_s8 }
 0x691   : > { %1414 = vrot.lane.b32.xlu0 %v1225_v16, %s3425_s8  ;;  %1420 = vrot.lane.b32.xlu1 %v1228_v34, %s3425_s8 }
 0x695   : > { %1424 = vrot.lane.b32.xlu0 %v1230_v17, %s3425_s8  ;;  %1412 = vrot.lane.b32.xlu1 %v4075_v36, %s3419_s26 }
 0x699   : > { %1410 = vrot.lane.b32.xlu0 %v4068_v35, %s3419_s26  ;;  %1509 = vperm.xlu1 %3238, %v3960_v1  }
 0x69d   : > { %1504 = vperm.xlu0 %3237, %v3955_v63   ;;  %1514 = vperm.xlu1 %3238, %v3965_v2  }
 0x6a1   : > { %1519 = vperm.xlu0 %3237, %v3970_v3  }
 0x6de   : > { %v1252_v56 = vpop.permute.xlu1 %1251 }
 0x6e3   : > { %v1254_v55 = vpop.permute.xlu0 %1253  ;;  %v1260_v37 = vpop.permute.xlu1 %1259 }
 0x6e4   : > { %v1263_v40 = vsel %vm427_vm2, %v1252_v56, %v1254_v55 }
 0x6e7   : > { %v1256_v58 = vpop.permute.xlu0 %1255  ;;  %v1258_v43 = vpop.permute.xlu1 %1257 }
 0x6e8   : > { %v1264_v39 = vsel %vm427_vm2, %v1254_v55, %v1256_v58  ;;  %v1265_v1 = vsel %vm427_vm2, %v1258_v43, %v1260_v37 }
 0x6e9   : > { %1277 = vmatprep.subr.bf16.mxu0 %v1264_v39 }
 0x6ea   : > { %1278 = vmatpush1.bf16.msra.mxu0 %v1263_v40 }
 0x6eb   : > { %v1262_v42 = vpop.permute.xlu0 %1261  ;;  %v1333_v2 = vpop.permute.xlu1 %1332 }
 0x6ec   : > { %v1266_v63 = vsel %vm427_vm2, %v1260_v37, %v1262_v42 }
 0x6ed   : > { %1279 = vmatprep.subr.bf16.mxu0 %v1266_v63 }
 0x6ee   : > { %1280 = vmatpush1.bf16.msra.mxu0 %v1265_v1 }
 0x6ef   : > { %v1242_v3 = vpop.permute.xlu0 %1241  ;;  %v1244_v19 = vpop.permute.xlu1 %1243 }
 0x6f1   : > { %2960 = vmatmul.mubr.msk.bf16.vlgmr.msra.gmra.mrb[8].mxu0 %vm436_vm3, %v1242_v3 }
 0x6f2   : > { %1319 = vmatprep.mubr.bf16.mxu0 %v3407_v0 }
 0x6f3   : > { %v1335_v44 = vpop.permute.xlu0 %1334  ;;  %v1339_v45 = vpop.permute.xlu1 %1338 }
 0x6f4   : > { %v1344_v20 = vsel %vm1342_vm12, %v1333_v2, %v1335_v44 }
 0x6f5   : > { %1357 = vmatprep.subr.bf16.mxu0 %v1344_v20 }
 0x6f7   : > { %v1331_v46 = vpop.permute.xlu0 %1330  ;;  %v1337_v47 = vpop.permute.xlu1 %1336 }
 0x6f8   : > { %v1343_v21 = vsel %vm1342_vm12, %v1331_v46, %v1333_v2  ;;  %v1345_v49 = vsel %vm1342_vm12, %v1337_v47, %v1339_v45 }
 0x6f9   : > { %2961 = vmatmul.mubr.msk.bf16.gmra.mrb[12].mxu0 %vm436_vm3, %v1244_v19 }
 0x6fa   : > { %1358 = vmatpush1.bf16.msra.mxu0 %v1343_v21  ;;  %1389 = vmatprep.mubr.bf16.mxu0 %v3407_v0 }
 0x6fb   : > { %v1341_v48 = vpop.permute.xlu0 %1340  ;;  %v1419_v52 = vpop.permute.xlu1 %1418 }
 0x6fc   : > { %v1346_v50 = vsel %vm1342_vm12, %v1339_v45, %v1341_v48 }
 0x6fd   : > { %1359 = vmatprep.subr.bf16.mxu0 %v1346_v50 }
 0x6fe   : > { %1360 = vmatpush1.bf16.msra.mxu0 %v1345_v49 }
 0x6ff   : > { %v1417_v51 = vpop.permute.xlu0 %1416  ;;  %v1423_v59 = vpop.permute.xlu1 %1422 }
 0x700   : > { %v1428_v53 = vsel %vm1426_vm13, %v1417_v51, %v1419_v52 }
 0x701   : > { %2962 = vmatmul.mubr.msk.bf16.vlgmr.msra.gmra.mrb[8].mxu0 %vm436_vm3, %v4068_v35  ;;  %1441 = vmatprep.subr.bf16.mxu0 %v1428_v53 }
 0x702   : > { %1399 = vmatprep.mubr.bf16.mxu0 %v3407_v0 }
 0x703   : > { %v1415_v54 = vpop.permute.xlu0 %1414  ;;  %v1421_v62 = vpop.permute.xlu1 %1420 }
 0x704   : > { %v1427_v60 = vsel %vm1426_vm13, %v1415_v54, %v1417_v51  ;;  %v1429_v4 = vsel %vm1426_vm13, %v1421_v62, %v1423_v59 }
 0x705   : > { %1442 = vmatpush1.bf16.msra.mxu0 %v1427_v60 }
 0x707   : > { %v1425_v61 = vpop.permute.xlu0 %1424  ;;  %v1413_v7 = vpop.permute.xlu1 %1412 }
 0x708   : > { %v1430_v5 = vsel %vm1426_vm13, %v1423_v59, %v1425_v61 }
 0x709   : > { %2963 = vmatmul.mubr.msk.bf16.gmra.mrb[12].mxu0 %vm436_vm3, %v4075_v36  ;;  %1443 = vmatprep.subr.bf16.mxu0 %v1430_v5 }
 0x70a   : > { %1444 = vmatpush1.bf16.msra.mxu0 %v1429_v4  ;;  %1473 = vmatprep.mubr.bf16.mxu0 %v3407_v0 }
 0x70b   : > { %v1411_v6 = vpop.permute.xlu0 %1410 }
 0x711   : > { %2964 = vmatmul.mubr.msk.bf16.vlgmr.msra.gmra.mrb[8].mxu0 %vm436_vm3, %v1411_v6 }
 0x712   : > { %1483 = vmatprep.mubr.bf16.mxu0 %v3407_v0 }
 0x718   : > { %v1510_v30 = vpop.permute.xlu1 %1509 }
 0x719   : > { %2965 = vmatmul.mubr.msk.bf16.gmra.mrb[12].mxu0 %vm436_vm3, %v1413_v7 }
 0x71c   : > { %v1505_v27 = vpop.permute.xlu0 %1504  ;;  %v1515_v56 = vpop.permute.xlu1 %1514 }
 0x720   : > { %v1520_v1 = vpop.permute.xlu0 %1519 }
 0x7e4   : > { %v1475_v29 = vpop.f32.mrb[8].mxu0 }
 0x7e5   : > { %v1522_v32 = vadd.f32 %v1505_v27, %v1475_v29  ;;  %v1477_v10 = vpop.f32.mrb[9].mxu0 }
 0x7e6   : > { %v1523_v15 = vadd.f32 %v1505_v27, %v1477_v10  ;;  %v1479_v11 = vpop.f32.mrb[10].mxu0 }
 0x7e7   : > { %vm1530_vm14 = vcmp.gt.f32.partialorder %v1522_v32, 0.0  ;;  %v1538_v12 = vmul.f32 0.1, %v1522_v32  ;;  %v1524_v16 = vadd.f32 %v1510_v30, %v1479_v11  ;;  %v1481_v13 = vpop.f32.mrb[11].mxu0 }
 0x7e8   : > { %vm1531_vm15 = vcmp.gt.f32.partialorder %v1523_v15, 0.0  ;;  %v1539_v33 = vmul.f32 0.1, %v1523_v15  ;;  %v1525_v17 = vadd.f32 %v1510_v30, %v1481_v13 }
 0x7e9   : > { %v4124_v34 = vsel %vm1530_vm14, %v1522_v32, %v1538_v12  ;;  %vm1532_vm6 = vcmp.gt.f32.partialorder %v1524_v16, 0.0  ;;  %v1540_v35 = vmul.f32 0.1, %v1524_v16 }
 0x7ea   : > { %v4126_v36 = vsel %vm1531_vm15, %v1523_v15, %v1539_v33  ;;  %vm1533_vm7 = vcmp.gt.f32.partialorder %v1525_v17, 0.0  ;;  %v1541_v55 = vmul.f32 0.1, %v1525_v17  ;;  %v1562_v52 = vmul.f32 (%p4606_p4), %v3613_v8, %v4124_v34 }
 0x7eb   : > { %v1548_v58 = vsel %vm1532_vm6, %v1524_v16, %v1540_v35  ;;  %v1563_v60 = vmul.f32 (%p4606_p4), %v3615_v9, %v4126_v36 }
 0x7ec   : > { %v1549_v37 = vsel %vm1533_vm7, %v1525_v17, %v1541_v55  ;;  %v1485_v39 = vpop.f32.mrb[12].mxu0  ;;  %v1564_v53 = vmul.f32 (%p4606_p4), %v3613_v8, %v1548_v58 }
 0x7ed   : > { %v1526_v40 = vadd.f32 %v1515_v56, %v1485_v39  ;;  %v1487_v42 = vpop.f32.mrb[13].mxu0  ;;  %v1565_v61 = vmul.f32 (%p4606_p4), %v3615_v9, %v1549_v37 }
 0x7ee   : > { %v1527_v43 = vadd.f32 %v1515_v56, %v1487_v42  ;;  %v1489_v63 = vpop.f32.mrb[14].mxu0  ;;  %1561 = sbr.rel (!%p4606_p4) target bundleno = 2161 (0x871), region = 72  ;;  %v1570_v4 = vpack.c.bf16 (%p4606_p4), %v1564_v53, %v1562_v52 }
 0x7ef   : > { %vm1534_vm8 = vcmp.gt.f32.partialorder %v1526_v40, 0.0  ;;  %v1542_v2 = vmul.f32 0.1, %v1526_v40  ;;  %v1528_v3 = vadd.f32 %v1520_v1, %v1489_v63  ;;  %v1491_v19 = vpop.f32.mrb[15].mxu0  ;;  %v1571_v6 = vpack.c.bf16 (%p4606_p4), %v1565_v61, %v1563_v60 }
 0x7f0   : > { %vm1535_vm9 = vcmp.gt.f32.partialorder %v1527_v43, 0.0  ;;  %v1543_v44 = vmul.f32 0.1, %v1527_v43  ;;  %v1529_v20 = vadd.f32 %v1520_v1, %v1491_v19  ;;  %1578 = vrot.lane.b32.xlu0 (%p4606_p4), %v1570_v4, %s3426_s7 }
 0x7f1   : > { %v1550_v45 = vsel %vm1534_vm8, %v1526_v40, %v1542_v2  ;;  %vm1536_vm10 = vcmp.gt.f32.partialorder %v1528_v3, 0.0  ;;  %v1544_v46 = vmul.f32 0.1, %v1528_v3 }
 0x7f2   : > { %v1551_v21 = vsel %vm1535_vm9, %v1527_v43, %v1543_v44  ;;  %vm1537_vm11 = vcmp.gt.f32.partialorder %v1529_v20, 0.0  ;;  %v1545_v47 = vmul.f32 0.1, %v1529_v20  ;;  %v1566_v50 = vmul.f32 (%p4606_p4), %v3613_v8, %v1550_v45 }
 0x7f3   : > { %v1552_v48 = vsel %vm1536_vm10, %v1528_v3, %v1544_v46  ;;  %v1567_v54 = vmul.f32 (%p4606_p4), %v3615_v9, %v1551_v21 }
 0x7f4   : > { %v1553_v49 = vsel %vm1537_vm11, %v1529_v20, %v1545_v47  ;;  %v1568_v51 = vmul.f32 (%p4606_p4), %v3613_v8, %v1552_v48  ;;  %1580 = vrot.lane.b32.xlu0 (%p4606_p4), %v1571_v6, %s3426_s7 }
 0x7f5   : > { %v1569_v59 = vmul.f32 %v3615_v9, %v1553_v49 }
 0x7f6   : > { %v1572_v62 = vpack.c.bf16 %v1568_v51, %v1566_v50 }
 0x7f7   : > { %v1573_v5 = vpack.c.bf16 %v1569_v59, %v1567_v54 }
 0x7f8   : > { %1582 = vrot.lane.b32.xlu1 %v1572_v62, %s3426_s7 }
 0x7fc   : > { %1584 = vrot.lane.b32.xlu1 %v1573_v5, %s3426_s7 }
 0x862   : > { %v1579_v27 = vpop.permute.xlu0 %1578 }
 0x863   : > { %1595 = vst.msk [vmem:[#allocation3] sm:$0xff] %vm221_vm1, %v1579_v27 }
 0x866   : > { %v1581_v30 = vpop.permute.xlu0 %1580 }
 0x867   : > { %v1587_v10 = vsel %vm218_vm0, %v1579_v27, %v1581_v30  ;;  %1597 = vst.msk [vmem:[#allocation3 + $0x10] sm:$0xff] %vm218_vm0, %v1581_v30 }
 0x868   : > { %1596 = vst [vmem:[#allocation3 + $0x8] sm:$0xff] %v1587_v10 }
 0x86a   : > { %v1583_v7 = vpop.permute.xlu1 %1582 }
 0x86b   : > { %1598 = vst.msk [vmem:[#allocation3 + $0x18] sm:$0xff] %vm221_vm1, %v1583_v7 }
 0x86e   : > { %v1585_v29 = vpop.permute.xlu1 %1584 }
 0x86f   : > { %v1588_v32 = vsel %vm218_vm0, %v1583_v7, %v1585_v29  ;;  %1600 = vst.msk [vmem:[#allocation3 + $0x28] sm:$0xff] %vm218_vm0, %v1585_v29 }
 0x870   : > { %1599 = vst [vmem:[#allocation3 + $0x20] sm:$0xff] %v1588_v32 }
 0x871 PF: > { %p4607_p6 = scmp.ne.s32.totalorder %s4591_s15, 0 }
 0x872   : > { %v1606_v15 = vpack.c.bf16 (!%p4607_p6), %v1552_v48, %v1550_v45  ;;  %v1604_v11 = vpack.c.bf16 (!%p4607_p6), %v1548_v58, %v4124_v34  ;;  %s3427_s10 = smov (!%p4607_p6), 5   ;;  %v1607_v12 = vpack.c.bf16 (!%p4607_p6), %v1553_v49, %v1551_v21  ;;  %v1605_v16 = vpack.c.bf16 (!%p4607_p6), %v1549_v37, %v4126_v36 }
 0x873   : > { %1603 = sbr.rel (%p4607_p6) target bundleno = 2285 (0x8ed), region = 76 }
 0x874   : > { %1616 = vrot.lane.b32.xlu1 (!%p4607_p6), %v1606_v15, %s3427_s10  ;;  %1612 = vrot.lane.b32.xlu0 (!%p4607_p6), %v1604_v11, %s3427_s10 }
 0x878   : > { %1618 = vrot.lane.b32.xlu1 (!%p4607_p6), %v1607_v12, %s3427_s10  ;;  %1614 = vrot.lane.b32.xlu0 (!%p4607_p6), %v1605_v16, %s3427_s10 }
 0x8e6   : > { %v1617_v13 = vpop.permute.xlu1 %1616  ;;  %v1613_v33 = vpop.permute.xlu0 %1612 }
 0x8e7   : > { %1632 = vst.msk [vmem:[#allocation3 + $0x18] sm:$0xff] %vm221_vm1, %v1617_v13  ;;  %1629 = vst.msk [vmem:[#allocation3] sm:$0xff] %vm221_vm1, %v1613_v33 }
 0x8ea   : > { %v1619_v17 = vpop.permute.xlu1 %1618  ;;  %v1615_v35 = vpop.permute.xlu0 %1614 }
 0x8eb   : > { %v1622_v55 = vsel %vm218_vm0, %v1617_v13, %v1619_v17  ;;  %1634 = vst.msk [vmem:[#allocation3 + $0x28] sm:$0xff] %vm218_vm0, %v1619_v17  ;;  %v1621_v34 = vsel %vm218_vm0, %v1613_v33, %v1615_v35  ;;  %1631 = vst.msk [vmem:[#allocation3 + $0x10] sm:$0xff] %vm218_vm0, %v1615_v35 }
 0x8ec   : > { %1633 = vst [vmem:[#allocation3 + $0x20] sm:$0xff] %v1622_v55  ;;  %1630 = vst [vmem:[#allocation3 + $0x8] sm:$0xff] %v1621_v34 }
 0x8ed PF: > { %1724 = vmatprep.mubr.bf16.mxu1 %v3407_v0  ;;  %3241 = vset.pattern.permute.xlu0 %v3407_v0  ;;  %v3243_v42 = vld [vmem:[%s4563_s3 + $0x10] sm:$0xff]   ;;  %v4173_v43 = vld [vmem:[%s4563_s3 + $0x18] sm:$0xff]   ;;  %v4222_v10 = vld [vmem:[%s4562_s2 + $0x40] sm:$0xff]  ;;  %p4608_p7 = scmp.ne.s32.totalorder %s4591_s15, 0 }
 0x8ee   : > { %v1640_v56 = vld [vmem:[#allocation3] sm:$0xff]  ;;  %3242 = vset.pattern.permute.xlu1 %v3407_v0  ;;  %v1643_v40 = vld [vmem:[#allocation3 + $0x18] sm:$0xff]  ;;  %v4227_v15 = vld [vmem:[%s4562_s2 + $0x48] sm:$0xff]  ;;  %s3428_s10 = smov (%p4608_p7), 5  }
 0x8ef   : > { %1666 = vrot.lane.b32.xlu1 %v1640_v56, %s3415_s13  ;;  %v4232_v11 = vld [vmem:[%s4562_s2 + $0x50] sm:$0xff]  ;;  %v4237_v12 = vld [vmem:[%s4562_s2 + $0x58] sm:$0xff] }
 0x8f2   : > { %v1642_v58 = vld [vmem:[#allocation3 + $0x10] sm:$0xff]  ;;  %v1645_v39 = vld [vmem:[#allocation3 + $0x28] sm:$0xff] }
 0x8f3   : > { %v1641_v36 = vld [vmem:[#allocation3 + $0x8] sm:$0xff]  ;;  %v1644_v37 = vld [vmem:[#allocation3 + $0x20] sm:$0xff] }
 0x8f4   : > { %1668 = vrot.lane.b32.xlu0 %v1641_v36, %s3415_s13  ;;  %1674 = vrot.lane.b32.xlu1 %v1644_v37, %s3415_s13 }
 0x8f8   : > { %1670 = vrot.lane.b32.xlu0 %v1642_v58, %s3415_s13  ;;  %1672 = vrot.lane.b32.xlu1 %v1643_v40, %s3415_s13 }
 0x8fc   : > { %1676 = vrot.lane.b32.xlu0 %v1645_v39, %s3415_s13  ;;  %1747 = vrot.lane.b32.xlu1 %v1641_v36, %s3416_s11 }
 0x900   : > { %1656 = vrot.lane.b32.xlu0 %v3243_v42, %s3417_s14  ;;  %1658 = vrot.lane.b32.xlu1 %v4173_v43, %s3417_s14 }
 0x904   : > { %1749 = vrot.lane.b32.xlu0 %v1642_v58, %s3416_s11  ;;  %1753 = vrot.lane.b32.xlu1 %v1644_v37, %s3416_s11 }
 0x908   : > { %1745 = vrot.lane.b32.xlu0 %v1640_v56, %s3416_s11  ;;  %1751 = vrot.lane.b32.xlu1 %v1643_v40, %s3416_s11 }
 0x90c   : > { %1755 = vrot.lane.b32.xlu0 %v1645_v39, %s3416_s11  ;;  %1832 = vrot.lane.b32.xlu1 %v1642_v58, %s3418_s12 }
 0x910   : > { %1830 = vrot.lane.b32.xlu0 %v1641_v36, %s3418_s12  ;;  %1836 = vrot.lane.b32.xlu1 %v1644_v37, %s3418_s12 }
 0x914   : > { %1828 = vrot.lane.b32.xlu0 %v1640_v56, %s3418_s12  ;;  %1834 = vrot.lane.b32.xlu1 %v1643_v40, %s3418_s12 }
 0x918   : > { %1838 = vrot.lane.b32.xlu0 %v1645_v39, %s3418_s12  ;;  %1826 = vrot.lane.b32.xlu1 %v4173_v43, %s3419_s26 }
 0x91c   : > { %1824 = vrot.lane.b32.xlu0 %v3243_v42, %s3419_s26  ;;  %1922 = vperm.xlu1 %3242, %v4112_v25  }
 0x920   : > { %1917 = vperm.xlu0 %3241, %v4107_v23   ;;  %1927 = vperm.xlu1 %3242, %v4117_v22  }
 0x924   : > { %1932 = vperm.xlu0 %3241, %v4122_v26  }
 0x961   : > { %v1667_v1 = vpop.permute.xlu1 %1666 }
 0x966   : > { %v1669_v63 = vpop.permute.xlu0 %1668  ;;  %v1675_v3 = vpop.permute.xlu1 %1674 }
 0x967   : > { %v1678_v44 = vsel %vm427_vm2, %v1667_v1, %v1669_v63 }
 0x96a   : > { %v1671_v2 = vpop.permute.xlu0 %1670  ;;  %v1673_v45 = vpop.permute.xlu1 %1672 }
 0x96b   : > { %v1679_v19 = vsel %vm427_vm2, %v1669_v63, %v1671_v2  ;;  %v1680_v25 = vsel %vm427_vm2, %v1673_v45, %v1675_v3 }
 0x96c   : > { %1692 = vmatprep.subr.bf16.mxu1 %v1679_v19 }
 0x96d   : > { %1693 = vmatpush1.bf16.msra.mxu1 %v1678_v44 }
 0x96e   : > { %v1677_v20 = vpop.permute.xlu0 %1676  ;;  %v1748_v22 = vpop.permute.xlu1 %1747 }
 0x96f   : > { %v1681_v23 = vsel %vm427_vm2, %v1675_v3, %v1677_v20 }
 0x970   : > { %1694 = vmatprep.subr.bf16.mxu1 %v1681_v23 }
 0x971   : > { %1695 = vmatpush1.bf16.msra.mxu1 %v1680_v25 }
 0x972   : > { %v1657_v26 = vpop.permute.xlu0 %1656  ;;  %v1659_v46 = vpop.permute.xlu1 %1658 }
 0x974   : > { %2976 = vmatmul.mubr.msk.bf16.vlgmr.msra.gmra.mrb[8].mxu1 %vm436_vm3, %v1657_v26 }
 0x975   : > { %1734 = vmatprep.mubr.bf16.mxu1 %v3407_v0 }
 0x976   : > { %v1750_v21 = vpop.permute.xlu0 %1749  ;;  %v1754_v48 = vpop.permute.xlu1 %1753 }
 0x977   : > { %v1758_v47 = vsel %vm508_vm4, %v1748_v22, %v1750_v21 }
 0x978   : > { %1771 = vmatprep.subr.bf16.mxu1 %v1758_v47 }
 0x97a   : > { %v1746_v49 = vpop.permute.xlu0 %1745  ;;  %v1752_v51 = vpop.permute.xlu1 %1751 }
 0x97b   : > { %v1757_v50 = vsel %vm508_vm4, %v1746_v49, %v1748_v22  ;;  %v1759_v53 = vsel %vm508_vm4, %v1752_v51, %v1754_v48 }
 0x97c   : > { %2977 = vmatmul.mubr.msk.bf16.gmra.mrb[12].mxu1 %vm436_vm3, %v1659_v46 }
 0x97d   : > { %1772 = vmatpush1.bf16.msra.mxu1 %v1757_v50  ;;  %1803 = vmatprep.mubr.bf16.mxu1 %v3407_v0 }
 0x97e   : > { %v1756_v52 = vpop.permute.xlu0 %1755  ;;  %v1833_v60 = vpop.permute.xlu1 %1832 }
 0x97f   : > { %v1760_v54 = vsel %vm508_vm4, %v1754_v48, %v1756_v52 }
 0x980   : > { %1773 = vmatprep.subr.bf16.mxu1 %v1760_v54 }
 0x981   : > { %1774 = vmatpush1.bf16.msra.mxu1 %v1759_v53 }
 0x982   : > { %v1831_v59 = vpop.permute.xlu0 %1830  ;;  %v1837_v4 = vpop.permute.xlu1 %1836 }
 0x983   : > { %v1841_v61 = vsel %vm592_vm5, %v1831_v59, %v1833_v60 }
 0x984   : > { %2978 = vmatmul.mubr.msk.bf16.vlgmr.msra.gmra.mrb[8].mxu1 %vm436_vm3, %v3243_v42  ;;  %1854 = vmatprep.subr.bf16.mxu1 %v1841_v61 }
 0x985   : > { %1813 = vmatprep.mubr.bf16.mxu1 %v3407_v0 }
 0x986   : > { %v1829_v62 = vpop.permute.xlu0 %1828  ;;  %v1835_v7 = vpop.permute.xlu1 %1834 }
 0x987   : > { %v1840_v5 = vsel %vm592_vm5, %v1829_v62, %v1831_v59  ;;  %v1842_v29 = vsel %vm592_vm5, %v1835_v7, %v1837_v4 }
 0x988   : > { %1855 = vmatpush1.bf16.msra.mxu1 %v1840_v5 }
 0x98a   : > { %v1839_v6 = vpop.permute.xlu0 %1838  ;;  %v1827_v32 = vpop.permute.xlu1 %1826 }
 0x98b   : > { %v1843_v27 = vsel %vm592_vm5, %v1837_v4, %v1839_v6 }
 0x98c   : > { %2979 = vmatmul.mubr.msk.bf16.gmra.mrb[12].mxu1 %vm436_vm3, %v4173_v43  ;;  %1856 = vmatprep.subr.bf16.mxu1 %v1843_v27 }
 0x98d   : > { %1857 = vmatpush1.bf16.msra.mxu1 %v1842_v29  ;;  %1886 = vmatprep.mubr.bf16.mxu1 %v3407_v0 }
 0x98e   : > { %v1825_v30 = vpop.permute.xlu0 %1824 }
 0x994   : > { %2980 = vmatmul.mubr.msk.bf16.vlgmr.msra.gmra.mrb[8].mxu1 %vm436_vm3, %v1825_v30 }
 0x995   : > { %1896 = vmatprep.mubr.bf16.mxu1 %v3407_v0 }
 0x99b   : > { %v1923_v33 = vpop.permute.xlu1 %1922 }
 0x99c   : > { %2981 = vmatmul.mubr.msk.bf16.gmra.mrb[12].mxu1 %vm436_vm3, %v1827_v32 }
 0x99f   : > { %v1918_v16 = vpop.permute.xlu0 %1917  ;;  %v1928_v63 = vpop.permute.xlu1 %1927 }
 0x9a3   : > { %v1933_v25 = vpop.permute.xlu0 %1932 }
 0xa67   : > { %v1888_v13 = vpop.f32.mrb[8].mxu1 }
 0xa68   : > { %v1935_v17 = vadd.f32 %v1918_v16, %v1888_v13  ;;  %v1890_v35 = vpop.f32.mrb[9].mxu1 }
 0xa69   : > { %v1936_v55 = vadd.f32 %v1918_v16, %v1890_v35  ;;  %v1892_v34 = vpop.f32.mrb[10].mxu1 }
 0xa6a   : > { %v4240_v36 = vadd.f32 %v1935_v17, %v3973_v24  ;;  %v1937_v56 = vadd.f32 %v1923_v33, %v1892_v34  ;;  %v1894_v58 = vpop.f32.mrb[11].mxu1 }
 0xa6b   : > { %v4243_v37 = vadd.f32 %v1936_v55, %v3976_v28  ;;  %v1938_v39 = vadd.f32 %v1923_v33, %v1894_v58 }
 0xa6c   : > { %vm1951_vm12 = vcmp.gt.f32.partialorder %v4240_v36, 0.0  ;;  %v1959_v40 = vmul.f32 0.1, %v4240_v36  ;;  %v4248_v42 = vadd.f32 %v1937_v56, %v3981_v31 }
 0xa6d   : > { %vm1952_vm13 = vcmp.gt.f32.partialorder %v4243_v37, 0.0  ;;  %v1960_v43 = vmul.f32 0.1, %v4243_v37  ;;  %v4253_v24 = vadd.f32 %v1938_v39, %v3986_v14 }
 0xa6e   : > { %v4256_v1 = vsel %vm1951_vm12, %v4240_v36, %v1959_v40  ;;  %vm1953_vm14 = vcmp.gt.f32.partialorder %v4248_v42, 0.0  ;;  %v1961_v28 = vmul.f32 0.1, %v4248_v42 }
 0xa6f   : > { %v4261_v2 = vsel %vm1952_vm13, %v4243_v37, %v1960_v43  ;;  %vm1954_vm15 = vcmp.gt.f32.partialorder %v4253_v24, 0.0  ;;  %v1962_v31 = vmul.f32 0.1, %v4253_v24  ;;  %v1898_v3 = vpop.f32.mrb[12].mxu1  ;;  %v1983_v60 = vmul.f32 (%p4608_p7), %v3613_v8, %v4256_v1 }
 0xa70   : > { %v1969_v19 = vsel %vm1953_vm14, %v4248_v42, %v1961_v28  ;;  %v1939_v14 = vadd.f32 %v1928_v63, %v1898_v3  ;;  %v1900_v44 = vpop.f32.mrb[13].mxu1  ;;  %v1984_v5 = vmul.f32 (%p4608_p7), %v3615_v9, %v4261_v2 }
 0xa71   : > { %v4267_v20 = vsel %vm1954_vm15, %v4253_v24, %v1962_v31  ;;  %v1940_v45 = vadd.f32 %v1928_v63, %v1900_v44  ;;  %v1902_v23 = vpop.f32.mrb[14].mxu1  ;;  %v1985_v61 = vmul.f32 (%p4608_p7), %v3613_v8, %v1969_v19 }
 0xa72   : > { %v4270_v22 = vadd.f32 %v1939_v14, %v4003_v57  ;;  %v1941_v26 = vadd.f32 %v1933_v25, %v1902_v23  ;;  %v1904_v46 = vpop.f32.mrb[15].mxu1  ;;  %v1986_v6 = vmul.f32 (%p4608_p7), %v3615_v9, %v4267_v20 }
 0xa73   : > { %v4273_v21 = vadd.f32 %v1940_v45, %v4006_v38  ;;  %v1942_v47 = vadd.f32 %v1933_v25, %v1904_v46  ;;  %1982 = sbr.rel (!%p4608_p7) target bundleno = 2806 (0xaf6), region = 80  ;;  %v1991_v27 = vpack.c.bf16 (%p4608_p7), %v1985_v61, %v1983_v60 }
 0xa74   : > { %vm1955_vm6 = vcmp.gt.f32.partialorder %v4270_v22, 0.0  ;;  %v1963_v48 = vmul.f32 0.1, %v4270_v22  ;;  %v4278_v49 = vadd.f32 %v1941_v26, %v4011_v41  ;;  %v1992_v30 = vpack.c.bf16 (%p4608_p7), %v1986_v6, %v1984_v5 }
 0xa75   : > { %vm1956_vm7 = vcmp.gt.f32.partialorder %v4273_v21, 0.0  ;;  %v1964_v50 = vmul.f32 0.1, %v4273_v21  ;;  %v4283_v57 = vadd.f32 %v1942_v47, %v4016_v18  ;;  %1999 = vrot.lane.b32.xlu0 (%p4608_p7), %v1991_v27, %s3428_s10 }
 0xa76   : > { %v1971_v51 = vsel %vm1955_vm6, %v4270_v22, %v1963_v48  ;;  %vm1957_vm8 = vcmp.gt.f32.partialorder %v4278_v49, 0.0  ;;  %v1965_v38 = vmul.f32 0.1, %v4278_v49 }
 0xa77   : > { %v1972_v52 = vsel %vm1956_vm7, %v4273_v21, %v1964_v50  ;;  %vm1958_vm9 = vcmp.gt.f32.partialorder %v4283_v57, 0.0  ;;  %v1966_v41 = vmul.f32 0.1, %v4283_v57  ;;  %v1987_v18 = vmul.f32 (%p4608_p7), %v3613_v8, %v1971_v51 }
 0xa78   : > { %v1973_v53 = vsel %vm1957_vm8, %v4278_v49, %v1965_v38  ;;  %v1988_v62 = vmul.f32 (%p4608_p7), %v3615_v9, %v1972_v52 }
 0xa79   : > { %v1974_v54 = vsel %vm1958_vm9, %v4283_v57, %v1966_v41  ;;  %v1989_v59 = vmul.f32 (%p4608_p7), %v3613_v8, %v1973_v53  ;;  %2001 = vrot.lane.b32.xlu0 (%p4608_p7), %v1992_v30, %s3428_s10 }
 0xa7a   : > { %v1990_v4 = vmul.f32 %v3615_v9, %v1974_v54 }
 0xa7b   : > { %v1993_v7 = vpack.c.bf16 %v1989_v59, %v1987_v18 }
 0xa7c   : > { %v1994_v29 = vpack.c.bf16 %v1990_v4, %v1988_v62 }
 0xa7d   : > { %2003 = vrot.lane.b32.xlu1 %v1993_v7, %s3428_s10 }
 0xa81   : > { %2005 = vrot.lane.b32.xlu1 %v1994_v29, %s3428_s10 }
 0xae7   : > { %v2000_v16 = vpop.permute.xlu0 %1999 }
 0xae8   : > { %2016 = vst.msk [vmem:[#allocation3] sm:$0xff] %vm221_vm1, %v2000_v16 }
 0xaeb   : > { %v2002_v33 = vpop.permute.xlu0 %2001 }
 0xaec   : > { %v2008_v35 = vsel %vm218_vm0, %v2000_v16, %v2002_v33  ;;  %2018 = vst.msk [vmem:[#allocation3 + $0x10] sm:$0xff] %vm218_vm0, %v2002_v33 }
 0xaed   : > { %2017 = vst [vmem:[#allocation3 + $0x8] sm:$0xff] %v2008_v35 }
 0xaef   : > { %v2004_v32 = vpop.permute.xlu1 %2003 }
 0xaf0   : > { %2019 = vst.msk [vmem:[#allocation3 + $0x18] sm:$0xff] %vm221_vm1, %v2004_v32 }
 0xaf3   : > { %v2006_v13 = vpop.permute.xlu1 %2005 }
 0xaf4   : > { %v2009_v17 = vsel %vm218_vm0, %v2004_v32, %v2006_v13  ;;  %2021 = vst.msk [vmem:[#allocation3 + $0x28] sm:$0xff] %vm218_vm0, %v2006_v13 }
 0xaf5   : > { %2020 = vst [vmem:[#allocation3 + $0x20] sm:$0xff] %v2009_v17 }
 0xaf6 PF: > { %p4609_p9 = scmp.ne.s32.totalorder %s4591_s15, 0 }
 0xaf7   : > { %v2027_v55 = vpack.c.bf16 (!%p4609_p9), %v1973_v53, %v1971_v51  ;;  %v2025_v34 = vpack.c.bf16 (!%p4609_p9), %v1969_v19, %v4256_v1  ;;  %s3429_s29 = smov (!%p4609_p9), 5   ;;  %v2028_v56 = vpack.c.bf16 (!%p4609_p9), %v1974_v54, %v1972_v52  ;;  %v2026_v58 = vpack.c.bf16 (!%p4609_p9), %v4267_v20, %v4261_v2 }
 0xaf8   : > { %2024 = sbr.rel (%p4609_p9) target bundleno = 2930 (0xb72), region = 84 }
 0xaf9   : > { %2037 = vrot.lane.b32.xlu1 (!%p4609_p9), %v2027_v55, %s3429_s29  ;;  %2033 = vrot.lane.b32.xlu0 (!%p4609_p9), %v2025_v34, %s3429_s29 }
 0xafd   : > { %2039 = vrot.lane.b32.xlu1 (!%p4609_p9), %v2028_v56, %s3429_s29  ;;  %2035 = vrot.lane.b32.xlu0 (!%p4609_p9), %v2026_v58, %s3429_s29 }
 0xb6b   : > { %v2038_v39 = vpop.permute.xlu1 %2037  ;;  %v2034_v40 = vpop.permute.xlu0 %2033 }
 0xb6c   : > { %2053 = vst.msk [vmem:[#allocation3 + $0x18] sm:$0xff] %vm221_vm1, %v2038_v39  ;;  %2050 = vst.msk [vmem:[#allocation3] sm:$0xff] %vm221_vm1, %v2034_v40 }
 0xb6f   : > { %v2040_v43 = vpop.permute.xlu1 %2039  ;;  %v2036_v63 = vpop.permute.xlu0 %2035 }
 0xb70   : > { %v2043_v28 = vsel %vm218_vm0, %v2038_v39, %v2040_v43  ;;  %2055 = vst.msk [vmem:[#allocation3 + $0x28] sm:$0xff] %vm218_vm0, %v2040_v43  ;;  %v2042_v1 = vsel %vm218_vm0, %v2034_v40, %v2036_v63  ;;  %2052 = vst.msk [vmem:[#allocation3 + $0x10] sm:$0xff] %vm218_vm0, %v2036_v63 }
 0xb71   : > { %2054 = vst [vmem:[#allocation3 + $0x20] sm:$0xff] %v2043_v28  ;;  %2051 = vst [vmem:[#allocation3 + $0x8] sm:$0xff] %v2042_v1 }
 0xb72 PF: > { %2149 = vmatprep.mubr.bf16.mxu0 %v3407_v0  ;;  %3245 = vset.pattern.permute.xlu0 %v3407_v0  ;;  %v3247_v20 = vld [vmem:[%s4561_s1 + $0x20] sm:$0xff]   ;;  %v3248_v45 = vld [vmem:[%s4561_s1 + $0x28] sm:$0xff]   ;;  %s3430_s23 = smov 118   ;;  %vm2245_vm10 = vcmask 965632   ;;  %v4378_v27 = vld [vmem:[%s4564_s4 + $0x50] sm:$0xff]  ;;  %p4610_p5 = scmp.ne.s32.totalorder %s4591_s15, 0 }
 0xb73   : > { %v2065_v31 = vld [vmem:[#allocation3] sm:$0xff]  ;;  %3246 = vset.pattern.permute.xlu1 %v3407_v0  ;;  %v2068_v44 = vld [vmem:[#allocation3 + $0x18] sm:$0xff]  ;;  %v4373_v7 = vld [vmem:[%s4564_s4 + $0x48] sm:$0xff]  ;;  %s3431_s17 = smov (%p4610_p5), 5  }
 0xb74   : > { %2091 = vrot.lane.b32.xlu1 %v2065_v31, %s3415_s13  ;;  %v4368_v6 = vld [vmem:[%s4564_s4 + $0x40] sm:$0xff]  ;;  %v4383_v29 = vld [vmem:[%s4564_s4 + $0x58] sm:$0xff] }
 0xb77   : > { %v2067_v3 = vld [vmem:[#allocation3 + $0x10] sm:$0xff]  ;;  %v2070_v14 = vld [vmem:[#allocation3 + $0x28] sm:$0xff] }
 0xb78   : > { %v2066_v2 = vld [vmem:[#allocation3 + $0x8] sm:$0xff]  ;;  %v2069_v19 = vld [vmem:[#allocation3 + $0x20] sm:$0xff] }
 0xb79   : > { %2093 = vrot.lane.b32.xlu0 %v2066_v2, %s3415_s13  ;;  %2099 = vrot.lane.b32.xlu1 %v2069_v19, %s3415_s13 }
 0xb7d   : > { %2095 = vrot.lane.b32.xlu0 %v2067_v3, %s3415_s13  ;;  %2097 = vrot.lane.b32.xlu1 %v2068_v44, %s3415_s13 }
 0xb81   : > { %2101 = vrot.lane.b32.xlu0 %v2070_v14, %s3415_s13  ;;  %2083 = vrot.lane.b32.xlu1 %v3248_v45, %s3417_s14 }
 0xb85   : > { %2081 = vrot.lane.b32.xlu0 %v3247_v20, %s3417_s14  ;;  %2237 = vrot.lane.b32.xlu1 %v2067_v3, %s3430_s23 }
 0xb89   : > { %2235 = vrot.lane.b32.xlu0 %v2066_v2, %s3430_s23  ;;  %2241 = vrot.lane.b32.xlu1 %v2069_v19, %s3430_s23 }
 0xb8d   : > { %2233 = vrot.lane.b32.xlu0 %v2065_v31, %s3430_s23  ;;  %2239 = vrot.lane.b32.xlu1 %v2068_v44, %s3430_s23 }
 0xb91   : > { %2243 = vrot.lane.b32.xlu0 %v2070_v14, %s3430_s23  ;;  %2231 = vrot.lane.b32.xlu1 %v3248_v45, %s3419_s26 }
 0xb95   : > { %2229 = vrot.lane.b32.xlu0 %v3247_v20, %s3419_s26  ;;  %2328 = vperm.xlu1 %3246, %v4227_v15  }
 0xb99   : > { %2323 = vperm.xlu0 %3245, %v4222_v10   ;;  %2333 = vperm.xlu1 %3246, %v4232_v11  }
 0xb9d   : > { %2338 = vperm.xlu0 %3245, %v4237_v12  }
 0xbe6   : > { %v2092_v25 = vpop.permute.xlu1 %2091 }
 0xbeb   : > { %v2094_v23 = vpop.permute.xlu0 %2093  ;;  %v2100_v46 = vpop.permute.xlu1 %2099 }
 0xbec   : > { %v2103_v48 = vsel %vm427_vm2, %v2092_v25, %v2094_v23 }
 0xbef   : > { %v2096_v26 = vpop.permute.xlu0 %2095  ;;  %v2098_v51 = vpop.permute.xlu1 %2097 }
 0xbf0   : > { %v2104_v47 = vsel %vm427_vm2, %v2094_v23, %v2096_v26  ;;  %v2105_v15 = vsel %vm427_vm2, %v2098_v51, %v2100_v46 }
 0xbf1   : > { %2117 = vmatprep.subr.bf16.mxu0 %v2104_v47 }
 0xbf2   : > { %2118 = vmatpush1.bf16.msra.mxu0 %v2103_v48 }
 0xbf3   : > { %v2102_v50 = vpop.permute.xlu0 %2101  ;;  %v2084_v12 = vpop.permute.xlu1 %2083 }
 0xbf4   : > { %v2106_v10 = vsel %vm427_vm2, %v2100_v46, %v2102_v50 }
 0xbf5   : > { %2119 = vmatprep.subr.bf16.mxu0 %v2106_v10 }
 0xbf6   : > { %2120 = vmatpush1.bf16.msra.mxu0 %v2105_v15 }
 0xbf7   : > { %v2082_v11 = vpop.permute.xlu0 %2081  ;;  %2176 = vmatprep.subr.bf16.mxu0 %v2066_v2  ;;  %v2238_v52 = vpop.permute.xlu1 %2237 }
 0xbf9   : > { %2992 = vmatmul.mubr.msk.bf16.vlgmr.msra.gmra.mrb[16].mxu0 %vm436_vm3, %v2082_v11 }
 0xbfa   : > { %2177 = vmatpush1.bf16.msra.mxu0 %v2065_v31  ;;  %2159 = vmatprep.mubr.bf16.mxu0 %v3407_v0 }
 0xbfb   : > { %v2236_v38 = vpop.permute.xlu0 %2235  ;;  %2178 = vmatprep.subr.bf16.mxu0 %v2069_v19  ;;  %v2242_v54 = vpop.permute.xlu1 %2241 }
 0xbfc   : > { %v2247_v41 = vsel %vm2245_vm10, %v2236_v38, %v2238_v52 }
 0xbfe   : > { %2179 = vmatpush1.bf16.msra.mxu0 %v2068_v44 }
 0xbff   : > { %v2234_v53 = vpop.permute.xlu0 %2233  ;;  %2260 = vmatprep.subr.bf16.mxu0 %v2247_v41  ;;  %v2240_v60 = vpop.permute.xlu1 %2239 }
 0xc00   : > { %v2246_v59 = vsel %vm2245_vm10, %v2234_v53, %v2236_v38  ;;  %v2248_v62 = vsel %vm2245_vm10, %v2240_v60, %v2242_v54 }
 0xc01   : > { %2993 = vmatmul.mubr.msk.bf16.gmra.mrb[20].mxu0 %vm436_vm3, %v2084_v12 }
 0xc02   : > { %2208 = vmatprep.mubr.bf16.mxu0 %v3407_v0 }
 0xc03   : > { %v2244_v18 = vpop.permute.xlu0 %2243  ;;  %v2232_v5 = vpop.permute.xlu1 %2231 }
 0xc04   : > { %v2249_v61 = vsel %vm2245_vm10, %v2242_v54, %v2244_v18 }
 0xc07   : > { %v2230_v4 = vpop.permute.xlu0 %2229 }
 0xc09   : > { %2994 = vmatmul.mubr.msk.bf16.vlgmr.msra.gmra.mrb[16].mxu0 %vm436_vm3, %v3247_v20 }
 0xc0a   : > { %2261 = vmatpush1.bf16.msra.mxu0 %v2246_v59  ;;  %2218 = vmatprep.mubr.bf16.mxu0 %v3407_v0 }
 0xc0b   : > { %2262 = vmatprep.subr.bf16.mxu0 %v2249_v61 }
 0xc0e   : > { %2263 = vmatpush1.bf16.msra.mxu0 %v2248_v62 }
 0xc11   : > { %2995 = vmatmul.mubr.msk.bf16.gmra.mrb[20].mxu0 %vm436_vm3, %v3248_v45 }
 0xc12   : > { %2292 = vmatprep.mubr.bf16.mxu0 %v3407_v0 }
 0xc14   : > { %v2329_v16 = vpop.permute.xlu1 %2328 }
 0xc18   : > { %v2324_v30 = vpop.permute.xlu0 %2323  ;;  %v2334_v1 = vpop.permute.xlu1 %2333 }
 0xc19   : > { %2996 = vmatmul.mubr.msk.bf16.vlgmr.msra.gmra.mrb[16].mxu0 %vm436_vm3, %v2230_v4 }
 0xc1a   : > { %2302 = vmatprep.mubr.bf16.mxu0 %v3407_v0 }
 0xc1c   : > { %v2339_v44 = vpop.permute.xlu0 %2338 }
 0xc21   : > { %2997 = vmatmul.mubr.msk.bf16.gmra.mrb[20].mxu0 %vm436_vm3, %v2232_v5 }
 0xcec   : > { %v2294_v32 = vpop.f32.mrb[16].mxu0 }
 0xced   : > { %v2341_v13 = vadd.f32 %v2324_v30, %v2294_v32  ;;  %v2296_v33 = vpop.f32.mrb[17].mxu0 }
 0xcee   : > { %v2342_v17 = vadd.f32 %v2324_v30, %v2296_v33  ;;  %v2298_v35 = vpop.f32.mrb[18].mxu0 }
 0xcef   : > { %vm2349_vm11 = vcmp.gt.f32.partialorder %v2341_v13, 0.0  ;;  %v2357_v55 = vmul.f32 0.1, %v2341_v13  ;;  %v2343_v34 = vadd.f32 %v2329_v16, %v2298_v35  ;;  %v2300_v56 = vpop.f32.mrb[19].mxu0 }
 0xcf0   : > { %vm2350_vm12 = vcmp.gt.f32.partialorder %v2342_v17, 0.0  ;;  %v2358_v58 = vmul.f32 0.1, %v2342_v17  ;;  %v2344_v39 = vadd.f32 %v2329_v16, %v2300_v56 }
 0xcf1   : > { %v4385_v40 = vsel %vm2349_vm11, %v2341_v13, %v2357_v55  ;;  %vm2351_vm13 = vcmp.gt.f32.partialorder %v2343_v34, 0.0  ;;  %v2359_v43 = vmul.f32 0.1, %v2343_v34 }
 0xcf2   : > { %v4387_v63 = vsel %vm2350_vm12, %v2342_v17, %v2358_v58  ;;  %vm2352_vm14 = vcmp.gt.f32.partialorder %v2344_v39, 0.0  ;;  %v2360_v28 = vmul.f32 0.1, %v2344_v39  ;;  %v2381_v52 = vmul.f32 (%p4610_p5), %v3613_v8, %v4385_v40 }
 0xcf3   : > { %v2367_v2 = vsel %vm2351_vm13, %v2343_v34, %v2359_v43  ;;  %v2382_v18 = vmul.f32 (%p4610_p5), %v3615_v9, %v4387_v63 }
 0xcf4   : > { %v2368_v31 = vsel %vm2352_vm14, %v2344_v39, %v2360_v28  ;;  %v2304_v3 = vpop.f32.mrb[20].mxu0  ;;  %v2383_v41 = vmul.f32 (%p4610_p5), %v3613_v8, %v2367_v2 }
 0xcf5   : > { %v2345_v19 = vadd.f32 %v2334_v1, %v2304_v3  ;;  %v2306_v14 = vpop.f32.mrb[21].mxu0  ;;  %v2384_v59 = vmul.f32 (%p4610_p5), %v3615_v9, %v2368_v31 }
 0xcf6   : > { %v2346_v20 = vadd.f32 %v2334_v1, %v2306_v14  ;;  %v2308_v45 = vpop.f32.mrb[22].mxu0  ;;  %2380 = sbr.rel (!%p4610_p5) target bundleno = 3449 (0xd79), region = 88  ;;  %v2389_v61 = vpack.c.bf16 (%p4610_p5), %v2383_v41, %v2381_v52 }
 0xcf7   : > { %vm2353_vm15 = vcmp.gt.f32.partialorder %v2345_v19, 0.0  ;;  %v2361_v23 = vmul.f32 0.1, %v2345_v19  ;;  %v2347_v25 = vadd.f32 %v2339_v44, %v2308_v45  ;;  %v2310_v26 = vpop.f32.mrb[23].mxu0  ;;  %v2390_v4 = vpack.c.bf16 (%p4610_p5), %v2384_v59, %v2382_v18 }
 0xcf8   : > { %vm2354_vm6 = vcmp.gt.f32.partialorder %v2346_v20, 0.0  ;;  %v2362_v46 = vmul.f32 0.1, %v2346_v20  ;;  %v2348_v47 = vadd.f32 %v2339_v44, %v2310_v26  ;;  %2397 = vrot.lane.b32.xlu0 (%p4610_p5), %v2389_v61, %s3431_s17 }
 0xcf9   : > { %v2369_v48 = vsel %vm2353_vm15, %v2345_v19, %v2361_v23  ;;  %vm2355_vm7 = vcmp.gt.f32.partialorder %v2347_v25, 0.0  ;;  %v2363_v50 = vmul.f32 0.1, %v2347_v25 }
 0xcfa   : > { %v2370_v51 = vsel %vm2354_vm6, %v2346_v20, %v2362_v46  ;;  %vm2356_vm8 = vcmp.gt.f32.partialorder %v2348_v47, 0.0  ;;  %v2364_v10 = vmul.f32 0.1, %v2348_v47  ;;  %v2385_v12 = vmul.f32 (%p4610_p5), %v3613_v8, %v2369_v48 }
 0xcfb   : > { %v2371_v15 = vsel %vm2355_vm7, %v2347_v25, %v2363_v50  ;;  %v2386_v53 = vmul.f32 (%p4610_p5), %v3615_v9, %v2370_v51 }
 0xcfc   : > { %v2372_v11 = vsel %vm2356_vm8, %v2348_v47, %v2364_v10  ;;  %v2387_v38 = vmul.f32 (%p4610_p5), %v3613_v8, %v2371_v15  ;;  %2399 = vrot.lane.b32.xlu0 (%p4610_p5), %v2390_v4, %s3431_s17 }
 0xcfd   : > { %v2388_v54 = vmul.f32 %v3615_v9, %v2372_v11 }
 0xcfe   : > { %v2391_v60 = vpack.c.bf16 %v2387_v38, %v2385_v12 }
 0xcff   : > { %v2392_v62 = vpack.c.bf16 %v2388_v54, %v2386_v53 }
 0xd00   : > { %2401 = vrot.lane.b32.xlu1 %v2391_v60, %s3431_s17 }
 0xd04   : > { %2403 = vrot.lane.b32.xlu1 %v2392_v62, %s3431_s17 }
 0xd6a   : > { %v2398_v8 = vpop.permute.xlu0 %2397 }
 0xd6b   : > { %2414 = vst.msk [vmem:[#allocation3] sm:$0xff] %vm221_vm1, %v2398_v8 }
 0xd6e   : > { %v2400_v32 = vpop.permute.xlu0 %2399 }
 0xd6f   : > { %v2406_v9 = vsel %vm218_vm0, %v2398_v8, %v2400_v32  ;;  %2416 = vst.msk [vmem:[#allocation3 + $0x10] sm:$0xff] %vm218_vm0, %v2400_v32 }
 0xd70   : > { %2415 = vst [vmem:[#allocation3 + $0x8] sm:$0xff] %v2406_v9 }
 0xd72   : > { %v2402_v5 = vpop.permute.xlu1 %2401 }
 0xd73   : > { %2417 = vst.msk [vmem:[#allocation3 + $0x18] sm:$0xff] %vm221_vm1, %v2402_v5 }
 0xd76   : > { %v2404_v30 = vpop.permute.xlu1 %2403 }
 0xd77   : > { %v2407_v16 = vsel %vm218_vm0, %v2402_v5, %v2404_v30  ;;  %2419 = vst.msk [vmem:[#allocation3 + $0x28] sm:$0xff] %vm218_vm0, %v2404_v30 }
 0xd78   : > { %2418 = vst [vmem:[#allocation3 + $0x20] sm:$0xff] %v2407_v16 }
 0xd79 PF: > { %p4611_p10 = scmp.ne.s32.totalorder %s4591_s15, 0 }
 0xd7a   : > { %v2425_v13 = vpack.c.bf16 (!%p4611_p10), %v2371_v15, %v2369_v48  ;;  %v2423_v33 = vpack.c.bf16 (!%p4611_p10), %v2367_v2, %v4385_v40  ;;  %s3432_s8 = smov (!%p4611_p10), 5   ;;  %v2426_v17 = vpack.c.bf16 (!%p4611_p10), %v2372_v11, %v2370_v51  ;;  %v2424_v35 = vpack.c.bf16 (!%p4611_p10), %v2368_v31, %v4387_v63 }
 0xd7b   : > { %2422 = sbr.rel (%p4611_p10) target bundleno = 3573 (0xdf5), region = 92 }
 0xd7c   : > { %2435 = vrot.lane.b32.xlu1 (!%p4611_p10), %v2425_v13, %s3432_s8  ;;  %2431 = vrot.lane.b32.xlu0 (!%p4611_p10), %v2423_v33, %s3432_s8 }
 0xd80   : > { %2437 = vrot.lane.b32.xlu1 (!%p4611_p10), %v2426_v17, %s3432_s8  ;;  %2433 = vrot.lane.b32.xlu0 (!%p4611_p10), %v2424_v35, %s3432_s8 }
 0xdee   : > { %v2436_v55 = vpop.permute.xlu1 %2435  ;;  %v2432_v34 = vpop.permute.xlu0 %2431 }
 0xdef   : > { %2451 = vst.msk [vmem:[#allocation3 + $0x18] sm:$0xff] %vm221_vm1, %v2436_v55  ;;  %2448 = vst.msk [vmem:[#allocation3] sm:$0xff] %vm221_vm1, %v2432_v34 }
 0xdf2   : > { %v2438_v56 = vpop.permute.xlu1 %2437  ;;  %v2434_v58 = vpop.permute.xlu0 %2433 }
 0xdf3   : > { %v2441_v39 = vsel %vm218_vm0, %v2436_v55, %v2438_v56  ;;  %2453 = vst.msk [vmem:[#allocation3 + $0x28] sm:$0xff] %vm218_vm0, %v2438_v56  ;;  %v2440_v40 = vsel %vm218_vm0, %v2432_v34, %v2434_v58  ;;  %2450 = vst.msk [vmem:[#allocation3 + $0x10] sm:$0xff] %vm218_vm0, %v2434_v58 }
 0xdf4   : > { %2452 = vst [vmem:[#allocation3 + $0x20] sm:$0xff] %v2441_v39  ;;  %2449 = vst [vmem:[#allocation3 + $0x8] sm:$0xff] %v2440_v40 }
 0xdf5 PF: > { %2543 = vmatprep.mubr.bf16.mxu1 %v3407_v0  ;;  %3249 = vset.pattern.permute.xlu0 %v3407_v0  ;;  %v3251_v3 = vld [vmem:[%s4563_s3 + $0x20] sm:$0xff]   ;;  %v4434_v19 = vld [vmem:[%s4563_s3 + $0x28] sm:$0xff]   ;;  %vm2794_vm0 = vcmask 949248   ;;  %p4613_p0 = scmp.ne.s32.totalorder %s4585_s6, 0  ;;  %s3434_s18 = smov [#allocation5]  }
 0xdf6   : > { %v2459_v63 = vld [vmem:[#allocation3] sm:$0xff]  ;;  %3250 = vset.pattern.permute.xlu1 %v3407_v0  ;;  %v2462_v31 = vld [vmem:[#allocation3 + $0x18] sm:$0xff]  ;;  %s3313_s7 = sshll.u32 %s3434_s18, 4  ;;  %s3314_s7 = int_to_ptr.vmem [resolvable:$false] %s3313_s7 }
 0xdf7   : > { %2485 = vrot.lane.b32.xlu1 %v2459_v63, %s3415_s13  ;;  %s3315_s10 = scalar_lea.vmem %s3314_s7, 1024 }
 0xdfa   : > { %v2461_v28 = vld [vmem:[#allocation3 + $0x10] sm:$0xff]  ;;  %v2464_v2 = vld [vmem:[#allocation3 + $0x28] sm:$0xff] }
 0xdfb   : > { %v2460_v43 = vld [vmem:[#allocation3 + $0x8] sm:$0xff]  ;;  %v2463_v1 = vld [vmem:[#allocation3 + $0x20] sm:$0xff] }
 0xdfc   : > { %2487 = vrot.lane.b32.xlu0 %v2460_v43, %s3415_s13  ;;  %2493 = vrot.lane.b32.xlu1 %v2463_v1, %s3415_s13 }
 0xe00   : > { %2489 = vrot.lane.b32.xlu0 %v2461_v28, %s3415_s13  ;;  %2491 = vrot.lane.b32.xlu1 %v2462_v31, %s3415_s13 }
 0xe04   : > { %2495 = vrot.lane.b32.xlu0 %v2464_v2, %s3415_s13  ;;  %2566 = vrot.lane.b32.xlu1 %v2460_v43, %s3416_s11  ;;  %s3433_s13 = smov 116  }
 0xe08   : > { %2475 = vrot.lane.b32.xlu0 %v3251_v3, %s3417_s14  ;;  %2477 = vrot.lane.b32.xlu1 %v4434_v19, %s3417_s14 }
 0xe0c   : > { %2568 = vrot.lane.b32.xlu0 %v2461_v28, %s3416_s11  ;;  %2572 = vrot.lane.b32.xlu1 %v2463_v1, %s3416_s11 }
 0xe10   : > { %2564 = vrot.lane.b32.xlu0 %v2459_v63, %s3416_s11  ;;  %2570 = vrot.lane.b32.xlu1 %v2462_v31, %s3416_s11 }
 0xe14   : > { %2574 = vrot.lane.b32.xlu0 %v2464_v2, %s3416_s11  ;;  %2651 = vrot.lane.b32.xlu1 %v2461_v28, %s3418_s12  ;;  %s3121_s11 = smul.u32 12, %s3393_s22 }
 0xe16   : > { %s2819_s14 = sadd.s32 %s3389_s21, %s3121_s11  ;;  %s4612_s21 = sand.u32 1, %s3381_s19  }
 0xe17   : > { %s4508_s30 = scalar_lea.sflag [#allocation6], %s4612_s21 }
 0xe18   : > { %2649 = vrot.lane.b32.xlu0 %v2460_v43, %s3418_s12  ;;  %2655 = vrot.lane.b32.xlu1 %v2463_v1, %s3418_s12 }
 0xe1c   : > { %2647 = vrot.lane.b32.xlu0 %v2459_v63, %s3418_s12  ;;  %2653 = vrot.lane.b32.xlu1 %v2462_v31, %s3418_s12 }
 0xe20   : > { %2657 = vrot.lane.b32.xlu0 %v2464_v2, %s3418_s12  ;;  %2645 = vrot.lane.b32.xlu1 %v4434_v19, %s3419_s26  ;;  %s3015_s12 = sshll.u32 %s2819_s14, 7 }
 0xe21   : > { %s4500_s16 = scalar_lea.hbm %s4565_s5, %s3015_s12 }
 0xe24   : > { %2643 = vrot.lane.b32.xlu0 %v3251_v3, %s3419_s26  ;;  %2741 = vperm.xlu1 %3250, %v4373_v7   ;;  %s2822_s26 = sshll.u32 %s3618_s9, 4  ;;  %s4502_s26 = int_to_ptr.vmem [resolvable:$true] %s2822_s26 }
 0xe25   : > { %s3309_s27 = scalar_lea.vmem %s4502_s26, 512  ;;  %p3316_p1 = scmp.lt.s32.totalorder %s4502_s26, %s3314_s7 }
 0xe26   : > { %p3310_p11 = scmp.ne.s32.totalorder %s4502_s26, %s3309_s27  ;;  %p3317_p13 = scmp.lt.s32.totalorder %s3315_s10, %s3309_s27 }
 0xe28   : > { %2736 = vperm.xlu0 %3249, %v4368_v6   ;;  %2746 = vperm.xlu1 %3250, %v4378_v27   ;;  %p3311_p3 = pnand %p3310_p11, %p4613_p0  ;;  %p3318_p12 = por %p3317_p13, %p3316_p1 }
 0xe2a   : > { %p3312_p8 = pneg %p3311_p3 }
 0xe2c   : > { %2751 = vperm.xlu0 %3249, %v4383_v29   ;;  %p3319_p2 = pnand %p3318_p12, %p3312_p8 }
 0xe69   : > { %v2486_v44 = vpop.permute.xlu1 %2485 }
 0xe6e   : > { %v2488_v14 = vpop.permute.xlu0 %2487  ;;  %v2494_v45 = vpop.permute.xlu1 %2493 }
 0xe6f   : > { %v2497_v25 = vsel %vm427_vm2, %v2486_v44, %v2488_v14 }
 0xe72   : > { %v2490_v20 = vpop.permute.xlu0 %2489  ;;  %v2492_v46 = vpop.permute.xlu1 %2491 }
 0xe73   : > { %v2498_v23 = vsel %vm427_vm2, %v2488_v14, %v2490_v20  ;;  %v2499_v7 = vsel %vm427_vm2, %v2492_v46, %v2494_v45 }
 0xe74   : > { %2511 = vmatprep.subr.bf16.mxu1 %v2498_v23 }
 0xe75   : > { %2512 = vmatpush1.bf16.msra.mxu1 %v2497_v25 }
 0xe76   : > { %v2496_v26 = vpop.permute.xlu0 %2495  ;;  %v2567_v27 = vpop.permute.xlu1 %2566 }
 0xe77   : > { %v2500_v6 = vsel %vm427_vm2, %v2494_v45, %v2496_v26 }
 0xe78   : > { %2513 = vmatprep.subr.bf16.mxu1 %v2500_v6 }
 0xe79   : > { %2514 = vmatpush1.bf16.msra.mxu1 %v2499_v7 }
 0xe7a   : > { %v2476_v29 = vpop.permute.xlu0 %2475  ;;  %v2478_v47 = vpop.permute.xlu1 %2477 }
 0xe7c   : > { %3008 = vmatmul.mubr.msk.bf16.vlgmr.msra.gmra.mrb[16].mxu1 %vm436_vm3, %v2476_v29 }
 0xe7d   : > { %2553 = vmatprep.mubr.bf16.mxu1 %v3407_v0 }
 0xe7e   : > { %v2569_v48 = vpop.permute.xlu0 %2568  ;;  %v2573_v51 = vpop.permute.xlu1 %2572 }
 0xe7f   : > { %v2577_v50 = vsel %vm508_vm4, %v2567_v27, %v2569_v48 }
 0xe80   : > { %2590 = vmatprep.subr.bf16.mxu1 %v2577_v50 }
 0xe82   : > { %v2565_v10 = vpop.permute.xlu0 %2564  ;;  %v2571_v11 = vpop.permute.xlu1 %2570 }
 0xe83   : > { %v2576_v15 = vsel %vm508_vm4, %v2565_v10, %v2567_v27  ;;  %v2578_v38 = vsel %vm508_vm4, %v2571_v11, %v2573_v51 }
 0xe84   : > { %3009 = vmatmul.mubr.msk.bf16.gmra.mrb[20].mxu1 %vm436_vm3, %v2478_v47 }
 0xe85   : > { %2591 = vmatpush1.bf16.msra.mxu1 %v2576_v15  ;;  %2622 = vmatprep.mubr.bf16.mxu1 %v3407_v0 }
 0xe86   : > { %v2575_v12 = vpop.permute.xlu0 %2574  ;;  %v2652_v53 = vpop.permute.xlu1 %2651 }
 0xe87   : > { %v2579_v52 = vsel %vm508_vm4, %v2573_v51, %v2575_v12 }
 0xe88   : > { %2592 = vmatprep.subr.bf16.mxu1 %v2579_v52 }
 0xe89   : > { %2593 = vmatpush1.bf16.msra.mxu1 %v2578_v38 }
 0xe8a   : > { %v2650_v41 = vpop.permute.xlu0 %2649  ;;  %v2656_v59 = vpop.permute.xlu1 %2655 }
 0xe8b   : > { %v2660_v54 = vsel %vm592_vm5, %v2650_v41, %v2652_v53 }
 0xe8c   : > { %3010 = vmatmul.mubr.msk.bf16.vlgmr.msra.gmra.mrb[16].mxu1 %vm436_vm3, %v3251_v3  ;;  %2673 = vmatprep.subr.bf16.mxu1 %v2660_v54 }
 0xe8d   : > { %2632 = vmatprep.mubr.bf16.mxu1 %v3407_v0 }
 0xe8e   : > { %v2648_v18 = vpop.permute.xlu0 %2647  ;;  %v2654_v62 = vpop.permute.xlu1 %2653 }
 0xe8f   : > { %v2659_v60 = vsel %vm592_vm5, %v2648_v18, %v2650_v41  ;;  %v2661_v5 = vsel %vm592_vm5, %v2654_v62, %v2656_v59 }
 0xe90   : > { %2674 = vmatpush1.bf16.msra.mxu1 %v2659_v60 }
 0xe92   : > { %v2658_v61 = vpop.permute.xlu0 %2657  ;;  %v2646_v30 = vpop.permute.xlu1 %2645 }
 0xe93   : > { %v2662_v4 = vsel %vm592_vm5, %v2656_v59, %v2658_v61 }
 0xe94   : > { %3011 = vmatmul.mubr.msk.bf16.gmra.mrb[20].mxu1 %vm436_vm3, %v4434_v19  ;;  %2675 = vmatprep.subr.bf16.mxu1 %v2662_v4 }
 0xe95   : > { %2676 = vmatpush1.bf16.msra.mxu1 %v2661_v5  ;;  %2705 = vmatprep.mubr.bf16.mxu1 %v3407_v0 }
 0xe96   : > { %v2644_v8 = vpop.permute.xlu0 %2643 }
 0xe9c   : > { %3012 = vmatmul.mubr.msk.bf16.vlgmr.msra.gmra.mrb[16].mxu1 %vm436_vm3, %v2644_v8 }
 0xe9d   : > { %2715 = vmatprep.mubr.bf16.mxu1 %v3407_v0 }
 0xea3   : > { %v2742_v9 = vpop.permute.xlu1 %2741 }
 0xea4   : > { %3013 = vmatmul.mubr.msk.bf16.gmra.mrb[20].mxu1 %vm436_vm3, %v2646_v30 }
 0xea7   : > { %v2737_v32 = vpop.permute.xlu0 %2736  ;;  %v2747_v43 = vpop.permute.xlu1 %2746 }
 0xeab   : > { %v2752_v31 = vpop.permute.xlu0 %2751 }
 0xf6f   : > { %v2707_v16 = vpop.f32.mrb[16].mxu1 }
 0xf70   : > { %v2754_v13 = vadd.f32 %v2737_v32, %v2707_v16  ;;  %v2709_v33 = vpop.f32.mrb[17].mxu1 }
 0xf71   : > { %v2755_v17 = vadd.f32 %v2737_v32, %v2709_v33  ;;  %v2711_v35 = vpop.f32.mrb[18].mxu1 }
 0xf72   : > { %v2762_v55 = vadd.f32 %v2754_v13, %v4240_v36  ;;  %v2756_v34 = vadd.f32 %v2742_v9, %v2711_v35  ;;  %v2713_v56 = vpop.f32.mrb[19].mxu1 }
 0xf73   : > { %v2763_v58 = vadd.f32 %v2755_v17, %v4243_v37  ;;  %v2757_v39 = vadd.f32 %v2742_v9, %v2713_v56 }
 0xf74   : > { %2778 = vrot.lane.b32.xlu1 %v2762_v55, %s3433_s13  ;;  %v2764_v0 = vadd.f32 %v2756_v34, %v4248_v42 }
 0xf75   : > { %2780 = vrot.lane.b32.xlu0 %v2763_v58, %s3433_s13  ;;  %v2765_v40 = vadd.f32 %v2757_v39, %v4253_v24 }
 0xf77   : > { %v2717_v63 = vpop.f32.mrb[20].mxu1 }
 0xf78   : > { %v2758_v28 = vadd.f32 %v2747_v43, %v2717_v63  ;;  %v2719_v1 = vpop.f32.mrb[21].mxu1  ;;  %2782 = vrot.lane.b32.xlu1 %v2764_v0, %s3433_s13 }
 0xf79   : > { %v2759_v2 = vadd.f32 %v2747_v43, %v2719_v1  ;;  %v2721_v36 = vpop.f32.mrb[22].mxu1  ;;  %2784 = vrot.lane.b32.xlu0 %v2765_v40, %s3433_s13 }
 0xf7a   : > { %v2766_v37 = vadd.f32 %v2758_v28, %v4270_v22  ;;  %v2760_v3 = vadd.f32 %v2752_v31, %v2721_v36  ;;  %v2723_v19 = vpop.f32.mrb[23].mxu1 }
 0xf7b   : > { %v2767_v14 = vadd.f32 %v2759_v2, %v4273_v21  ;;  %v2761_v42 = vadd.f32 %v2752_v31, %v2723_v19 }
 0xf7c   : > { %2786 = vrot.lane.b32.xlu1 %v2766_v37, %s3433_s13  ;;  %v2768_v24 = vadd.f32 %v2760_v3, %v4278_v49 }
 0xf7d   : > { %2788 = vrot.lane.b32.xlu0 %v2767_v14, %s3433_s13  ;;  %v2769_v44 = vadd.f32 %v2761_v42, %v4283_v57 }
 0xf80   : > { %2790 = vrot.lane.b32.xlu1 %v2768_v24, %s3433_s13 }
 0xf81   : > { %2792 = vrot.lane.b32.xlu0 %v2769_v44, %s3433_s13 }
 0xfe6   : > { %v2779_v22 = vpop.permute.xlu1 %2778 }
 0xfe7   : > { %v2781_v20 = vpop.permute.xlu0 %2780 }
 0xfe8   : > { %v2795_v45 = vsel %vm2794_vm0, %v2779_v22, %v2781_v20 }
 0xfe9   : > { %2803 = vst [vmem:[%s3618_s9] sm:$0xff] %v2795_v45 }
 0xfea   : > { %v2783_v21 = vpop.permute.xlu1 %2782 }
 0xfeb   : > { %v2785_v23 = vpop.permute.xlu0 %2784 }
 0xfec   : > { %v2796_v49 = vsel %vm2794_vm0, %v2783_v21, %v2785_v23 }
 0xfed   : > { %2804 = vst [vmem:[%s3618_s9 + $0x8] sm:$0xff] %v2796_v49 }
 0xfee   : > { %v2787_v57 = vpop.permute.xlu1 %2786 }
 0xfef   : > { %v2789_v25 = vpop.permute.xlu0 %2788 }
 0xff0   : > { %v2797_v26 = vsel %vm2794_vm0, %v2787_v57, %v2789_v25 }
 0xff1   : > { %2805 = vst [vmem:[%s3618_s9 + $0x10] sm:$0xff] %v2797_v26 }
 0xff2   : > { %v2791_v46 = vpop.permute.xlu1 %2790 }
 0xff3   : > { %v2793_v6 = vpop.permute.xlu0 %2792 }
 0xff4   : > { %v2798_v7 = vsel %vm2794_vm0, %v2791_v46, %v2793_v6 }
 0xff5   : > { %2806 = vst [vmem:[%s3618_s9 + $0x18] sm:$0xff] %v2798_v7 }
 0xff6   : > { %3322 = shalt.err (!%p3319_p2)
}
 0xff7   : > { %s3323_s9 = scalar_lea.hbm %s4500_s16, 512  ;;  %s3327_s8 = scalar_lea.hbm %s4565_s5, 3072 }
 0xff8   : > { %p3324_p4 = scmp.ne.s32.totalorder %s4500_s16, %s3323_s9  ;;  %p3328_p9 = scmp.lt.u32.totalorder %s4500_s16, %s4565_s5 }
 0xff9   : > { %p3329_p5 = scmp.lt.u32.totalorder %s3327_s8, %s3323_s9  ;;  %p3331_p11 = scmp.lt.u32.totalorder %s3323_s9, %s4500_s16 }
 0xffa   : > { %p3325_p6 = pnand %p3324_p4, %p4613_p0 }
 0xffb   : > { %p3330_p10 = por %p3329_p5, %p3328_p9 }
 0xffc   : > { %p3326_p7 = pneg %p3325_p6 }
 0xffd   : > { %p3332_p3 = por %p3331_p11, %p3330_p10 }
 0xfff   : > { %p3333_p8 = pnand %p3332_p3, %p3326_p7 }
0x1001   : > { %3336 = shalt.err (!%p3333_p8)
}
0x1002   : > { %s3435_s28 = smov 128   ;;  %s3436_s23 = smov 384  }
0x1003   : > { %s3437_s13 = smov 8  }
0x1004   : > { %3126 = dma.vmem_to_hbm [thread:$0]  (%p4613_p0), %s4502_s26, 512, %s4500_s16, %s4508_s30, %s3435_s28, %s3436_s23, %s3437_s13  }
0x1005 PF: > { %s4614_s11 = sld [smem:[#allocation11_spill]]  ;;  %s4615_s14 = sld [smem:[#allocation17_spill]] }
0x1006   : > { %p3134_p1 = scmp.ge.s32.totalorder %s3405_s25, 2 }
0x100b   : > { %s2837_s12 = sand.u32 1, %s4614_s11   ;;  %p4616_p13 = scmp.ne.s32.totalorder %s4615_s14, 0 }
0x100c   : > { %s2838_s22 = scalar_lea.sflag [#allocation6], %s2837_s12 }
0x100d   : > { %p3129_p12 = pnand %p3134_p1, %p4616_p13 }
0x100f   : > { %3372 = dma.done.wait (!%p3129_p12), %s2838_s22, 512  }
0x1010   : > { %3374 = vsyncadd (!%p3129_p12), %s2838_s22, 4294966784  ;;  %s18_s25 = sadd.s32 1, %s3405_s25   ;;  %s4617_s20 = sld [smem:[#allocation12_spill]] }
0x1011   : > { %p15_p2 = scmp.ge.s32.totalorder %s18_s25, 8   ;;  %s4618_s21 = sld [smem:[#allocation18_spill]] }
0x1012   : > { %s4619_s27 = sld [smem:[#allocation13_spill]]  ;;  %s4620_s22 = sld [smem:[#allocation14_spill]] }
0x1013   : > { %s4621_s23 = sld [smem:[#allocation15_spill]]  ;;  %s4622_s24 = sld [smem:[#allocation16_spill]] }
0x1014   : > { %s4623_s18 = smov %s3381_s19  ;;  %17 = sbr.rel (!%p15_p2) target bundleno = 5 (0x5), region = 139 }
0x1016   : > { %s4624_s19 = smov %s4617_s20 }
0x1017   : > { %s4625_s20 = smov %s4618_s21 }
0x1018   : > { %s4626_s21 = smov %s4619_s27 }
0x101b   :  { %2843 = vsyncpa [#allocation6], 1 }
0x101c   :  { %2845 = vsyncpa [#allocation6 + $0x1], 1 }
0x101d   :  { %2846 = vsyncmov [#allocation4] }
0x1020   :  { %s2847_s6 = vpop.sfrf %2846 }
0x1021   :  { %p3018_p0 = scmp.ne.s32.totalorder %s2847_s6, 0 }
0x1023   :  { %2851 = shalt.err (%p3018_p0)  }
0x1024   :  { %2853 = vsyncmov [#allocation4 + $0x1] }
0x1027   :  { %s2854_s26 = vpop.sfrf %2853 }
0x1028   :  { %p3019_p4 = scmp.ne.s32.totalorder %s2854_s26, 0 }
0x102a   :  { %2858 = shalt.err (%p3019_p4)  }

</bundles_post_ra>
